<compile_context>
chip_gen: v6e
topology: v6e:2x2x1
jax: 0.10.0
libtpu: 0.0.40
codegen_flags: <defaults>
</compile_context>

<pallas_src>
import functools
import math

import jax
import jax.numpy as jnp
from jax import lax
from jax.experimental import pallas as pl
from jax.experimental.pallas import tpu as pltpu


# ----------------------------------------------------------------------------
# helpers
# ----------------------------------------------------------------------------
def _softmax(x, axis):
    x = x - jnp.max(x, axis=axis, keepdims=True)
    e = jnp.exp(x)
    return e / jnp.sum(e, axis=axis, keepdims=True)


def _sigmoid_fast(x):
    # exp (EUP) + approximate reciprocal (EUP slot): keeps the serial GRU cell
    # off the VPU divide path.
    return pl.reciprocal(1.0 + jnp.exp(-x), approx=True)


def _interleave_gate_cols(f, b, H):
    """[*, 3H] (r|z|n) per direction -> [*, 6H] columns [r_f r_b z_f z_b n_f n_b]."""
    return jnp.concatenate([f[:, 0:H], b[:, 0:H],
                            f[:, H:2 * H], b[:, H:2 * H],
                            f[:, 2 * H:], b[:, 2 * H:]], axis=1)


# ----------------------------------------------------------------------------
# Kernel 1: bidirectional GRU (encoder RNN and gru_agg).
#   x (flattened [T*B, I]) -> y: [T, B, 2H]  (fwd in [..., :H], bwd in [..., H:])
#   Exact nn.GRU cell math (both directions in one interleaved [B, 2H] slab):
#     r = sig(Wir x + bir + Whr h + bhr); z = sig(...);
#     n = tanh(Win x + bin + r*(Whn h + bhn)); h' = n + z*(h - n)
# ----------------------------------------------------------------------------
def _bigru_kernel(x_ref, wih_ref, bih_ref, whh_ref, bhh_ref, y_ref,
                  hf_ref, hb_ref, *, T, B, H):
    # (1) Hoisted input projection for BOTH directions: one [T*B, I] @ [I, 6H]
    #     matmul with the input biases folded in.  No scatter loop / scratch.
    # TODO(synk): cast MXU operands to bf16 on v6e/v7x (keep f32 accumulate).
    gx = (jnp.dot(x_ref[...], wih_ref[...], preferred_element_type=jnp.float32)
          + bih_ref[...])                                          # [T*B, 6H]

    whh = whh_ref[...]                                             # [2H, 6H]
    bhh = jnp.broadcast_to(bhh_ref[...], (B, 6 * H))               # hoisted broadcast

    # Hoisted column selector: gate blocks 0/2/4 are forward (consume x_t),
    # blocks 1/3/5 are backward (consume x_{T-1-t}).
    col = lax.broadcasted_iota(jnp.int32, (B, 6 * H), 1)
    is_fwd_col = ((col < H)
                  | ((col >= 2 * H) & (col < 3 * H))
                  | ((col >= 4 * H) & (col < 5 * H)))

    h = jnp.zeros((B, 2 * H), jnp.float32)                         # carry [hf | hb]
    # TODO(synk): for large T use lax.fori_loop with a partial unroll (and a gx
    # VMEM scratch / time-chunked pipeline) to bound code size and vreg pressure.
    for t in range(T):                                             # static full unroll
        gx_f = gx[t * B:(t + 1) * B]                               # gates of x_t
        gx_b = gx[(T - 1 - t) * B:(T - t) * B]                     # gates of x_{T-1-t}
        gx_t = jnp.where(is_fwd_col, gx_f, gx_b)                   # one vselect / step

        # (2) single fused recurrent matmul for both directions.
        # TODO(synk): split into two per-direction matmuls once 2H exceeds one
        # MXU K-tile (the zero blocks waste MXU pushes at real hidden sizes).
        gh = jnp.dot(h, whh, preferred_element_type=jnp.float32) + bhh

        r = _sigmoid_fast(gx_t[:, :2 * H] + gh[:, :2 * H])
        z = _sigmoid_fast(gx_t[:, 2 * H:4 * H] + gh[:, 2 * H:4 * H])
        n = jnp.tanh(gx_t[:, 4 * H:] + r * gh[:, 4 * H:])
        h = n + z * (h - n)                                        # == (1-z)*n + z*h

        hf_ref[t] = h[:, :H]                                       # fwd state @ time t
        hb_ref[T - 1 - t] = h[:, H:]                               # bwd state @ time T-1-t

    # (3) Dense whole-buffer writebacks (no per-step masked output stores).
    y_ref[:, :, :H] = hf_ref[...]
    y_ref[:, :, H:] = hb_ref[...]


def bigru(x, p):
    """x: [T, B, I] (recurrence over the leading axis) -> [T, B, 2H]."""
    T, B, I = x.shape
    H = p["whh_f"].shape[0]
    f32 = jnp.float32

    # fused, per-gate-interleaved weights / biases
    wih = _interleave_gate_cols(p["wih_f"], p["wih_b"], H)          # [I, 6H]
    bih = _interleave_gate_cols(p["bih_f"], p["bih_b"], H)          # [1, 6H]
    bhh = _interleave_gate_cols(p["bhh_f"], p["bhh_b"], H)          # [1, 6H]
    # recurrent block matrix [2H, 6H]: hf rows feed only forward gate columns,
    # hb rows feed only backward gate columns.
    z3 = jnp.zeros((H, 3 * H), f32)
    whh = jnp.concatenate([_interleave_gate_cols(p["whh_f"], z3, H),
                           _interleave_gate_cols(z3, p["whh_b"], H)], axis=0)

    x2d = x.reshape(T * B, I)                     # row-major collapse: free in XLA
    vmem = pl.BlockSpec(memory_space=pltpu.MemorySpace.VMEM)
    kernel = functools.partial(_bigru_kernel, T=T, B=B, H=H)
    # TODO(synk): at production T/B/H add a grid over T + explicit
    # vmem_limit_bytes (v7x: 64 MiB physical) and shard the two directions /
    # the batch across the two v7x TensorCores.
    return pl.pallas_call(
        kernel,
        in_specs=[vmem] * 5,
        out_specs=vmem,
        out_shape=jax.ShapeDtypeStruct((T, B, 2 * H), f32),
        scratch_shapes=[pltpu.VMEM((T, B, H), f32),   # forward history
                        pltpu.VMEM((T, B, H), f32)],  # backward history
    )(x2d, wih, bih, whh, bhh)


# ----------------------------------------------------------------------------
# Kernel 2: self-attentive pooling + self.att projection (single invocation).
#   outp: [B, L, 2E];  A = softmax_L(ws2(tanh(ws1(outp))))      -> [B, L, hops]
#   M = A^T @ outp  ([B, hops, 2E]);  attention_out = M @ Watt  -> [B, hops, S]
#   alphas ([B, L, hops]) is exactly out_hidden.transpose(1,2) fed to gru_agg.
# ----------------------------------------------------------------------------
def _selfattn_kernel(o_ref, ws1_ref, ws2_ref, watt_ref, alphas_ref, att_ref):
    B = o_ref.shape[0]
    ws1 = ws1_ref[...]
    ws2 = ws2_ref[...]
    watt = watt_ref[...]
    alphas, atts = [], []
    # TODO(synk): at larger B, batch the ws1/ws2 projections over the flattened
    # [B*L, 2E] rows before this loop (bigger MXU M-tiles).
    for b in range(B):                                    # static unroll; weights staged once
        o_b = o_ref[b]                                                   # [L, 2E]
        hbar = jnp.tanh(jnp.dot(o_b, ws1,
                                preferred_element_type=jnp.float32))     # [L, A]
        sm = _softmax(jnp.dot(hbar, ws2,
                              preferred_element_type=jnp.float32), axis=0)  # [L, hops]
        # M[hop, :] = sum_l sm[l, hop] * o_b[l, :]
        m = lax.dot_general(sm, o_b, (((0,), (0,)), ((), ())),
                            preferred_element_type=jnp.float32)          # [hops, 2E]
        alphas.append(sm)
        atts.append(jnp.dot(m, watt, preferred_element_type=jnp.float32))  # [hops, S]
    # single dense writeback per output (no per-b lane-masked stores)
    alphas_ref[...] = jnp.stack(alphas, axis=0)
    att_ref[...] = jnp.stack(atts, axis=0)


def self_attentive(outp, ws1, ws2, watt):
    B, L, _ = outp.shape
    hops = ws2.shape[1]
    S = watt.shape[1]
    vmem = pl.BlockSpec(memory_space=pltpu.MemorySpace.VMEM)
    return pl.pallas_call(
        _selfattn_kernel,
        in_specs=[vmem] * 4,
        out_specs=(vmem, vmem),
        out_shape=(jax.ShapeDtypeStruct((B, L, hops), jnp.float32),
                   jax.ShapeDtypeStruct((B, hops, S), jnp.float32)),
    )(outp, ws1, ws2, watt)


# ----------------------------------------------------------------------------
# Kernel 3: prediction head (single invocation over all `len` slices).
#   g = agg[l] : [B, 2S]
#   sj = vp(tanh(Wp(g)))                        [B, S]
#   rp = softmax_B(sj^T) @ g                    [S, 2S]
#   out = Wc(rp)                                [S, labels]
#   rc^T = softmax_S(out)                       [S, labels]
#   score[l] = softmax_C(Wpred^T contracted with rc^T)  -> [C, labels]
#   (emits the final PyTorch layout [len, class_number, labels] directly)
# ----------------------------------------------------------------------------
def _pred_kernel(agg_ref, wp_ref, vp_ref, wc_ref, wpr_ref, score_ref):
    L = agg_ref.shape[0]
    Wp = wp_ref[...]
    Vp = vp_ref[...]
    Wc = wc_ref[...]
    Wpr = wpr_ref[...]
    scores = []
    # TODO(synk): at larger L, batch the Wp/vp projection over the flattened
    # [L*B, 2S] rows before this loop.
    for l in range(L):                                    # static unroll; weights staged once
        g = agg_ref[l]                                                    # [B, 2S]
        sj = jnp.dot(jnp.tanh(jnp.dot(g, Wp,
                                      preferred_element_type=jnp.float32)),
                     Vp, preferred_element_type=jnp.float32)              # [B, S]
        p = _softmax(sj, axis=0)                # softmax over batch (PyTorch dim 2)
        rp = lax.dot_general(p, g, (((0,), (0,)), ((), ())),
                             preferred_element_type=jnp.float32)          # [S, 2S]
        out = jnp.dot(rp, Wc, preferred_element_type=jnp.float32)         # [S, labels]
        rcT = _softmax(out, axis=0)             # rc^T: softmax over S
        # score_pre[c, j] = sum_s Wpred[s, c] * rc^T[s, j]
        pred = lax.dot_general(Wpr, rcT, (((0,), (0,)), ((), ())),
                               preferred_element_type=jnp.float32)        # [C, labels]
        scores.append(_softmax(pred, axis=0))   # softmax over class dim
    score_ref[...] = jnp.stack(scores, axis=0)  # one dense [L, C, labels] store


def prediction_head(agg, Wp, Vp, Wc, Wpred):
    L, _, _ = agg.shape
    labels = Wc.shape[1]
    C = Wpred.shape[1]
    vmem = pl.BlockSpec(memory_space=pltpu.MemorySpace.VMEM)
    return pl.pallas_call(
        _pred_kernel,
        in_specs=[vmem] * 5,
        out_specs=vmem,
        out_shape=jax.ShapeDtypeStruct((L, C, labels), jnp.float32),
    )(agg, Wp, Vp, Wc, Wpred)


# ----------------------------------------------------------------------------
# Full forward pass (glue in plain JAX; hot paths in the kernels above).
# ----------------------------------------------------------------------------
def sabirnn_forward(inp, hidden, params):
    del hidden  # init_hidden() is zeros; the BiGRU kernels start from h0 = 0.
    # --- encoder: embedding gathered directly time-major + BiGRU ---
    emb = jnp.take(params["embedding"], inp.T, axis=0)       # [len, bsz, E]
    outp_tb = bigru(emb, params["enc_gru"])                  # [len, bsz, 2E]
    # TODO(synk): fold this layout-only transpose into the attention kernel via
    # sublane-strided reads (o_ref[:, b, :]) at production shapes.
    outp = jnp.transpose(outp_tb, (1, 0, 2))                 # [bsz, len, 2E]

    # --- self-attentive pooling + self.att (dropouts are identity) ---
    alphas_t, attention = self_attentive(
        outp, params["ws1"], params["ws2"], params["watt"])
    # alphas_t == out_hidden.transpose(1,2): [bsz, len, hops]
    # attention == self.att(drop_out(M)):    [bsz, hops, seperate_hops]

    # --- gru_agg over the attention distributions (seq dim = bsz) ---
    agg = bigru(alphas_t, params["agg_gru"])                 # [bsz, len, 2S]
    # TODO(synk): same — read agg[:, l, :] inside the prediction kernel instead.
    agg_lb = jnp.transpose(agg, (1, 0, 2))                   # [len, bsz, 2S]

    # --- prediction layer (emits [len, class_number, labels] directly) ---
    score = prediction_head(agg_lb, params["Wp"], params["vp"],
                            params["Wc"], params["Wpred"])
    return score, attention


# ----------------------------------------------------------------------------
# Deterministic parameter initialization (PyTorch-default-like uniforms).
# ----------------------------------------------------------------------------
def init_params(key, cfg):
    E = cfg["emb_size"]
    A = cfg["attention_unit"]
    hops = cfg["attention_hops"]
    S = cfg["seperate_hops"]
    labels = cfg["labels"]
    C = cfg["class_number"]
    V = cfg["vocab"]
    # self.att is Linear(emb_size*nlayers, S); its input M has 2*emb_size
    # features, so the module is only shape-consistent when nlayers == 2.
    assert cfg["nlayers"] == 2, "self.att sizing requires nlayers == 2"
    keys = iter(jax.random.split(key, 32))

    def u(shape, fan_in):
        k = 1.0 / math.sqrt(float(fan_in))
        return jax.random.uniform(next(keys), shape, jnp.float32, -k, k)

    def gru_params(I, H):
        return dict(
            wih_f=u((I, 3 * H), H), whh_f=u((H, 3 * H), H),
            bih_f=u((1, 3 * H), H), bhh_f=u((1, 3 * H), H),
            wih_b=u((I, 3 * H), H), whh_b=u((H, 3 * H), H),
            bih_b=u((1, 3 * H), H), bhh_b=u((1, 3 * H), H))

    return dict(
        embedding=jax.random.normal(next(keys), (V, E), jnp.float32),
        enc_gru=gru_params(E, E),                       # encoder BiGRU, hidden = emb_size
        ws1=u((2 * E, A), 2 * E),                       # Linear(2E -> attention_unit), no bias
        ws2=u((A, hops), A),                            # Linear(attention_unit -> hops), no bias
        watt=u((E * cfg["nlayers"], S), E * cfg["nlayers"]),   # self.att
        agg_gru=gru_params(hops, S),                    # self.gru_agg
        Wp=u((2 * S, S), 2 * S),                        # self.Wp
        vp=u((S, S), S),                                # self.vp
        Wc=u((2 * S, labels), 2 * S),                   # self.Wc
        Wpred=u((S, C), S),                             # self.prediction
    )


if __name__ == "__main__":
    cfg = dict(emb_size=16, nlayers=2, attention_unit=16, attention_hops=4,
               seperate_hops=8, labels=3, class_number=5, vocab=20,
               bsz=2, seq_len=8)

    key = jax.random.PRNGKey(0)
    pkey, ikey = jax.random.split(key)
    params = init_params(pkey, cfg)

    inp = jax.random.randint(ikey, (cfg["bsz"], cfg["seq_len"]),
                             0, cfg["vocab"], dtype=jnp.int32)
    hidden = jnp.zeros((2 * cfg["nlayers"], cfg["bsz"], cfg["emb_size"]),
                       jnp.float32)   # encoder.init_hidden(bsz) -> zeros

    forward = jax.jit(sabirnn_forward)
    score, attention = forward(inp, hidden, params)
    jax.block_until_ready((score, attention))

    assert score.shape == (cfg["seq_len"], cfg["class_number"], cfg["labels"])
    assert attention.shape == (cfg["bsz"], cfg["attention_hops"],
                               cfg["seperate_hops"])
    assert bool(jnp.all(jnp.isfinite(score))) and bool(jnp.all(jnp.isfinite(attention)))
    # score columns are softmax over the class dim -> each (l, :, j) sums to 1
    assert bool(jnp.allclose(jnp.sum(score, axis=1), 1.0, atol=1e-5))
    print("KERNEL_OK")
</pallas_src>

<mosaic_0001>
module attributes {stable_mosaic.version = 11 : i64} {
  func.func @_selfattn_kernel(%arg0: memref<2x8x32xf32, #tpu.memory_space<vmem>>, %arg1: memref<32x16xf32, #tpu.memory_space<vmem>>, %arg2: memref<16x4xf32, #tpu.memory_space<vmem>>, %arg3: memref<32x8xf32, #tpu.memory_space<vmem>>, %arg4: memref<2x8x4xf32, #tpu.memory_space<vmem>>, %arg5: memref<2x4x8xf32, #tpu.memory_space<vmem>>) attributes {dimension_semantics = [], scalar_prefetch = 0 : i64, scratch_operands = 0 : i64, tpu.core_type = #tpu.core_type<tc>} {
    %c0 = arith.constant 0 : index
    %c0_0 = arith.constant 0 : index
    %0 = vector.load %arg1[%c0, %c0_0] : memref<32x16xf32, #tpu.memory_space<vmem>>, vector<32x16xf32>
    %c0_1 = arith.constant 0 : index
    %c0_2 = arith.constant 0 : index
    %1 = vector.load %arg2[%c0_1, %c0_2] : memref<16x4xf32, #tpu.memory_space<vmem>>, vector<16x4xf32>
    %c0_3 = arith.constant 0 : index
    %c0_4 = arith.constant 0 : index
    %2 = vector.load %arg3[%c0_3, %c0_4] : memref<32x8xf32, #tpu.memory_space<vmem>>, vector<32x8xf32>
    %c0_5 = arith.constant 0 : index
    %c0_6 = arith.constant 0 : index
    %c0_7 = arith.constant 0 : index
    %3 = vector.load %arg0[%c0_5, %c0_6, %c0_7] : memref<2x8x32xf32, #tpu.memory_space<vmem>>, vector<1x8x32xf32>
    %4 = vector.shape_cast %3 : vector<1x8x32xf32> to vector<8x32xf32>
    %cst = arith.constant dense<0.000000e+00> : vector<8x16xf32>
    %5 = tpu.matmul %4, %0, %cst {dimension_numbers = #tpu.dot_dimension_numbers<[1], [0], [0], [1], [0, 0, 1, 1], [], []>} : vector<8x32xf32>, vector<32x16xf32>, vector<8x16xf32> -> vector<8x16xf32>
    %6 = math.tanh %5 : vector<8x16xf32>
    %cst_8 = arith.constant dense<0.000000e+00> : vector<8x4xf32>
    %7 = tpu.matmul %6, %1, %cst_8 {dimension_numbers = #tpu.dot_dimension_numbers<[1], [0], [0], [1], [0, 0, 1, 1], [], []>} : vector<8x16xf32>, vector<16x4xf32>, vector<8x4xf32> -> vector<8x4xf32>
    %cst_9 = arith.constant dense<0xFF800000> : vector<4xf32>
    %8 = vector.multi_reduction <maximumf>, %7, %cst_9 [0] : vector<8x4xf32> to vector<4xf32>
    %9 = vector.shape_cast %8 : vector<4xf32> to vector<1x4xf32>
    %10 = vector.broadcast %9 : vector<1x4xf32> to vector<8x4xf32>
    %11 = arith.subf %7, %10 : vector<8x4xf32>
    %12 = math.exp %11 : vector<8x4xf32>
    %cst_10 = arith.constant dense<0.000000e+00> : vector<4xf32>
    %13 = vector.multi_reduction <add>, %12, %cst_10 [0] : vector<8x4xf32> to vector<4xf32>
    %14 = vector.shape_cast %13 : vector<4xf32> to vector<1x4xf32>
    %15 = vector.broadcast %14 : vector<1x4xf32> to vector<8x4xf32>
    %16 = arith.divf %12, %15 : vector<8x4xf32>
    %cst_11 = arith.constant dense<0.000000e+00> : vector<4x32xf32>
    %17 = tpu.matmul %16, %4, %cst_11 {dimension_numbers = #tpu.dot_dimension_numbers<[0], [0], [1], [1], [0, 1, 1, 1], [], []>} : vector<8x4xf32>, vector<8x32xf32>, vector<4x32xf32> -> vector<4x32xf32>
    %cst_12 = arith.constant dense<0.000000e+00> : vector<4x8xf32>
    %18 = tpu.matmul %17, %2, %cst_12 {dimension_numbers = #tpu.dot_dimension_numbers<[1], [0], [0], [1], [0, 0, 1, 1], [], []>} : vector<4x32xf32>, vector<32x8xf32>, vector<4x8xf32> -> vector<4x8xf32>
    %c1 = arith.constant 1 : index
    %c0_13 = arith.constant 0 : index
    %c0_14 = arith.constant 0 : index
    %19 = vector.load %arg0[%c1, %c0_13, %c0_14] : memref<2x8x32xf32, #tpu.memory_space<vmem>>, vector<1x8x32xf32>
    %20 = vector.shape_cast %19 : vector<1x8x32xf32> to vector<8x32xf32>
    %cst_15 = arith.constant dense<0.000000e+00> : vector<8x16xf32>
    %21 = tpu.matmul %20, %0, %cst_15 {dimension_numbers = #tpu.dot_dimension_numbers<[1], [0], [0], [1], [0, 0, 1, 1], [], []>} : vector<8x32xf32>, vector<32x16xf32>, vector<8x16xf32> -> vector<8x16xf32>
    %22 = math.tanh %21 : vector<8x16xf32>
    %cst_16 = arith.constant dense<0.000000e+00> : vector<8x4xf32>
    %23 = tpu.matmul %22, %1, %cst_16 {dimension_numbers = #tpu.dot_dimension_numbers<[1], [0], [0], [1], [0, 0, 1, 1], [], []>} : vector<8x16xf32>, vector<16x4xf32>, vector<8x4xf32> -> vector<8x4xf32>
    %cst_17 = arith.constant dense<0xFF800000> : vector<4xf32>
    %24 = vector.multi_reduction <maximumf>, %23, %cst_17 [0] : vector<8x4xf32> to vector<4xf32>
    %25 = vector.shape_cast %24 : vector<4xf32> to vector<1x4xf32>
    %26 = vector.broadcast %25 : vector<1x4xf32> to vector<8x4xf32>
    %27 = arith.subf %23, %26 : vector<8x4xf32>
    %28 = math.exp %27 : vector<8x4xf32>
    %cst_18 = arith.constant dense<0.000000e+00> : vector<4xf32>
    %29 = vector.multi_reduction <add>, %28, %cst_18 [0] : vector<8x4xf32> to vector<4xf32>
    %30 = vector.shape_cast %29 : vector<4xf32> to vector<1x4xf32>
    %31 = vector.broadcast %30 : vector<1x4xf32> to vector<8x4xf32>
    %32 = arith.divf %28, %31 : vector<8x4xf32>
    %cst_19 = arith.constant dense<0.000000e+00> : vector<4x32xf32>
    %33 = tpu.matmul %32, %20, %cst_19 {dimension_numbers = #tpu.dot_dimension_numbers<[0], [0], [1], [1], [0, 1, 1, 1], [], []>} : vector<8x4xf32>, vector<8x32xf32>, vector<4x32xf32> -> vector<4x32xf32>
    %cst_20 = arith.constant dense<0.000000e+00> : vector<4x8xf32>
    %34 = tpu.matmul %33, %2, %cst_20 {dimension_numbers = #tpu.dot_dimension_numbers<[1], [0], [0], [1], [0, 0, 1, 1], [], []>} : vector<4x32xf32>, vector<32x8xf32>, vector<4x8xf32> -> vector<4x8xf32>
    %35 = vector.shape_cast %16 : vector<8x4xf32> to vector<1x8x4xf32>
    %36 = vector.shape_cast %32 : vector<8x4xf32> to vector<1x8x4xf32>
    %37 = tpu.concatenate %35, %36 in 0 : vector<1x8x4xf32>, vector<1x8x4xf32> -> vector<2x8x4xf32>
    %c0_21 = arith.constant 0 : index
    %c0_22 = arith.constant 0 : index
    %c0_23 = arith.constant 0 : index
    %38 = vector.load %arg4[%c0_21, %c0_22, %c0_23] : memref<2x8x4xf32, #tpu.memory_space<vmem>>, vector<2x8x4xf32>
    tpu.vector_store %arg4[%c0_21, %c0_22, %c0_23], %37 {strides = array<i32>} : memref<2x8x4xf32, #tpu.memory_space<vmem>>, vector<2x8x4xf32>,
    %39 = vector.shape_cast %18 : vector<4x8xf32> to vector<1x4x8xf32>
    %40 = vector.shape_cast %34 : vector<4x8xf32> to vector<1x4x8xf32>
    %41 = tpu.concatenate %39, %40 in 0 : vector<1x4x8xf32>, vector<1x4x8xf32> -> vector<2x4x8xf32>
    %c0_24 = arith.constant 0 : index
    %c0_25 = arith.constant 0 : index
    %c0_26 = arith.constant 0 : index
    %42 = vector.load %arg5[%c0_24, %c0_25, %c0_26] : memref<2x4x8xf32, #tpu.memory_space<vmem>>, vector<2x4x8xf32>
    tpu.vector_store %arg5[%c0_24, %c0_25, %c0_26], %41 {strides = array<i32>} : memref<2x4x8xf32, #tpu.memory_space<vmem>>, vector<2x4x8xf32>,
    return
  }
}

module attributes {stable_mosaic.version = 11 : i64} {
  func.func @_bigru_kernel(%arg0: memref<16x16xf32, #tpu.memory_space<vmem>>, %arg1: memref<16x96xf32, #tpu.memory_space<vmem>>, %arg2: memref<1x96xf32, #tpu.memory_space<vmem>>, %arg3: memref<32x96xf32, #tpu.memory_space<vmem>>, %arg4: memref<1x96xf32, #tpu.memory_space<vmem>>, %arg5: memref<8x2x32xf32, #tpu.memory_space<vmem>>, %arg6: memref<8x2x16xf32, #tpu.memory_space<vmem>>, %arg7: memref<8x2x16xf32, #tpu.memory_space<vmem>>) attributes {dimension_semantics = [], scalar_prefetch = 0 : i64, scratch_operands = 2 : i64, tpu.core_type = #tpu.core_type<tc>} {
    %c0 = arith.constant 0 : index
    %c0_0 = arith.constant 0 : index
    %0 = vector.load %arg0[%c0, %c0_0] : memref<16x16xf32, #tpu.memory_space<vmem>>, vector<16x16xf32>
    %c0_1 = arith.constant 0 : index
    %c0_2 = arith.constant 0 : index
    %1 = vector.load %arg1[%c0_1, %c0_2] : memref<16x96xf32, #tpu.memory_space<vmem>>, vector<16x96xf32>
    %cst = arith.constant dense<0.000000e+00> : vector<16x96xf32>
    %2 = tpu.matmul %0, %1, %cst {dimension_numbers = #tpu.dot_dimension_numbers<[1], [0], [0], [1], [0, 0, 1, 1], [], []>} : vector<16x16xf32>, vector<16x96xf32>, vector<16x96xf32> -> vector<16x96xf32>
    %c0_3 = arith.constant 0 : index
    %c0_4 = arith.constant 0 : index
    %3 = vector.load %arg2[%c0_3, %c0_4] : memref<1x96xf32, #tpu.memory_space<vmem>>, vector<1x96xf32>
    %4 = vector.broadcast %3 : vector<1x96xf32> to vector<16x96xf32>
    %5 = arith.addf %2, %4 : vector<16x96xf32>
    %c0_5 = arith.constant 0 : index
    %c0_6 = arith.constant 0 : index
    %6 = vector.load %arg3[%c0_5, %c0_6] : memref<32x96xf32, #tpu.memory_space<vmem>>, vector<32x96xf32>
    %c0_7 = arith.constant 0 : index
    %c0_8 = arith.constant 0 : index
    %7 = vector.load %arg4[%c0_7, %c0_8] : memref<1x96xf32, #tpu.memory_space<vmem>>, vector<1x96xf32>
    %8 = vector.shape_cast %7 : vector<1x96xf32> to vector<1x96xf32>
    %9 = vector.broadcast %8 : vector<1x96xf32> to vector<2x96xf32>
    %10 = tpu.iota {dimensions = array<i32: 1>} : vector<2x96xi32>
    %c16_i32 = arith.constant 16 : i32
    %11 = vector.broadcast %c16_i32 : i32 to vector<2x96xi32>
    %12 = arith.cmpi slt, %10, %11 : vector<2x96xi32>
    %c32_i32 = arith.constant 32 : i32
    %13 = vector.broadcast %c32_i32 : i32 to vector<2x96xi32>
    %14 = arith.cmpi sge, %10, %13 : vector<2x96xi32>
    %c48_i32 = arith.constant 48 : i32
    %15 = vector.broadcast %c48_i32 : i32 to vector<2x96xi32>
    %16 = arith.cmpi slt, %10, %15 : vector<2x96xi32>
    %17 = arith.andi %14, %16 : vector<2x96xi1>
    %18 = arith.ori %12, %17 : vector<2x96xi1>
    %c64_i32 = arith.constant 64 : i32
    %19 = vector.broadcast %c64_i32 : i32 to vector<2x96xi32>
    %20 = arith.cmpi sge, %10, %19 : vector<2x96xi32>
    %c80_i32 = arith.constant 80 : i32
    %21 = vector.broadcast %c80_i32 : i32 to vector<2x96xi32>
    %22 = arith.cmpi slt, %10, %21 : vector<2x96xi32>
    %23 = arith.andi %20, %22 : vector<2x96xi1>
    %24 = arith.ori %18, %23 : vector<2x96xi1>
    %cst_9 = arith.constant 0.000000e+00 : f32
    %25 = vector.broadcast %cst_9 : f32 to vector<2x32xf32>
    %26 = vector.extract_strided_slice %5 {offsets = [0, 0], sizes = [2, 96], strides = [1, 1]} : vector<16x96xf32> to vector<2x96xf32>
    %27 = vector.extract_strided_slice %5 {offsets = [14, 0], sizes = [2, 96], strides = [1, 1]} : vector<16x96xf32> to vector<2x96xf32>
    %28 = arith.select %24, %26, %27 : vector<2x96xi1>, vector<2x96xf32>
    %cst_10 = arith.constant dense<0.000000e+00> : vector<2x96xf32>
    %29 = tpu.matmul %25, %6, %cst_10 {dimension_numbers = #tpu.dot_dimension_numbers<[1], [0], [0], [1], [0, 0, 1, 1], [], []>} : vector<2x32xf32>, vector<32x96xf32>, vector<2x96xf32> -> vector<2x96xf32>
    %30 = arith.addf %29, %9 : vector<2x96xf32>
    %31 = vector.extract_strided_slice %28 {offsets = [0, 0], sizes = [2, 32], strides = [1, 1]} : vector<2x96xf32> to vector<2x32xf32>
    %32 = vector.extract_strided_slice %30 {offsets = [0, 0], sizes = [2, 32], strides = [1, 1]} : vector<2x96xf32> to vector<2x32xf32>
    %33 = arith.addf %31, %32 : vector<2x32xf32>
    %cst_11 = arith.constant 0.000000e+00 : f32
    %34 = vector.broadcast %cst_11 : f32 to vector<2x32xf32>
    %35 = arith.subf %34, %33 : vector<2x32xf32>
    %36 = math.exp %35 : vector<2x32xf32>
    %cst_12 = arith.constant 1.000000e+00 : f32
    %37 = vector.broadcast %cst_12 : f32 to vector<2x32xf32>
    %38 = arith.addf %37, %36 : vector<2x32xf32>
    %39 = tpu.reciprocal %38 {approx = true} : vector<2x32xf32> -> vector<2x32xf32>
    %40 = vector.extract_strided_slice %28 {offsets = [0, 32], sizes = [2, 32], strides = [1, 1]} : vector<2x96xf32> to vector<2x32xf32>
    %41 = vector.extract_strided_slice %30 {offsets = [0, 32], sizes = [2, 32], strides = [1, 1]} : vector<2x96xf32> to vector<2x32xf32>
    %42 = arith.addf %40, %41 : vector<2x32xf32>
    %cst_13 = arith.constant 0.000000e+00 : f32
    %43 = vector.broadcast %cst_13 : f32 to vector<2x32xf32>
    %44 = arith.subf %43, %42 : vector<2x32xf32>
    %45 = math.exp %44 : vector<2x32xf32>
    %cst_14 = arith.constant 1.000000e+00 : f32
    %46 = vector.broadcast %cst_14 : f32 to vector<2x32xf32>
    %47 = arith.addf %46, %45 : vector<2x32xf32>
    %48 = tpu.reciprocal %47 {approx = true} : vector<2x32xf32> -> vector<2x32xf32>
    %49 = vector.extract_strided_slice %28 {offsets = [0, 64], sizes = [2, 32], strides = [1, 1]} : vector<2x96xf32> to vector<2x32xf32>
    %50 = vector.extract_strided_slice %30 {offsets = [0, 64], sizes = [2, 32], strides = [1, 1]} : vector<2x96xf32> to vector<2x32xf32>
    %51 = arith.mulf %39, %50 : vector<2x32xf32>
    %52 = arith.addf %49, %51 : vector<2x32xf32>
    %53 = math.tanh %52 : vector<2x32xf32>
    %54 = arith.subf %25, %53 : vector<2x32xf32>
    %55 = arith.mulf %48, %54 : vector<2x32xf32>
    %56 = arith.addf %53, %55 : vector<2x32xf32>
    %57 = vector.extract_strided_slice %56 {offsets = [0, 0], sizes = [2, 16], strides = [1, 1]} : vector<2x32xf32> to vector<2x16xf32>
    %c0_15 = arith.constant 0 : index
    %c0_16 = arith.constant 0 : index
    %c0_17 = arith.constant 0 : index
    %58 = vector.load %arg6[%c0_15, %c0_16, %c0_17] : memref<8x2x16xf32, #tpu.memory_space<vmem>>, vector<1x2x16xf32>
    %59 = vector.shape_cast %58 : vector<1x2x16xf32> to vector<2x16xf32>
    %60 = vector.shape_cast %57 : vector<2x16xf32> to vector<1x2x16xf32>
    tpu.vector_store %arg6[%c0_15, %c0_16, %c0_17], %60 {strides = array<i32>} : memref<8x2x16xf32, #tpu.memory_space<vmem>>, vector<1x2x16xf32>,
    %61 = vector.extract_strided_slice %56 {offsets = [0, 16], sizes = [2, 16], strides = [1, 1]} : vector<2x32xf32> to vector<2x16xf32>
    %c7 = arith.constant 7 : index
    %c0_18 = arith.constant 0 : index
    %c0_19 = arith.constant 0 : index
    %62 = vector.load %arg7[%c7, %c0_18, %c0_19] : memref<8x2x16xf32, #tpu.memory_space<vmem>>, vector<1x2x16xf32>
    %63 = vector.shape_cast %62 : vector<1x2x16xf32> to vector<2x16xf32>
    %64 = vector.shape_cast %61 : vector<2x16xf32> to vector<1x2x16xf32>
    tpu.vector_store %arg7[%c7, %c0_18, %c0_19], %64 {strides = array<i32>} : memref<8x2x16xf32, #tpu.memory_space<vmem>>, vector<1x2x16xf32>,
    %65 = vector.extract_strided_slice %5 {offsets = [2, 0], sizes = [2, 96], strides = [1, 1]} : vector<16x96xf32> to vector<2x96xf32>
    %66 = vector.extract_strided_slice %5 {offsets = [12, 0], sizes = [2, 96], strides = [1, 1]} : vector<16x96xf32> to vector<2x96xf32>
    %67 = arith.select %24, %65, %66 : vector<2x96xi1>, vector<2x96xf32>
    %cst_20 = arith.constant dense<0.000000e+00> : vector<2x96xf32>
    %68 = tpu.matmul %56, %6, %cst_20 {dimension_numbers = #tpu.dot_dimension_numbers<[1], [0], [0], [1], [0, 0, 1, 1], [], []>} : vector<2x32xf32>, vector<32x96xf32>, vector<2x96xf32> -> vector<2x96xf32>
    %69 = arith.addf %68, %9 : vector<2x96xf32>
    %70 = vector.extract_strided_slice %67 {offsets = [0, 0], sizes = [2, 32], strides = [1, 1]} : vector<2x96xf32> to vector<2x32xf32>
    %71 = vector.extract_strided_slice %69 {offsets = [0, 0], sizes = [2, 32], strides = [1, 1]} : vector<2x96xf32> to vector<2x32xf32>
    %72 = arith.addf %70, %71 : vector<2x32xf32>
    %cst_21 = arith.constant 0.000000e+00 : f32
    %73 = vector.broadcast %cst_21 : f32 to vector<2x32xf32>
    %74 = arith.subf %73, %72 : vector<2x32xf32>
    %75 = math.exp %74 : vector<2x32xf32>
    %cst_22 = arith.constant 1.000000e+00 : f32
    %76 = vector.broadcast %cst_22 : f32 to vector<2x32xf32>
    %77 = arith.addf %76, %75 : vector<2x32xf32>
    %78 = tpu.reciprocal %77 {approx = true} : vector<2x32xf32> -> vector<2x32xf32>
    %79 = vector.extract_strided_slice %67 {offsets = [0, 32], sizes = [2, 32], strides = [1, 1]} : vector<2x96xf32> to vector<2x32xf32>
    %80 = vector.extract_strided_slice %69 {offsets = [0, 32], sizes = [2, 32], strides = [1, 1]} : vector<2x96xf32> to vector<2x32xf32>
    %81 = arith.addf %79, %80 : vector<2x32xf32>
    %cst_23 = arith.constant 0.000000e+00 : f32
    %82 = vector.broadcast %cst_23 : f32 to vector<2x32xf32>
    %83 = arith.subf %82, %81 : vector<2x32xf32>
    %84 = math.exp %83 : vector<2x32xf32>
    %cst_24 = arith.constant 1.000000e+00 : f32
    %85 = vector.broadcast %cst_24 : f32 to vector<2x32xf32>
    %86 = arith.addf %85, %84 : vector<2x32xf32>
    %87 = tpu.reciprocal %86 {approx = true} : vector<2x32xf32> -> vector<2x32xf32>
    %88 = vector.extract_strided_slice %67 {offsets = [0, 64], sizes = [2, 32], strides = [1, 1]} : vector<2x96xf32> to vector<2x32xf32>
    %89 = vector.extract_strided_slice %69 {offsets = [0, 64], sizes = [2, 32], strides = [1, 1]} : vector<2x96xf32> to vector<2x32xf32>
    %90 = arith.mulf %78, %89 : vector<2x32xf32>
    %91 = arith.addf %88, %90 : vector<2x32xf32>
    %92 = math.tanh %91 : vector<2x32xf32>
    %93 = arith.subf %56, %92 : vector<2x32xf32>
    %94 = arith.mulf %87, %93 : vector<2x32xf32>
    %95 = arith.addf %92, %94 : vector<2x32xf32>
    %96 = vector.extract_strided_slice %95 {offsets = [0, 0], sizes = [2, 16], strides = [1, 1]} : vector<2x32xf32> to vector<2x16xf32>
    %c1 = arith.constant 1 : index
    %c0_25 = arith.constant 0 : index
    %c0_26 = arith.constant 0 : index
    %97 = vector.load %arg6[%c1, %c0_25, %c0_26] : memref<8x2x16xf32, #tpu.memory_space<vmem>>, vector<1x2x16xf32>
    %98 = vector.shape_cast %97 : vector<1x2x16xf32> to vector<2x16xf32>
    %99 = vector.shape_cast %96 : vector<2x16xf32> to vector<1x2x16xf32>
    tpu.vector_store %arg6[%c1, %c0_25, %c0_26], %99 {strides = array<i32>} : memref<8x2x16xf32, #tpu.memory_space<vmem>>, vector<1x2x16xf32>,
    %100 = vector.extract_strided_slice %95 {offsets = [0, 16], sizes = [2, 16], strides = [1, 1]} : vector<2x32xf32> to vector<2x16xf32>
    %c6 = arith.constant 6 : index
    %c0_27 = arith.constant 0 : index
    %c0_28 = arith.constant 0 : index
    %101 = vector.load %arg7[%c6, %c0_27, %c0_28] : memref<8x2x16xf32, #tpu.memory_space<vmem>>, vector<1x2x16xf32>
    %102 = vector.shape_cast %101 : vector<1x2x16xf32> to vector<2x16xf32>
    %103 = vector.shape_cast %100 : vector<2x16xf32> to vector<1x2x16xf32>
    tpu.vector_store %arg7[%c6, %c0_27, %c0_28], %103 {strides = array<i32>} : memref<8x2x16xf32, #tpu.memory_space<vmem>>, vector<1x2x16xf32>,
    %104 = vector.extract_strided_slice %5 {offsets = [4, 0], sizes = [2, 96], strides = [1, 1]} : vector<16x96xf32> to vector<2x96xf32>
    %105 = vector.extract_strided_slice %5 {offsets = [10, 0], sizes = [2, 96], strides = [1, 1]} : vector<16x96xf32> to vector<2x96xf32>
    %106 = arith.select %24, %104, %105 : vector<2x96xi1>, vector<2x96xf32>
    %cst_29 = arith.constant dense<0.000000e+00> : vector<2x96xf32>
    %107 = tpu.matmul %95, %6, %cst_29 {dimension_numbers = #tpu.dot_dimension_numbers<[1], [0], [0], [1], [0, 0, 1, 1], [], []>} : vector<2x32xf32>, vector<32x96xf32>, vector<2x96xf32> -> vector<2x96xf32>
    %108 = arith.addf %107, %9 : vector<2x96xf32>
    %109 = vector.extract_strided_slice %106 {offsets = [0, 0], sizes = [2, 32], strides = [1, 1]} : vector<2x96xf32> to vector<2x32xf32>
    %110 = vector.extract_strided_slice %108 {offsets = [0, 0], sizes = [2, 32], strides = [1, 1]} : vector<2x96xf32> to vector<2x32xf32>
    %111 = arith.addf %109, %110 : vector<2x32xf32>
    %cst_30 = arith.constant 0.000000e+00 : f32
    %112 = vector.broadcast %cst_30 : f32 to vector<2x32xf32>
    %113 = arith.subf %112, %111 : vector<2x32xf32>
    %114 = math.exp %113 : vector<2x32xf32>
    %cst_31 = arith.constant 1.000000e+00 : f32
    %115 = vector.broadcast %cst_31 : f32 to vector<2x32xf32>
    %116 = arith.addf %115, %114 : vector<2x32xf32>
    %117 = tpu.reciprocal %116 {approx = true} : vector<2x32xf32> -> vector<2x32xf32>
    %118 = vector.extract_strided_slice %106 {offsets = [0, 32], sizes = [2, 32], strides = [1, 1]} : vector<2x96xf32> to vector<2x32xf32>
    %119 = vector.extract_strided_slice %108 {offsets = [0, 32], sizes = [2, 32], strides = [1, 1]} : vector<2x96xf32> to vector<2x32xf32>
    %120 = arith.addf %118, %119 : vector<2x32xf32>
    %cst_32 = arith.constant 0.000000e+00 : f32
    %121 = vector.broadcast %cst_32 : f32 to vector<2x32xf32>
    %122 = arith.subf %121, %120 : vector<2x32xf32>
    %123 = math.exp %122 : vector<2x32xf32>
    %cst_33 = arith.constant 1.000000e+00 : f32
    %124 = vector.broadcast %cst_33 : f32 to vector<2x32xf32>
    %125 = arith.addf %124, %123 : vector<2x32xf32>
    %126 = tpu.reciprocal %125 {approx = true} : vector<2x32xf32> -> vector<2x32xf32>
    %127 = vector.extract_strided_slice %106 {offsets = [0, 64], sizes = [2, 32], strides = [1, 1]} : vector<2x96xf32> to vector<2x32xf32>
    %128 = vector.extract_strided_slice %108 {offsets = [0, 64], sizes = [2, 32], strides = [1, 1]} : vector<2x96xf32> to vector<2x32xf32>
    %129 = arith.mulf %117, %128 : vector<2x32xf32>
    %130 = arith.addf %127, %129 : vector<2x32xf32>
    %131 = math.tanh %130 : vector<2x32xf32>
    %132 = arith.subf %95, %131 : vector<2x32xf32>
    %133 = arith.mulf %126, %132 : vector<2x32xf32>
    %134 = arith.addf %131, %133 : vector<2x32xf32>
    %135 = vector.extract_strided_slice %134 {offsets = [0, 0], sizes = [2, 16], strides = [1, 1]} : vector<2x32xf32> to vector<2x16xf32>
    %c2 = arith.constant 2 : index
    %c0_34 = arith.constant 0 : index
    %c0_35 = arith.constant 0 : index
    %136 = vector.load %arg6[%c2, %c0_34, %c0_35] : memref<8x2x16xf32, #tpu.memory_space<vmem>>, vector<1x2x16xf32>
    %137 = vector.shape_cast %136 : vector<1x2x16xf32> to vector<2x16xf32>
    %138 = vector.shape_cast %135 : vector<2x16xf32> to vector<1x2x16xf32>
    tpu.vector_store %arg6[%c2, %c0_34, %c0_35], %138 {strides = array<i32>} : memref<8x2x16xf32, #tpu.memory_space<vmem>>, vector<1x2x16xf32>,
    %139 = vector.extract_strided_slice %134 {offsets = [0, 16], sizes = [2, 16], strides = [1, 1]} : vector<2x32xf32> to vector<2x16xf32>
    %c5 = arith.constant 5 : index
    %c0_36 = arith.constant 0 : index
    %c0_37 = arith.constant 0 : index
    %140 = vector.load %arg7[%c5, %c0_36, %c0_37] : memref<8x2x16xf32, #tpu.memory_space<vmem>>, vector<1x2x16xf32>
    %141 = vector.shape_cast %140 : vector<1x2x16xf32> to vector<2x16xf32>
    %142 = vector.shape_cast %139 : vector<2x16xf32> to vector<1x2x16xf32>
    tpu.vector_store %arg7[%c5, %c0_36, %c0_37], %142 {strides = array<i32>} : memref<8x2x16xf32, #tpu.memory_space<vmem>>, vector<1x2x16xf32>,
    %143 = vector.extract_strided_slice %5 {offsets = [6, 0], sizes = [2, 96], strides = [1, 1]} : vector<16x96xf32> to vector<2x96xf32>
    %144 = vector.extract_strided_slice %5 {offsets = [8, 0], sizes = [2, 96], strides = [1, 1]} : vector<16x96xf32> to vector<2x96xf32>
    %145 = arith.select %24, %143, %144 : vector<2x96xi1>, vector<2x96xf32>
    %cst_38 = arith.constant dense<0.000000e+00> : vector<2x96xf32>
    %146 = tpu.matmul %134, %6, %cst_38 {dimension_numbers = #tpu.dot_dimension_numbers<[1], [0], [0], [1], [0, 0, 1, 1], [], []>} : vector<2x32xf32>, vector<32x96xf32>, vector<2x96xf32> -> vector<2x96xf32>
    %147 = arith.addf %146, %9 : vector<2x96xf32>
    %148 = vector.extract_strided_slice %145 {offsets = [0, 0], sizes = [2, 32], strides = [1, 1]} : vector<2x96xf32> to vector<2x32xf32>
    %149 = vector.extract_strided_slice %147 {offsets = [0, 0], sizes = [2, 32], strides = [1, 1]} : vector<2x96xf32> to vector<2x32xf32>
    %150 = arith.addf %148, %149 : vector<2x32xf32>
    %cst_39 = arith.constant 0.000000e+00 : f32
    %151 = vector.broadcast %cst_39 : f32 to vector<2x32xf32>
    %152 = arith.subf %151, %150 : vector<2x32xf32>
    %153 = math.exp %152 : vector<2x32xf32>
    %cst_40 = arith.constant 1.000000e+00 : f32
    %154 = vector.broadcast %cst_40 : f32 to vector<2x32xf32>
    %155 = arith.addf %154, %153 : vector<2x32xf32>
    %156 = tpu.reciprocal %155 {approx = true} : vector<2x32xf32> -> vector<2x32xf32>
    %157 = vector.extract_strided_slice %145 {offsets = [0, 32], sizes = [2, 32], strides = [1, 1]} : vector<2x96xf32> to vector<2x32xf32>
    %158 = vector.extract_strided_slice %147 {offsets = [0, 32], sizes = [2, 32], strides = [1, 1]} : vector<2x96xf32> to vector<2x32xf32>
    %159 = arith.addf %157, %158 : vector<2x32xf32>
    %cst_41 = arith.constant 0.000000e+00 : f32
    %160 = vector.broadcast %cst_41 : f32 to vector<2x32xf32>
    %161 = arith.subf %160, %159 : vector<2x32xf32>
    %162 = math.exp %161 : vector<2x32xf32>
    %cst_42 = arith.constant 1.000000e+00 : f32
    %163 = vector.broadcast %cst_42 : f32 to vector<2x32xf32>
    %164 = arith.addf %163, %162 : vector<2x32xf32>
    %165 = tpu.reciprocal %164 {approx = true} : vector<2x32xf32> -> vector<2x32xf32>
    %166 = vector.extract_strided_slice %145 {offsets = [0, 64], sizes = [2, 32], strides = [1, 1]} : vector<2x96xf32> to vector<2x32xf32>
    %167 = vector.extract_strided_slice %147 {offsets = [0, 64], sizes = [2, 32], strides = [1, 1]} : vector<2x96xf32> to vector<2x32xf32>
    %168 = arith.mulf %156, %167 : vector<2x32xf32>
    %169 = arith.addf %166, %168 : vector<2x32xf32>
    %170 = math.tanh %169 : vector<2x32xf32>
    %171 = arith.subf %134, %170 : vector<2x32xf32>
    %172 = arith.mulf %165, %171 : vector<2x32xf32>
    %173 = arith.addf %170, %172 : vector<2x32xf32>
    %174 = vector.extract_strided_slice %173 {offsets = [0, 0], sizes = [2, 16], strides = [1, 1]} : vector<2x32xf32> to vector<2x16xf32>
    %c3 = arith.constant 3 : index
    %c0_43 = arith.constant 0 : index
    %c0_44 = arith.constant 0 : index
    %175 = vector.load %arg6[%c3, %c0_43, %c0_44] : memref<8x2x16xf32, #tpu.memory_space<vmem>>, vector<1x2x16xf32>
    %176 = vector.shape_cast %175 : vector<1x2x16xf32> to vector<2x16xf32>
    %177 = vector.shape_cast %174 : vector<2x16xf32> to vector<1x2x16xf32>
    tpu.vector_store %arg6[%c3, %c0_43, %c0_44], %177 {strides = array<i32>} : memref<8x2x16xf32, #tpu.memory_space<vmem>>, vector<1x2x16xf32>,
    %178 = vector.extract_strided_slice %173 {offsets = [0, 16], sizes = [2, 16], strides = [1, 1]} : vector<2x32xf32> to vector<2x16xf32>
    %c4 = arith.constant 4 : index
    %c0_45 = arith.constant 0 : index
    %c0_46 = arith.constant 0 : index
    %179 = vector.load %arg7[%c4, %c0_45, %c0_46] : memref<8x2x16xf32, #tpu.memory_space<vmem>>, vector<1x2x16xf32>
    %180 = vector.shape_cast %179 : vector<1x2x16xf32> to vector<2x16xf32>
    %181 = vector.shape_cast %178 : vector<2x16xf32> to vector<1x2x16xf32>
    tpu.vector_store %arg7[%c4, %c0_45, %c0_46], %181 {strides = array<i32>} : memref<8x2x16xf32, #tpu.memory_space<vmem>>, vector<1x2x16xf32>,
    %182 = vector.extract_strided_slice %5 {offsets = [8, 0], sizes = [2, 96], strides = [1, 1]} : vector<16x96xf32> to vector<2x96xf32>
    %183 = vector.extract_strided_slice %5 {offsets = [6, 0], sizes = [2, 96], strides = [1, 1]} : vector<16x96xf32> to vector<2x96xf32>
    %184 = arith.select %24, %182, %183 : vector<2x96xi1>, vector<2x96xf32>
    %cst_47 = arith.constant dense<0.000000e+00> : vector<2x96xf32>
    %185 = tpu.matmul %173, %6, %cst_47 {dimension_numbers = #tpu.dot_dimension_numbers<[1], [0], [0], [1], [0, 0, 1, 1], [], []>} : vector<2x32xf32>, vector<32x96xf32>, vector<2x96xf32> -> vector<2x96xf32>
    %186 = arith.addf %185, %9 : vector<2x96xf32>
    %187 = vector.extract_strided_slice %184 {offsets = [0, 0], sizes = [2, 32], strides = [1, 1]} : vector<2x96xf32> to vector<2x32xf32>
    %188 = vector.extract_strided_slice %186 {offsets = [0, 0], sizes = [2, 32], strides = [1, 1]} : vector<2x96xf32> to vector<2x32xf32>
    %189 = arith.addf %187, %188 : vector<2x32xf32>
    %cst_48 = arith.constant 0.000000e+00 : f32
    %190 = vector.broadcast %cst_48 : f32 to vector<2x32xf32>
    %191 = arith.subf %190, %189 : vector<2x32xf32>
    %192 = math.exp %191 : vector<2x32xf32>
    %cst_49 = arith.constant 1.000000e+00 : f32
    %193 = vector.broadcast %cst_49 : f32 to vector<2x32xf32>
    %194 = arith.addf %193, %192 : vector<2x32xf32>
    %195 = tpu.reciprocal %194 {approx = true} : vector<2x32xf32> -> vector<2x32xf32>
    %196 = vector.extract_strided_slice %184 {offsets = [0, 32], sizes = [2, 32], strides = [1, 1]} : vector<2x96xf32> to vector<2x32xf32>
    %197 = vector.extract_strided_slice %186 {offsets = [0, 32], sizes = [2, 32], strides = [1, 1]} : vector<2x96xf32> to vector<2x32xf32>
    %198 = arith.addf %196, %197 : vector<2x32xf32>
    %cst_50 = arith.constant 0.000000e+00 : f32
    %199 = vector.broadcast %cst_50 : f32 to vector<2x32xf32>
    %200 = arith.subf %199, %198 : vector<2x32xf32>
    %201 = math.exp %200 : vector<2x32xf32>
    %cst_51 = arith.constant 1.000000e+00 : f32
    %202 = vector.broadcast %cst_51 : f32 to vector<2x32xf32>
    %203 = arith.addf %202, %201 : vector<2x32xf32>
    %204 = tpu.reciprocal %203 {approx = true} : vector<2x32xf32> -> vector<2x32xf32>
    %205 = vector.extract_strided_slice %184 {offsets = [0, 64], sizes = [2, 32], strides = [1, 1]} : vector<2x96xf32> to vector<2x32xf32>
    %206 = vector.extract_strided_slice %186 {offsets = [0, 64], sizes = [2, 32], strides = [1, 1]} : vector<2x96xf32> to vector<2x32xf32>
    %207 = arith.mulf %195, %206 : vector<2x32xf32>
    %208 = arith.addf %205, %207 : vector<2x32xf32>
    %209 = math.tanh %208 : vector<2x32xf32>
    %210 = arith.subf %173, %209 : vector<2x32xf32>
    %211 = arith.mulf %204, %210 : vector<2x32xf32>
    %212 = arith.addf %209, %211 : vector<2x32xf32>
    %213 = vector.extract_strided_slice %212 {offsets = [0, 0], sizes = [2, 16], strides = [1, 1]} : vector<2x32xf32> to vector<2x16xf32>
    %c4_52 = arith.constant 4 : index
    %c0_53 = arith.constant 0 : index
    %c0_54 = arith.constant 0 : index
    %214 = vector.load %arg6[%c4_52, %c0_53, %c0_54] : memref<8x2x16xf32, #tpu.memory_space<vmem>>, vector<1x2x16xf32>
    %215 = vector.shape_cast %214 : vector<1x2x16xf32> to vector<2x16xf32>
    %216 = vector.shape_cast %213 : vector<2x16xf32> to vector<1x2x16xf32>
    tpu.vector_store %arg6[%c4_52, %c0_53, %c0_54], %216 {strides = array<i32>} : memref<8x2x16xf32, #tpu.memory_space<vmem>>, vector<1x2x16xf32>,
    %217 = vector.extract_strided_slice %212 {offsets = [0, 16], sizes = [2, 16], strides = [1, 1]} : vector<2x32xf32> to vector<2x16xf32>
    %c3_55 = arith.constant 3 : index
    %c0_56 = arith.constant 0 : index
    %c0_57 = arith.constant 0 : index
    %218 = vector.load %arg7[%c3_55, %c0_56, %c0_57] : memref<8x2x16xf32, #tpu.memory_space<vmem>>, vector<1x2x16xf32>
    %219 = vector.shape_cast %218 : vector<1x2x16xf32> to vector<2x16xf32>
    %220 = vector.shape_cast %217 : vector<2x16xf32> to vector<1x2x16xf32>
    tpu.vector_store %arg7[%c3_55, %c0_56, %c0_57], %220 {strides = array<i32>} : memref<8x2x16xf32, #tpu.memory_space<vmem>>, vector<1x2x16xf32>,
    %221 = vector.extract_strided_slice %5 {offsets = [10, 0], sizes = [2, 96], strides = [1, 1]} : vector<16x96xf32> to vector<2x96xf32>
    %222 = vector.extract_strided_slice %5 {offsets = [4, 0], sizes = [2, 96], strides = [1, 1]} : vector<16x96xf32> to vector<2x96xf32>
    %223 = arith.select %24, %221, %222 : vector<2x96xi1>, vector<2x96xf32>
    %cst_58 = arith.constant dense<0.000000e+00> : vector<2x96xf32>
    %224 = tpu.matmul %212, %6, %cst_58 {dimension_numbers = #tpu.dot_dimension_numbers<[1], [0], [0], [1], [0, 0, 1, 1], [], []>} : vector<2x32xf32>, vector<32x96xf32>, vector<2x96xf32> -> vector<2x96xf32>
    %225 = arith.addf %224, %9 : vector<2x96xf32>
    %226 = vector.extract_strided_slice %223 {offsets = [0, 0], sizes = [2, 32], strides = [1, 1]} : vector<2x96xf32> to vector<2x32xf32>
    %227 = vector.extract_strided_slice %225 {offsets = [0, 0], sizes = [2, 32], strides = [1, 1]} : vector<2x96xf32> to vector<2x32xf32>
    %228 = arith.addf %226, %227 : vector<2x32xf32>
    %cst_59 = arith.constant 0.000000e+00 : f32
    %229 = vector.broadcast %cst_59 : f32 to vector<2x32xf32>
    %230 = arith.subf %229, %228 : vector<2x32xf32>
    %231 = math.exp %230 : vector<2x32xf32>
    %cst_60 = arith.constant 1.000000e+00 : f32
    %232 = vector.broadcast %cst_60 : f32 to vector<2x32xf32>
    %233 = arith.addf %232, %231 : vector<2x32xf32>
    %234 = tpu.reciprocal %233 {approx = true} : vector<2x32xf32> -> vector<2x32xf32>
    %235 = vector.extract_strided_slice %223 {offsets = [0, 32], sizes = [2, 32], strides = [1, 1]} : vector<2x96xf32> to vector<2x32xf32>
    %236 = vector.extract_strided_slice %225 {offsets = [0, 32], sizes = [2, 32], strides = [1, 1]} : vector<2x96xf32> to vector<2x32xf32>
    %237 = arith.addf %235, %236 : vector<2x32xf32>
    %cst_61 = arith.constant 0.000000e+00 : f32
    %238 = vector.broadcast %cst_61 : f32 to vector<2x32xf32>
    %239 = arith.subf %238, %237 : vector<2x32xf32>
    %240 = math.exp %239 : vector<2x32xf32>
    %cst_62 = arith.constant 1.000000e+00 : f32
    %241 = vector.broadcast %cst_62 : f32 to vector<2x32xf32>
    %242 = arith.addf %241, %240 : vector<2x32xf32>
    %243 = tpu.reciprocal %242 {approx = true} : vector<2x32xf32> -> vector<2x32xf32>
    %244 = vector.extract_strided_slice %223 {offsets = [0, 64], sizes = [2, 32], strides = [1, 1]} : vector<2x96xf32> to vector<2x32xf32>
    %245 = vector.extract_strided_slice %225 {offsets = [0, 64], sizes = [2, 32], strides = [1, 1]} : vector<2x96xf32> to vector<2x32xf32>
    %246 = arith.mulf %234, %245 : vector<2x32xf32>
    %247 = arith.addf %244, %246 : vector<2x32xf32>
    %248 = math.tanh %247 : vector<2x32xf32>
    %249 = arith.subf %212, %248 : vector<2x32xf32>
    %250 = arith.mulf %243, %249 : vector<2x32xf32>
    %251 = arith.addf %248, %250 : vector<2x32xf32>
    %252 = vector.extract_strided_slice %251 {offsets = [0, 0], sizes = [2, 16], strides = [1, 1]} : vector<2x32xf32> to vector<2x16xf32>
    %c5_63 = arith.constant 5 : index
    %c0_64 = arith.constant 0 : index
    %c0_65 = arith.constant 0 : index
    %253 = vector.load %arg6[%c5_63, %c0_64, %c0_65] : memref<8x2x16xf32, #tpu.memory_space<vmem>>, vector<1x2x16xf32>
    %254 = vector.shape_cast %253 : vector<1x2x16xf32> to vector<2x16xf32>
    %255 = vector.shape_cast %252 : vector<2x16xf32> to vector<1x2x16xf32>
    tpu.vector_store %arg6[%c5_63, %c0_64, %c0_65], %255 {strides = array<i32>} : memref<8x2x16xf32, #tpu.memory_space<vmem>>, vector<1x2x16xf32>,
    %256 = vector.extract_strided_slice %251 {offsets = [0, 16], sizes = [2, 16], strides = [1, 1]} : vector<2x32xf32> to vector<2x16xf32>
    %c2_66 = arith.constant 2 : index
    %c0_67 = arith.constant 0 : index
    %c0_68 = arith.constant 0 : index
    %257 = vector.load %arg7[%c2_66, %c0_67, %c0_68] : memref<8x2x16xf32, #tpu.memory_space<vmem>>, vector<1x2x16xf32>
    %258 = vector.shape_cast %257 : vector<1x2x16xf32> to vector<2x16xf32>
    %259 = vector.shape_cast %256 : vector<2x16xf32> to vector<1x2x16xf32>
    tpu.vector_store %arg7[%c2_66, %c0_67, %c0_68], %259 {strides = array<i32>} : memref<8x2x16xf32, #tpu.memory_space<vmem>>, vector<1x2x16xf32>,
    %260 = vector.extract_strided_slice %5 {offsets = [12, 0], sizes = [2, 96], strides = [1, 1]} : vector<16x96xf32> to vector<2x96xf32>
    %261 = vector.extract_strided_slice %5 {offsets = [2, 0], sizes = [2, 96], strides = [1, 1]} : vector<16x96xf32> to vector<2x96xf32>
    %262 = arith.select %24, %260, %261 : vector<2x96xi1>, vector<2x96xf32>
    %cst_69 = arith.constant dense<0.000000e+00> : vector<2x96xf32>
    %263 = tpu.matmul %251, %6, %cst_69 {dimension_numbers = #tpu.dot_dimension_numbers<[1], [0], [0], [1], [0, 0, 1, 1], [], []>} : vector<2x32xf32>, vector<32x96xf32>, vector<2x96xf32> -> vector<2x96xf32>
    %264 = arith.addf %263, %9 : vector<2x96xf32>
    %265 = vector.extract_strided_slice %262 {offsets = [0, 0], sizes = [2, 32], strides = [1, 1]} : vector<2x96xf32> to vector<2x32xf32>
    %266 = vector.extract_strided_slice %264 {offsets = [0, 0], sizes = [2, 32], strides = [1, 1]} : vector<2x96xf32> to vector<2x32xf32>
    %267 = arith.addf %265, %266 : vector<2x32xf32>
    %cst_70 = arith.constant 0.000000e+00 : f32
    %268 = vector.broadcast %cst_70 : f32 to vector<2x32xf32>
    %269 = arith.subf %268, %267 : vector<2x32xf32>
    %270 = math.exp %269 : vector<2x32xf32>
    %cst_71 = arith.constant 1.000000e+00 : f32
    %271 = vector.broadcast %cst_71 : f32 to vector<2x32xf32>
    %272 = arith.addf %271, %270 : vector<2x32xf32>
    %273 = tpu.reciprocal %272 {approx = true} : vector<2x32xf32> -> vector<2x32xf32>
    %274 = vector.extract_strided_slice %262 {offsets = [0, 32], sizes = [2, 32], strides = [1, 1]} : vector<2x96xf32> to vector<2x32xf32>
    %275 = vector.extract_strided_slice %264 {offsets = [0, 32], sizes = [2, 32], strides = [1, 1]} : vector<2x96xf32> to vector<2x32xf32>
    %276 = arith.addf %274, %275 : vector<2x32xf32>
    %cst_72 = arith.constant 0.000000e+00 : f32
    %277 = vector.broadcast %cst_72 : f32 to vector<2x32xf32>
    %278 = arith.subf %277, %276 : vector<2x32xf32>
    %279 = math.exp %278 : vector<2x32xf32>
    %cst_73 = arith.constant 1.000000e+00 : f32
    %280 = vector.broadcast %cst_73 : f32 to vector<2x32xf32>
    %281 = arith.addf %280, %279 : vector<2x32xf32>
    %282 = tpu.reciprocal %281 {approx = true} : vector<2x32xf32> -> vector<2x32xf32>
    %283 = vector.extract_strided_slice %262 {offsets = [0, 64], sizes = [2, 32], strides = [1, 1]} : vector<2x96xf32> to vector<2x32xf32>
    %284 = vector.extract_strided_slice %264 {offsets = [0, 64], sizes = [2, 32], strides = [1, 1]} : vector<2x96xf32> to vector<2x32xf32>
    %285 = arith.mulf %273, %284 : vector<2x32xf32>
    %286 = arith.addf %283, %285 : vector<2x32xf32>
    %287 = math.tanh %286 : vector<2x32xf32>
    %288 = arith.subf %251, %287 : vector<2x32xf32>
    %289 = arith.mulf %282, %288 : vector<2x32xf32>
    %290 = arith.addf %287, %289 : vector<2x32xf32>
    %291 = vector.extract_strided_slice %290 {offsets = [0, 0], sizes = [2, 16], strides = [1, 1]} : vector<2x32xf32> to vector<2x16xf32>
    %c6_74 = arith.constant 6 : index
    %c0_75 = arith.constant 0 : index
    %c0_76 = arith.constant 0 : index
    %292 = vector.load %arg6[%c6_74, %c0_75, %c0_76] : memref<8x2x16xf32, #tpu.memory_space<vmem>>, vector<1x2x16xf32>
    %293 = vector.shape_cast %292 : vector<1x2x16xf32> to vector<2x16xf32>
    %294 = vector.shape_cast %291 : vector<2x16xf32> to vector<1x2x16xf32>
    tpu.vector_store %arg6[%c6_74, %c0_75, %c0_76], %294 {strides = array<i32>} : memref<8x2x16xf32, #tpu.memory_space<vmem>>, vector<1x2x16xf32>,
    %295 = vector.extract_strided_slice %290 {offsets = [0, 16], sizes = [2, 16], strides = [1, 1]} : vector<2x32xf32> to vector<2x16xf32>
    %c1_77 = arith.constant 1 : index
    %c0_78 = arith.constant 0 : index
    %c0_79 = arith.constant 0 : index
    %296 = vector.load %arg7[%c1_77, %c0_78, %c0_79] : memref<8x2x16xf32, #tpu.memory_space<vmem>>, vector<1x2x16xf32>
    %297 = vector.shape_cast %296 : vector<1x2x16xf32> to vector<2x16xf32>
    %298 = vector.shape_cast %295 : vector<2x16xf32> to vector<1x2x16xf32>
    tpu.vector_store %arg7[%c1_77, %c0_78, %c0_79], %298 {strides = array<i32>} : memref<8x2x16xf32, #tpu.memory_space<vmem>>, vector<1x2x16xf32>,
    %299 = vector.extract_strided_slice %5 {offsets = [14, 0], sizes = [2, 96], strides = [1, 1]} : vector<16x96xf32> to vector<2x96xf32>
    %300 = vector.extract_strided_slice %5 {offsets = [0, 0], sizes = [2, 96], strides = [1, 1]} : vector<16x96xf32> to vector<2x96xf32>
    %301 = arith.select %24, %299, %300 : vector<2x96xi1>, vector<2x96xf32>
    %cst_80 = arith.constant dense<0.000000e+00> : vector<2x96xf32>
    %302 = tpu.matmul %290, %6, %cst_80 {dimension_numbers = #tpu.dot_dimension_numbers<[1], [0], [0], [1], [0, 0, 1, 1], [], []>} : vector<2x32xf32>, vector<32x96xf32>, vector<2x96xf32> -> vector<2x96xf32>
    %303 = arith.addf %302, %9 : vector<2x96xf32>
    %304 = vector.extract_strided_slice %301 {offsets = [0, 0], sizes = [2, 32], strides = [1, 1]} : vector<2x96xf32> to vector<2x32xf32>
    %305 = vector.extract_strided_slice %303 {offsets = [0, 0], sizes = [2, 32], strides = [1, 1]} : vector<2x96xf32> to vector<2x32xf32>
    %306 = arith.addf %304, %305 : vector<2x32xf32>
    %cst_81 = arith.constant 0.000000e+00 : f32
    %307 = vector.broadcast %cst_81 : f32 to vector<2x32xf32>
    %308 = arith.subf %307, %306 : vector<2x32xf32>
    %309 = math.exp %308 : vector<2x32xf32>
    %cst_82 = arith.constant 1.000000e+00 : f32
    %310 = vector.broadcast %cst_82 : f32 to vector<2x32xf32>
    %311 = arith.addf %310, %309 : vector<2x32xf32>
    %312 = tpu.reciprocal %311 {approx = true} : vector<2x32xf32> -> vector<2x32xf32>
    %313 = vector.extract_strided_slice %301 {offsets = [0, 32], sizes = [2, 32], strides = [1, 1]} : vector<2x96xf32> to vector<2x32xf32>
    %314 = vector.extract_strided_slice %303 {offsets = [0, 32], sizes = [2, 32], strides = [1, 1]} : vector<2x96xf32> to vector<2x32xf32>
    %315 = arith.addf %313, %314 : vector<2x32xf32>
    %cst_83 = arith.constant 0.000000e+00 : f32
    %316 = vector.broadcast %cst_83 : f32 to vector<2x32xf32>
    %317 = arith.subf %316, %315 : vector<2x32xf32>
    %318 = math.exp %317 : vector<2x32xf32>
    %cst_84 = arith.constant 1.000000e+00 : f32
    %319 = vector.broadcast %cst_84 : f32 to vector<2x32xf32>
    %320 = arith.addf %319, %318 : vector<2x32xf32>
    %321 = tpu.reciprocal %320 {approx = true} : vector<2x32xf32> -> vector<2x32xf32>
    %322 = vector.extract_strided_slice %301 {offsets = [0, 64], sizes = [2, 32], strides = [1, 1]} : vector<2x96xf32> to vector<2x32xf32>
    %323 = vector.extract_strided_slice %303 {offsets = [0, 64], sizes = [2, 32], strides = [1, 1]} : vector<2x96xf32> to vector<2x32xf32>
    %324 = arith.mulf %312, %323 : vector<2x32xf32>
    %325 = arith.addf %322, %324 : vector<2x32xf32>
    %326 = math.tanh %325 : vector<2x32xf32>
    %327 = arith.subf %290, %326 : vector<2x32xf32>
    %328 = arith.mulf %321, %327 : vector<2x32xf32>
    %329 = arith.addf %326, %328 : vector<2x32xf32>
    %330 = vector.extract_strided_slice %329 {offsets = [0, 0], sizes = [2, 16], strides = [1, 1]} : vector<2x32xf32> to vector<2x16xf32>
    %c7_85 = arith.constant 7 : index
    %c0_86 = arith.constant 0 : index
    %c0_87 = arith.constant 0 : index
    %331 = vector.load %arg6[%c7_85, %c0_86, %c0_87] : memref<8x2x16xf32, #tpu.memory_space<vmem>>, vector<1x2x16xf32>
    %332 = vector.shape_cast %331 : vector<1x2x16xf32> to vector<2x16xf32>
    %333 = vector.shape_cast %330 : vector<2x16xf32> to vector<1x2x16xf32>
    tpu.vector_store %arg6[%c7_85, %c0_86, %c0_87], %333 {strides = array<i32>} : memref<8x2x16xf32, #tpu.memory_space<vmem>>, vector<1x2x16xf32>,
    %334 = vector.extract_strided_slice %329 {offsets = [0, 16], sizes = [2, 16], strides = [1, 1]} : vector<2x32xf32> to vector<2x16xf32>
    %c0_88 = arith.constant 0 : index
    %c0_89 = arith.constant 0 : index
    %c0_90 = arith.constant 0 : index
    %335 = vector.load %arg7[%c0_88, %c0_89, %c0_90] : memref<8x2x16xf32, #tpu.memory_space<vmem>>, vector<1x2x16xf32>
    %336 = vector.shape_cast %335 : vector<1x2x16xf32> to vector<2x16xf32>
    %337 = vector.shape_cast %334 : vector<2x16xf32> to vector<1x2x16xf32>
    tpu.vector_store %arg7[%c0_88, %c0_89, %c0_90], %337 {strides = array<i32>} : memref<8x2x16xf32, #tpu.memory_space<vmem>>, vector<1x2x16xf32>,
    %c0_91 = arith.constant 0 : index
    %c0_92 = arith.constant 0 : index
    %c0_93 = arith.constant 0 : index
    %338 = vector.load %arg6[%c0_91, %c0_92, %c0_93] : memref<8x2x16xf32, #tpu.memory_space<vmem>>, vector<8x2x16xf32>
    %c0_94 = arith.constant 0 : index
    %c0_95 = arith.constant 0 : index
    %c0_96 = arith.constant 0 : index
    %339 = vector.load %arg5[%c0_94, %c0_95, %c0_96] : memref<8x2x32xf32, #tpu.memory_space<vmem>>, vector<8x2x16xf32>
    tpu.vector_store %arg5[%c0_94, %c0_95, %c0_96], %338 {strides = array<i32>} : memref<8x2x32xf32, #tpu.memory_space<vmem>>, vector<8x2x16xf32>,
    %c0_97 = arith.constant 0 : index
    %c0_98 = arith.constant 0 : index
    %c0_99 = arith.constant 0 : index
    %340 = vector.load %arg7[%c0_97, %c0_98, %c0_99] : memref<8x2x16xf32, #tpu.memory_space<vmem>>, vector<8x2x16xf32>
    %c0_100 = arith.constant 0 : index
    %c0_101 = arith.constant 0 : index
    %c16 = arith.constant 16 : index
    %341 = vector.load %arg5[%c0_100, %c0_101, %c16] : memref<8x2x32xf32, #tpu.memory_space<vmem>>, vector<8x2x16xf32>
    tpu.vector_store %arg5[%c0_100, %c0_101, %c16], %340 {strides = array<i32>} : memref<8x2x32xf32, #tpu.memory_space<vmem>>, vector<8x2x16xf32>,
    return
  }
}

module attributes {stable_mosaic.version = 11 : i64} {
  func.func @_bigru_kernel(%arg0: memref<16x4xf32, #tpu.memory_space<vmem>>, %arg1: memref<4x48xf32, #tpu.memory_space<vmem>>, %arg2: memref<1x48xf32, #tpu.memory_space<vmem>>, %arg3: memref<16x48xf32, #tpu.memory_space<vmem>>, %arg4: memref<1x48xf32, #tpu.memory_space<vmem>>, %arg5: memref<2x8x16xf32, #tpu.memory_space<vmem>>, %arg6: memref<2x8x8xf32, #tpu.memory_space<vmem>>, %arg7: memref<2x8x8xf32, #tpu.memory_space<vmem>>) attributes {dimension_semantics = [], scalar_prefetch = 0 : i64, scratch_operands = 2 : i64, tpu.core_type = #tpu.core_type<tc>} {
    %c0 = arith.constant 0 : index
    %c0_0 = arith.constant 0 : index
    %0 = vector.load %arg0[%c0, %c0_0] : memref<16x4xf32, #tpu.memory_space<vmem>>, vector<16x4xf32>
    %c0_1 = arith.constant 0 : index
    %c0_2 = arith.constant 0 : index
    %1 = vector.load %arg1[%c0_1, %c0_2] : memref<4x48xf32, #tpu.memory_space<vmem>>, vector<4x48xf32>
    %cst = arith.constant dense<0.000000e+00> : vector<16x48xf32>
    %2 = tpu.matmul %0, %1, %cst {dimension_numbers = #tpu.dot_dimension_numbers<[1], [0], [0], [1], [0, 0, 1, 1], [], []>} : vector<16x4xf32>, vector<4x48xf32>, vector<16x48xf32> -> vector<16x48xf32>
    %c0_3 = arith.constant 0 : index
    %c0_4 = arith.constant 0 : index
    %3 = vector.load %arg2[%c0_3, %c0_4] : memref<1x48xf32, #tpu.memory_space<vmem>>, vector<1x48xf32>
    %4 = vector.broadcast %3 : vector<1x48xf32> to vector<16x48xf32>
    %5 = arith.addf %2, %4 : vector<16x48xf32>
    %c0_5 = arith.constant 0 : index
    %c0_6 = arith.constant 0 : index
    %6 = vector.load %arg3[%c0_5, %c0_6] : memref<16x48xf32, #tpu.memory_space<vmem>>, vector<16x48xf32>
    %c0_7 = arith.constant 0 : index
    %c0_8 = arith.constant 0 : index
    %7 = vector.load %arg4[%c0_7, %c0_8] : memref<1x48xf32, #tpu.memory_space<vmem>>, vector<1x48xf32>
    %8 = vector.shape_cast %7 : vector<1x48xf32> to vector<1x48xf32>
    %9 = vector.broadcast %8 : vector<1x48xf32> to vector<8x48xf32>
    %10 = tpu.iota {dimensions = array<i32: 1>} : vector<8x48xi32>
    %c8_i32 = arith.constant 8 : i32
    %11 = vector.broadcast %c8_i32 : i32 to vector<8x48xi32>
    %12 = arith.cmpi slt, %10, %11 : vector<8x48xi32>
    %c16_i32 = arith.constant 16 : i32
    %13 = vector.broadcast %c16_i32 : i32 to vector<8x48xi32>
    %14 = arith.cmpi sge, %10, %13 : vector<8x48xi32>
    %c24_i32 = arith.constant 24 : i32
    %15 = vector.broadcast %c24_i32 : i32 to vector<8x48xi32>
    %16 = arith.cmpi slt, %10, %15 : vector<8x48xi32>
    %17 = arith.andi %14, %16 : vector<8x48xi1>
    %18 = arith.ori %12, %17 : vector<8x48xi1>
    %c32_i32 = arith.constant 32 : i32
    %19 = vector.broadcast %c32_i32 : i32 to vector<8x48xi32>
    %20 = arith.cmpi sge, %10, %19 : vector<8x48xi32>
    %c40_i32 = arith.constant 40 : i32
    %21 = vector.broadcast %c40_i32 : i32 to vector<8x48xi32>
    %22 = arith.cmpi slt, %10, %21 : vector<8x48xi32>
    %23 = arith.andi %20, %22 : vector<8x48xi1>
    %24 = arith.ori %18, %23 : vector<8x48xi1>
    %cst_9 = arith.constant 0.000000e+00 : f32
    %25 = vector.broadcast %cst_9 : f32 to vector<8x16xf32>
    %26 = vector.extract_strided_slice %5 {offsets = [0, 0], sizes = [8, 48], strides = [1, 1]} : vector<16x48xf32> to vector<8x48xf32>
    %27 = vector.extract_strided_slice %5 {offsets = [8, 0], sizes = [8, 48], strides = [1, 1]} : vector<16x48xf32> to vector<8x48xf32>
    %28 = arith.select %24, %26, %27 : vector<8x48xi1>, vector<8x48xf32>
    %cst_10 = arith.constant dense<0.000000e+00> : vector<8x48xf32>
    %29 = tpu.matmul %25, %6, %cst_10 {dimension_numbers = #tpu.dot_dimension_numbers<[1], [0], [0], [1], [0, 0, 1, 1], [], []>} : vector<8x16xf32>, vector<16x48xf32>, vector<8x48xf32> -> vector<8x48xf32>
    %30 = arith.addf %29, %9 : vector<8x48xf32>
    %31 = vector.extract_strided_slice %28 {offsets = [0, 0], sizes = [8, 16], strides = [1, 1]} : vector<8x48xf32> to vector<8x16xf32>
    %32 = vector.extract_strided_slice %30 {offsets = [0, 0], sizes = [8, 16], strides = [1, 1]} : vector<8x48xf32> to vector<8x16xf32>
    %33 = arith.addf %31, %32 : vector<8x16xf32>
    %cst_11 = arith.constant 0.000000e+00 : f32
    %34 = vector.broadcast %cst_11 : f32 to vector<8x16xf32>
    %35 = arith.subf %34, %33 : vector<8x16xf32>
    %36 = math.exp %35 : vector<8x16xf32>
    %cst_12 = arith.constant 1.000000e+00 : f32
    %37 = vector.broadcast %cst_12 : f32 to vector<8x16xf32>
    %38 = arith.addf %37, %36 : vector<8x16xf32>
    %39 = tpu.reciprocal %38 {approx = true} : vector<8x16xf32> -> vector<8x16xf32>
    %40 = vector.extract_strided_slice %28 {offsets = [0, 16], sizes = [8, 16], strides = [1, 1]} : vector<8x48xf32> to vector<8x16xf32>
    %41 = vector.extract_strided_slice %30 {offsets = [0, 16], sizes = [8, 16], strides = [1, 1]} : vector<8x48xf32> to vector<8x16xf32>
    %42 = arith.addf %40, %41 : vector<8x16xf32>
    %cst_13 = arith.constant 0.000000e+00 : f32
    %43 = vector.broadcast %cst_13 : f32 to vector<8x16xf32>
    %44 = arith.subf %43, %42 : vector<8x16xf32>
    %45 = math.exp %44 : vector<8x16xf32>
    %cst_14 = arith.constant 1.000000e+00 : f32
    %46 = vector.broadcast %cst_14 : f32 to vector<8x16xf32>
    %47 = arith.addf %46, %45 : vector<8x16xf32>
    %48 = tpu.reciprocal %47 {approx = true} : vector<8x16xf32> -> vector<8x16xf32>
    %49 = vector.extract_strided_slice %28 {offsets = [0, 32], sizes = [8, 16], strides = [1, 1]} : vector<8x48xf32> to vector<8x16xf32>
    %50 = vector.extract_strided_slice %30 {offsets = [0, 32], sizes = [8, 16], strides = [1, 1]} : vector<8x48xf32> to vector<8x16xf32>
    %51 = arith.mulf %39, %50 : vector<8x16xf32>
    %52 = arith.addf %49, %51 : vector<8x16xf32>
    %53 = math.tanh %52 : vector<8x16xf32>
    %54 = arith.subf %25, %53 : vector<8x16xf32>
    %55 = arith.mulf %48, %54 : vector<8x16xf32>
    %56 = arith.addf %53, %55 : vector<8x16xf32>
    %57 = vector.extract_strided_slice %56 {offsets = [0, 0], sizes = [8, 8], strides = [1, 1]} : vector<8x16xf32> to vector<8x8xf32>
    %c0_15 = arith.constant 0 : index
    %c0_16 = arith.constant 0 : index
    %c0_17 = arith.constant 0 : index
    %58 = vector.load %arg6[%c0_15, %c0_16, %c0_17] : memref<2x8x8xf32, #tpu.memory_space<vmem>>, vector<1x8x8xf32>
    %59 = vector.shape_cast %58 : vector<1x8x8xf32> to vector<8x8xf32>
    %60 = vector.shape_cast %57 : vector<8x8xf32> to vector<1x8x8xf32>
    tpu.vector_store %arg6[%c0_15, %c0_16, %c0_17], %60 {strides = array<i32>} : memref<2x8x8xf32, #tpu.memory_space<vmem>>, vector<1x8x8xf32>,
    %61 = vector.extract_strided_slice %56 {offsets = [0, 8], sizes = [8, 8], strides = [1, 1]} : vector<8x16xf32> to vector<8x8xf32>
    %c1 = arith.constant 1 : index
    %c0_18 = arith.constant 0 : index
    %c0_19 = arith.constant 0 : index
    %62 = vector.load %arg7[%c1, %c0_18, %c0_19] : memref<2x8x8xf32, #tpu.memory_space<vmem>>, vector<1x8x8xf32>
    %63 = vector.shape_cast %62 : vector<1x8x8xf32> to vector<8x8xf32>
    %64 = vector.shape_cast %61 : vector<8x8xf32> to vector<1x8x8xf32>
    tpu.vector_store %arg7[%c1, %c0_18, %c0_19], %64 {strides = array<i32>} : memref<2x8x8xf32, #tpu.memory_space<vmem>>, vector<1x8x8xf32>,
    %65 = vector.extract_strided_slice %5 {offsets = [8, 0], sizes = [8, 48], strides = [1, 1]} : vector<16x48xf32> to vector<8x48xf32>
    %66 = vector.extract_strided_slice %5 {offsets = [0, 0], sizes = [8, 48], strides = [1, 1]} : vector<16x48xf32> to vector<8x48xf32>
    %67 = arith.select %24, %65, %66 : vector<8x48xi1>, vector<8x48xf32>
    %cst_20 = arith.constant dense<0.000000e+00> : vector<8x48xf32>
    %68 = tpu.matmul %56, %6, %cst_20 {dimension_numbers = #tpu.dot_dimension_numbers<[1], [0], [0], [1], [0, 0, 1, 1], [], []>} : vector<8x16xf32>, vector<16x48xf32>, vector<8x48xf32> -> vector<8x48xf32>
    %69 = arith.addf %68, %9 : vector<8x48xf32>
    %70 = vector.extract_strided_slice %67 {offsets = [0, 0], sizes = [8, 16], strides = [1, 1]} : vector<8x48xf32> to vector<8x16xf32>
    %71 = vector.extract_strided_slice %69 {offsets = [0, 0], sizes = [8, 16], strides = [1, 1]} : vector<8x48xf32> to vector<8x16xf32>
    %72 = arith.addf %70, %71 : vector<8x16xf32>
    %cst_21 = arith.constant 0.000000e+00 : f32
    %73 = vector.broadcast %cst_21 : f32 to vector<8x16xf32>
    %74 = arith.subf %73, %72 : vector<8x16xf32>
    %75 = math.exp %74 : vector<8x16xf32>
    %cst_22 = arith.constant 1.000000e+00 : f32
    %76 = vector.broadcast %cst_22 : f32 to vector<8x16xf32>
    %77 = arith.addf %76, %75 : vector<8x16xf32>
    %78 = tpu.reciprocal %77 {approx = true} : vector<8x16xf32> -> vector<8x16xf32>
    %79 = vector.extract_strided_slice %67 {offsets = [0, 16], sizes = [8, 16], strides = [1, 1]} : vector<8x48xf32> to vector<8x16xf32>
    %80 = vector.extract_strided_slice %69 {offsets = [0, 16], sizes = [8, 16], strides = [1, 1]} : vector<8x48xf32> to vector<8x16xf32>
    %81 = arith.addf %79, %80 : vector<8x16xf32>
    %cst_23 = arith.constant 0.000000e+00 : f32
    %82 = vector.broadcast %cst_23 : f32 to vector<8x16xf32>
    %83 = arith.subf %82, %81 : vector<8x16xf32>
    %84 = math.exp %83 : vector<8x16xf32>
    %cst_24 = arith.constant 1.000000e+00 : f32
    %85 = vector.broadcast %cst_24 : f32 to vector<8x16xf32>
    %86 = arith.addf %85, %84 : vector<8x16xf32>
    %87 = tpu.reciprocal %86 {approx = true} : vector<8x16xf32> -> vector<8x16xf32>
    %88 = vector.extract_strided_slice %67 {offsets = [0, 32], sizes = [8, 16], strides = [1, 1]} : vector<8x48xf32> to vector<8x16xf32>
    %89 = vector.extract_strided_slice %69 {offsets = [0, 32], sizes = [8, 16], strides = [1, 1]} : vector<8x48xf32> to vector<8x16xf32>
    %90 = arith.mulf %78, %89 : vector<8x16xf32>
    %91 = arith.addf %88, %90 : vector<8x16xf32>
    %92 = math.tanh %91 : vector<8x16xf32>
    %93 = arith.subf %56, %92 : vector<8x16xf32>
    %94 = arith.mulf %87, %93 : vector<8x16xf32>
    %95 = arith.addf %92, %94 : vector<8x16xf32>
    %96 = vector.extract_strided_slice %95 {offsets = [0, 0], sizes = [8, 8], strides = [1, 1]} : vector<8x16xf32> to vector<8x8xf32>
    %c1_25 = arith.constant 1 : index
    %c0_26 = arith.constant 0 : index
    %c0_27 = arith.constant 0 : index
    %97 = vector.load %arg6[%c1_25, %c0_26, %c0_27] : memref<2x8x8xf32, #tpu.memory_space<vmem>>, vector<1x8x8xf32>
    %98 = vector.shape_cast %97 : vector<1x8x8xf32> to vector<8x8xf32>
    %99 = vector.shape_cast %96 : vector<8x8xf32> to vector<1x8x8xf32>
    tpu.vector_store %arg6[%c1_25, %c0_26, %c0_27], %99 {strides = array<i32>} : memref<2x8x8xf32, #tpu.memory_space<vmem>>, vector<1x8x8xf32>,
    %100 = vector.extract_strided_slice %95 {offsets = [0, 8], sizes = [8, 8], strides = [1, 1]} : vector<8x16xf32> to vector<8x8xf32>
    %c0_28 = arith.constant 0 : index
    %c0_29 = arith.constant 0 : index
    %c0_30 = arith.constant 0 : index
    %101 = vector.load %arg7[%c0_28, %c0_29, %c0_30] : memref<2x8x8xf32, #tpu.memory_space<vmem>>, vector<1x8x8xf32>
    %102 = vector.shape_cast %101 : vector<1x8x8xf32> to vector<8x8xf32>
    %103 = vector.shape_cast %100 : vector<8x8xf32> to vector<1x8x8xf32>
    tpu.vector_store %arg7[%c0_28, %c0_29, %c0_30], %103 {strides = array<i32>} : memref<2x8x8xf32, #tpu.memory_space<vmem>>, vector<1x8x8xf32>,
    %c0_31 = arith.constant 0 : index
    %c0_32 = arith.constant 0 : index
    %c0_33 = arith.constant 0 : index
    %104 = vector.load %arg6[%c0_31, %c0_32, %c0_33] : memref<2x8x8xf32, #tpu.memory_space<vmem>>, vector<2x8x8xf32>
    %c0_34 = arith.constant 0 : index
    %c0_35 = arith.constant 0 : index
    %c0_36 = arith.constant 0 : index
    %105 = vector.load %arg5[%c0_34, %c0_35, %c0_36] : memref<2x8x16xf32, #tpu.memory_space<vmem>>, vector<2x8x8xf32>
    tpu.vector_store %arg5[%c0_34, %c0_35, %c0_36], %104 {strides = array<i32>} : memref<2x8x16xf32, #tpu.memory_space<vmem>>, vector<2x8x8xf32>,
    %c0_37 = arith.constant 0 : index
    %c0_38 = arith.constant 0 : index
    %c0_39 = arith.constant 0 : index
    %106 = vector.load %arg7[%c0_37, %c0_38, %c0_39] : memref<2x8x8xf32, #tpu.memory_space<vmem>>, vector<2x8x8xf32>
    %c0_40 = arith.constant 0 : index
    %c0_41 = arith.constant 0 : index
    %c8 = arith.constant 8 : index
    %107 = vector.load %arg5[%c0_40, %c0_41, %c8] : memref<2x8x16xf32, #tpu.memory_space<vmem>>, vector<2x8x8xf32>
    tpu.vector_store %arg5[%c0_40, %c0_41, %c8], %106 {strides = array<i32>} : memref<2x8x16xf32, #tpu.memory_space<vmem>>, vector<2x8x8xf32>,
    return
  }
}

module attributes {stable_mosaic.version = 11 : i64} {
  func.func @_pred_kernel(%arg0: memref<8x2x16xf32, #tpu.memory_space<vmem>>, %arg1: memref<16x8xf32, #tpu.memory_space<vmem>>, %arg2: memref<8x8xf32, #tpu.memory_space<vmem>>, %arg3: memref<16x3xf32, #tpu.memory_space<vmem>>, %arg4: memref<8x5xf32, #tpu.memory_space<vmem>>, %arg5: memref<8x5x3xf32, #tpu.memory_space<vmem>>) attributes {dimension_semantics = [], scalar_prefetch = 0 : i64, scratch_operands = 0 : i64, tpu.core_type = #tpu.core_type<tc>} {
    %c0 = arith.constant 0 : index
    %c0_0 = arith.constant 0 : index
    %0 = vector.load %arg1[%c0, %c0_0] : memref<16x8xf32, #tpu.memory_space<vmem>>, vector<16x8xf32>
    %c0_1 = arith.constant 0 : index
    %c0_2 = arith.constant 0 : index
    %1 = vector.load %arg2[%c0_1, %c0_2] : memref<8x8xf32, #tpu.memory_space<vmem>>, vector<8x8xf32>
    %c0_3 = arith.constant 0 : index
    %c0_4 = arith.constant 0 : index
    %2 = vector.load %arg3[%c0_3, %c0_4] : memref<16x3xf32, #tpu.memory_space<vmem>>, vector<16x3xf32>
    %c0_5 = arith.constant 0 : index
    %c0_6 = arith.constant 0 : index
    %3 = vector.load %arg4[%c0_5, %c0_6] : memref<8x5xf32, #tpu.memory_space<vmem>>, vector<8x5xf32>
    %c0_7 = arith.constant 0 : index
    %c0_8 = arith.constant 0 : index
    %c0_9 = arith.constant 0 : index
    %4 = vector.load %arg0[%c0_7, %c0_8, %c0_9] : memref<8x2x16xf32, #tpu.memory_space<vmem>>, vector<1x2x16xf32>
    %5 = vector.shape_cast %4 : vector<1x2x16xf32> to vector<2x16xf32>
    %cst = arith.constant dense<0.000000e+00> : vector<2x8xf32>
    %6 = tpu.matmul %5, %0, %cst {dimension_numbers = #tpu.dot_dimension_numbers<[1], [0], [0], [1], [0, 0, 1, 1], [], []>} : vector<2x16xf32>, vector<16x8xf32>, vector<2x8xf32> -> vector<2x8xf32>
    %7 = math.tanh %6 : vector<2x8xf32>
    %cst_10 = arith.constant dense<0.000000e+00> : vector<2x8xf32>
    %8 = tpu.matmul %7, %1, %cst_10 {dimension_numbers = #tpu.dot_dimension_numbers<[1], [0], [0], [1], [0, 0, 1, 1], [], []>} : vector<2x8xf32>, vector<8x8xf32>, vector<2x8xf32> -> vector<2x8xf32>
    %cst_11 = arith.constant dense<0xFF800000> : vector<8xf32>
    %9 = vector.multi_reduction <maximumf>, %8, %cst_11 [0] : vector<2x8xf32> to vector<8xf32>
    %10 = vector.shape_cast %9 : vector<8xf32> to vector<1x8xf32>
    %11 = vector.broadcast %10 : vector<1x8xf32> to vector<2x8xf32>
    %12 = arith.subf %8, %11 : vector<2x8xf32>
    %13 = math.exp %12 : vector<2x8xf32>
    %cst_12 = arith.constant dense<0.000000e+00> : vector<8xf32>
    %14 = vector.multi_reduction <add>, %13, %cst_12 [0] : vector<2x8xf32> to vector<8xf32>
    %15 = vector.shape_cast %14 : vector<8xf32> to vector<1x8xf32>
    %16 = vector.broadcast %15 : vector<1x8xf32> to vector<2x8xf32>
    %17 = arith.divf %13, %16 : vector<2x8xf32>
    %cst_13 = arith.constant dense<0.000000e+00> : vector<8x16xf32>
    %18 = tpu.matmul %17, %5, %cst_13 {dimension_numbers = #tpu.dot_dimension_numbers<[0], [0], [1], [1], [0, 1, 1, 1], [], []>} : vector<2x8xf32>, vector<2x16xf32>, vector<8x16xf32> -> vector<8x16xf32>
    %cst_14 = arith.constant dense<0.000000e+00> : vector<8x3xf32>
    %19 = tpu.matmul %18, %2, %cst_14 {dimension_numbers = #tpu.dot_dimension_numbers<[1], [0], [0], [1], [0, 0, 1, 1], [], []>} : vector<8x16xf32>, vector<16x3xf32>, vector<8x3xf32> -> vector<8x3xf32>
    %cst_15 = arith.constant dense<0xFF800000> : vector<3xf32>
    %20 = vector.multi_reduction <maximumf>, %19, %cst_15 [0] : vector<8x3xf32> to vector<3xf32>
    %21 = vector.shape_cast %20 : vector<3xf32> to vector<1x3xf32>
    %22 = vector.broadcast %21 : vector<1x3xf32> to vector<8x3xf32>
    %23 = arith.subf %19, %22 : vector<8x3xf32>
    %24 = math.exp %23 : vector<8x3xf32>
    %cst_16 = arith.constant dense<0.000000e+00> : vector<3xf32>
    %25 = vector.multi_reduction <add>, %24, %cst_16 [0] : vector<8x3xf32> to vector<3xf32>
    %26 = vector.shape_cast %25 : vector<3xf32> to vector<1x3xf32>
    %27 = vector.broadcast %26 : vector<1x3xf32> to vector<8x3xf32>
    %28 = arith.divf %24, %27 : vector<8x3xf32>
    %cst_17 = arith.constant dense<0.000000e+00> : vector<5x3xf32>
    %29 = tpu.matmul %3, %28, %cst_17 {dimension_numbers = #tpu.dot_dimension_numbers<[0], [0], [1], [1], [0, 1, 1, 1], [], []>} : vector<8x5xf32>, vector<8x3xf32>, vector<5x3xf32> -> vector<5x3xf32>
    %cst_18 = arith.constant dense<0xFF800000> : vector<3xf32>
    %30 = vector.multi_reduction <maximumf>, %29, %cst_18 [0] : vector<5x3xf32> to vector<3xf32>
    %31 = vector.shape_cast %30 : vector<3xf32> to vector<1x3xf32>
    %32 = vector.broadcast %31 : vector<1x3xf32> to vector<5x3xf32>
    %33 = arith.subf %29, %32 : vector<5x3xf32>
    %34 = math.exp %33 : vector<5x3xf32>
    %cst_19 = arith.constant dense<0.000000e+00> : vector<3xf32>
    %35 = vector.multi_reduction <add>, %34, %cst_19 [0] : vector<5x3xf32> to vector<3xf32>
    %36 = vector.shape_cast %35 : vector<3xf32> to vector<1x3xf32>
    %37 = vector.broadcast %36 : vector<1x3xf32> to vector<5x3xf32>
    %38 = arith.divf %34, %37 : vector<5x3xf32>
    %c1 = arith.constant 1 : index
    %c0_20 = arith.constant 0 : index
    %c0_21 = arith.constant 0 : index
    %39 = vector.load %arg0[%c1, %c0_20, %c0_21] : memref<8x2x16xf32, #tpu.memory_space<vmem>>, vector<1x2x16xf32>
    %40 = vector.shape_cast %39 : vector<1x2x16xf32> to vector<2x16xf32>
    %cst_22 = arith.constant dense<0.000000e+00> : vector<2x8xf32>
    %41 = tpu.matmul %40, %0, %cst_22 {dimension_numbers = #tpu.dot_dimension_numbers<[1], [0], [0], [1], [0, 0, 1, 1], [], []>} : vector<2x16xf32>, vector<16x8xf32>, vector<2x8xf32> -> vector<2x8xf32>
    %42 = math.tanh %41 : vector<2x8xf32>
    %cst_23 = arith.constant dense<0.000000e+00> : vector<2x8xf32>
    %43 = tpu.matmul %42, %1, %cst_23 {dimension_numbers = #tpu.dot_dimension_numbers<[1], [0], [0], [1], [0, 0, 1, 1], [], []>} : vector<2x8xf32>, vector<8x8xf32>, vector<2x8xf32> -> vector<2x8xf32>
    %cst_24 = arith.constant dense<0xFF800000> : vector<8xf32>
    %44 = vector.multi_reduction <maximumf>, %43, %cst_24 [0] : vector<2x8xf32> to vector<8xf32>
    %45 = vector.shape_cast %44 : vector<8xf32> to vector<1x8xf32>
    %46 = vector.broadcast %45 : vector<1x8xf32> to vector<2x8xf32>
    %47 = arith.subf %43, %46 : vector<2x8xf32>
    %48 = math.exp %47 : vector<2x8xf32>
    %cst_25 = arith.constant dense<0.000000e+00> : vector<8xf32>
    %49 = vector.multi_reduction <add>, %48, %cst_25 [0] : vector<2x8xf32> to vector<8xf32>
    %50 = vector.shape_cast %49 : vector<8xf32> to vector<1x8xf32>
    %51 = vector.broadcast %50 : vector<1x8xf32> to vector<2x8xf32>
    %52 = arith.divf %48, %51 : vector<2x8xf32>
    %cst_26 = arith.constant dense<0.000000e+00> : vector<8x16xf32>
    %53 = tpu.matmul %52, %40, %cst_26 {dimension_numbers = #tpu.dot_dimension_numbers<[0], [0], [1], [1], [0, 1, 1, 1], [], []>} : vector<2x8xf32>, vector<2x16xf32>, vector<8x16xf32> -> vector<8x16xf32>
    %cst_27 = arith.constant dense<0.000000e+00> : vector<8x3xf32>
    %54 = tpu.matmul %53, %2, %cst_27 {dimension_numbers = #tpu.dot_dimension_numbers<[1], [0], [0], [1], [0, 0, 1, 1], [], []>} : vector<8x16xf32>, vector<16x3xf32>, vector<8x3xf32> -> vector<8x3xf32>
    %cst_28 = arith.constant dense<0xFF800000> : vector<3xf32>
    %55 = vector.multi_reduction <maximumf>, %54, %cst_28 [0] : vector<8x3xf32> to vector<3xf32>
    %56 = vector.shape_cast %55 : vector<3xf32> to vector<1x3xf32>
    %57 = vector.broadcast %56 : vector<1x3xf32> to vector<8x3xf32>
    %58 = arith.subf %54, %57 : vector<8x3xf32>
    %59 = math.exp %58 : vector<8x3xf32>
    %cst_29 = arith.constant dense<0.000000e+00> : vector<3xf32>
    %60 = vector.multi_reduction <add>, %59, %cst_29 [0] : vector<8x3xf32> to vector<3xf32>
    %61 = vector.shape_cast %60 : vector<3xf32> to vector<1x3xf32>
    %62 = vector.broadcast %61 : vector<1x3xf32> to vector<8x3xf32>
    %63 = arith.divf %59, %62 : vector<8x3xf32>
    %cst_30 = arith.constant dense<0.000000e+00> : vector<5x3xf32>
    %64 = tpu.matmul %3, %63, %cst_30 {dimension_numbers = #tpu.dot_dimension_numbers<[0], [0], [1], [1], [0, 1, 1, 1], [], []>} : vector<8x5xf32>, vector<8x3xf32>, vector<5x3xf32> -> vector<5x3xf32>
    %cst_31 = arith.constant dense<0xFF800000> : vector<3xf32>
    %65 = vector.multi_reduction <maximumf>, %64, %cst_31 [0] : vector<5x3xf32> to vector<3xf32>
    %66 = vector.shape_cast %65 : vector<3xf32> to vector<1x3xf32>
    %67 = vector.broadcast %66 : vector<1x3xf32> to vector<5x3xf32>
    %68 = arith.subf %64, %67 : vector<5x3xf32>
    %69 = math.exp %68 : vector<5x3xf32>
    %cst_32 = arith.constant dense<0.000000e+00> : vector<3xf32>
    %70 = vector.multi_reduction <add>, %69, %cst_32 [0] : vector<5x3xf32> to vector<3xf32>
    %71 = vector.shape_cast %70 : vector<3xf32> to vector<1x3xf32>
    %72 = vector.broadcast %71 : vector<1x3xf32> to vector<5x3xf32>
    %73 = arith.divf %69, %72 : vector<5x3xf32>
    %c2 = arith.constant 2 : index
    %c0_33 = arith.constant 0 : index
    %c0_34 = arith.constant 0 : index
    %74 = vector.load %arg0[%c2, %c0_33, %c0_34] : memref<8x2x16xf32, #tpu.memory_space<vmem>>, vector<1x2x16xf32>
    %75 = vector.shape_cast %74 : vector<1x2x16xf32> to vector<2x16xf32>
    %cst_35 = arith.constant dense<0.000000e+00> : vector<2x8xf32>
    %76 = tpu.matmul %75, %0, %cst_35 {dimension_numbers = #tpu.dot_dimension_numbers<[1], [0], [0], [1], [0, 0, 1, 1], [], []>} : vector<2x16xf32>, vector<16x8xf32>, vector<2x8xf32> -> vector<2x8xf32>
    %77 = math.tanh %76 : vector<2x8xf32>
    %cst_36 = arith.constant dense<0.000000e+00> : vector<2x8xf32>
    %78 = tpu.matmul %77, %1, %cst_36 {dimension_numbers = #tpu.dot_dimension_numbers<[1], [0], [0], [1], [0, 0, 1, 1], [], []>} : vector<2x8xf32>, vector<8x8xf32>, vector<2x8xf32> -> vector<2x8xf32>
    %cst_37 = arith.constant dense<0xFF800000> : vector<8xf32>
    %79 = vector.multi_reduction <maximumf>, %78, %cst_37 [0] : vector<2x8xf32> to vector<8xf32>
    %80 = vector.shape_cast %79 : vector<8xf32> to vector<1x8xf32>
    %81 = vector.broadcast %80 : vector<1x8xf32> to vector<2x8xf32>
    %82 = arith.subf %78, %81 : vector<2x8xf32>
    %83 = math.exp %82 : vector<2x8xf32>
    %cst_38 = arith.constant dense<0.000000e+00> : vector<8xf32>
    %84 = vector.multi_reduction <add>, %83, %cst_38 [0] : vector<2x8xf32> to vector<8xf32>
    %85 = vector.shape_cast %84 : vector<8xf32> to vector<1x8xf32>
    %86 = vector.broadcast %85 : vector<1x8xf32> to vector<2x8xf32>
    %87 = arith.divf %83, %86 : vector<2x8xf32>
    %cst_39 = arith.constant dense<0.000000e+00> : vector<8x16xf32>
    %88 = tpu.matmul %87, %75, %cst_39 {dimension_numbers = #tpu.dot_dimension_numbers<[0], [0], [1], [1], [0, 1, 1, 1], [], []>} : vector<2x8xf32>, vector<2x16xf32>, vector<8x16xf32> -> vector<8x16xf32>
    %cst_40 = arith.constant dense<0.000000e+00> : vector<8x3xf32>
    %89 = tpu.matmul %88, %2, %cst_40 {dimension_numbers = #tpu.dot_dimension_numbers<[1], [0], [0], [1], [0, 0, 1, 1], [], []>} : vector<8x16xf32>, vector<16x3xf32>, vector<8x3xf32> -> vector<8x3xf32>
    %cst_41 = arith.constant dense<0xFF800000> : vector<3xf32>
    %90 = vector.multi_reduction <maximumf>, %89, %cst_41 [0] : vector<8x3xf32> to vector<3xf32>
    %91 = vector.shape_cast %90 : vector<3xf32> to vector<1x3xf32>
    %92 = vector.broadcast %91 : vector<1x3xf32> to vector<8x3xf32>
    %93 = arith.subf %89, %92 : vector<8x3xf32>
    %94 = math.exp %93 : vector<8x3xf32>
    %cst_42 = arith.constant dense<0.000000e+00> : vector<3xf32>
    %95 = vector.multi_reduction <add>, %94, %cst_42 [0] : vector<8x3xf32> to vector<3xf32>
    %96 = vector.shape_cast %95 : vector<3xf32> to vector<1x3xf32>
    %97 = vector.broadcast %96 : vector<1x3xf32> to vector<8x3xf32>
    %98 = arith.divf %94, %97 : vector<8x3xf32>
    %cst_43 = arith.constant dense<0.000000e+00> : vector<5x3xf32>
    %99 = tpu.matmul %3, %98, %cst_43 {dimension_numbers = #tpu.dot_dimension_numbers<[0], [0], [1], [1], [0, 1, 1, 1], [], []>} : vector<8x5xf32>, vector<8x3xf32>, vector<5x3xf32> -> vector<5x3xf32>
    %cst_44 = arith.constant dense<0xFF800000> : vector<3xf32>
    %100 = vector.multi_reduction <maximumf>, %99, %cst_44 [0] : vector<5x3xf32> to vector<3xf32>
    %101 = vector.shape_cast %100 : vector<3xf32> to vector<1x3xf32>
    %102 = vector.broadcast %101 : vector<1x3xf32> to vector<5x3xf32>
    %103 = arith.subf %99, %102 : vector<5x3xf32>
    %104 = math.exp %103 : vector<5x3xf32>
    %cst_45 = arith.constant dense<0.000000e+00> : vector<3xf32>
    %105 = vector.multi_reduction <add>, %104, %cst_45 [0] : vector<5x3xf32> to vector<3xf32>
    %106 = vector.shape_cast %105 : vector<3xf32> to vector<1x3xf32>
    %107 = vector.broadcast %106 : vector<1x3xf32> to vector<5x3xf32>
    %108 = arith.divf %104, %107 : vector<5x3xf32>
    %c3 = arith.constant 3 : index
    %c0_46 = arith.constant 0 : index
    %c0_47 = arith.constant 0 : index
    %109 = vector.load %arg0[%c3, %c0_46, %c0_47] : memref<8x2x16xf32, #tpu.memory_space<vmem>>, vector<1x2x16xf32>
    %110 = vector.shape_cast %109 : vector<1x2x16xf32> to vector<2x16xf32>
    %cst_48 = arith.constant dense<0.000000e+00> : vector<2x8xf32>
    %111 = tpu.matmul %110, %0, %cst_48 {dimension_numbers = #tpu.dot_dimension_numbers<[1], [0], [0], [1], [0, 0, 1, 1], [], []>} : vector<2x16xf32>, vector<16x8xf32>, vector<2x8xf32> -> vector<2x8xf32>
    %112 = math.tanh %111 : vector<2x8xf32>
    %cst_49 = arith.constant dense<0.000000e+00> : vector<2x8xf32>
    %113 = tpu.matmul %112, %1, %cst_49 {dimension_numbers = #tpu.dot_dimension_numbers<[1], [0], [0], [1], [0, 0, 1, 1], [], []>} : vector<2x8xf32>, vector<8x8xf32>, vector<2x8xf32> -> vector<2x8xf32>
    %cst_50 = arith.constant dense<0xFF800000> : vector<8xf32>
    %114 = vector.multi_reduction <maximumf>, %113, %cst_50 [0] : vector<2x8xf32> to vector<8xf32>
    %115 = vector.shape_cast %114 : vector<8xf32> to vector<1x8xf32>
    %116 = vector.broadcast %115 : vector<1x8xf32> to vector<2x8xf32>
    %117 = arith.subf %113, %116 : vector<2x8xf32>
    %118 = math.exp %117 : vector<2x8xf32>
    %cst_51 = arith.constant dense<0.000000e+00> : vector<8xf32>
    %119 = vector.multi_reduction <add>, %118, %cst_51 [0] : vector<2x8xf32> to vector<8xf32>
    %120 = vector.shape_cast %119 : vector<8xf32> to vector<1x8xf32>
    %121 = vector.broadcast %120 : vector<1x8xf32> to vector<2x8xf32>
    %122 = arith.divf %118, %121 : vector<2x8xf32>
    %cst_52 = arith.constant dense<0.000000e+00> : vector<8x16xf32>
    %123 = tpu.matmul %122, %110, %cst_52 {dimension_numbers = #tpu.dot_dimension_numbers<[0], [0], [1], [1], [0, 1, 1, 1], [], []>} : vector<2x8xf32>, vector<2x16xf32>, vector<8x16xf32> -> vector<8x16xf32>
    %cst_53 = arith.constant dense<0.000000e+00> : vector<8x3xf32>
    %124 = tpu.matmul %123, %2, %cst_53 {dimension_numbers = #tpu.dot_dimension_numbers<[1], [0], [0], [1], [0, 0, 1, 1], [], []>} : vector<8x16xf32>, vector<16x3xf32>, vector<8x3xf32> -> vector<8x3xf32>
    %cst_54 = arith.constant dense<0xFF800000> : vector<3xf32>
    %125 = vector.multi_reduction <maximumf>, %124, %cst_54 [0] : vector<8x3xf32> to vector<3xf32>
    %126 = vector.shape_cast %125 : vector<3xf32> to vector<1x3xf32>
    %127 = vector.broadcast %126 : vector<1x3xf32> to vector<8x3xf32>
    %128 = arith.subf %124, %127 : vector<8x3xf32>
    %129 = math.exp %128 : vector<8x3xf32>
    %cst_55 = arith.constant dense<0.000000e+00> : vector<3xf32>
    %130 = vector.multi_reduction <add>, %129, %cst_55 [0] : vector<8x3xf32> to vector<3xf32>
    %131 = vector.shape_cast %130 : vector<3xf32> to vector<1x3xf32>
    %132 = vector.broadcast %131 : vector<1x3xf32> to vector<8x3xf32>
    %133 = arith.divf %129, %132 : vector<8x3xf32>
    %cst_56 = arith.constant dense<0.000000e+00> : vector<5x3xf32>
    %134 = tpu.matmul %3, %133, %cst_56 {dimension_numbers = #tpu.dot_dimension_numbers<[0], [0], [1], [1], [0, 1, 1, 1], [], []>} : vector<8x5xf32>, vector<8x3xf32>, vector<5x3xf32> -> vector<5x3xf32>
    %cst_57 = arith.constant dense<0xFF800000> : vector<3xf32>
    %135 = vector.multi_reduction <maximumf>, %134, %cst_57 [0] : vector<5x3xf32> to vector<3xf32>
    %136 = vector.shape_cast %135 : vector<3xf32> to vector<1x3xf32>
    %137 = vector.broadcast %136 : vector<1x3xf32> to vector<5x3xf32>
    %138 = arith.subf %134, %137 : vector<5x3xf32>
    %139 = math.exp %138 : vector<5x3xf32>
    %cst_58 = arith.constant dense<0.000000e+00> : vector<3xf32>
    %140 = vector.multi_reduction <add>, %139, %cst_58 [0] : vector<5x3xf32> to vector<3xf32>
    %141 = vector.shape_cast %140 : vector<3xf32> to vector<1x3xf32>
    %142 = vector.broadcast %141 : vector<1x3xf32> to vector<5x3xf32>
    %143 = arith.divf %139, %142 : vector<5x3xf32>
    %c4 = arith.constant 4 : index
    %c0_59 = arith.constant 0 : index
    %c0_60 = arith.constant 0 : index
    %144 = vector.load %arg0[%c4, %c0_59, %c0_60] : memref<8x2x16xf32, #tpu.memory_space<vmem>>, vector<1x2x16xf32>
    %145 = vector.shape_cast %144 : vector<1x2x16xf32> to vector<2x16xf32>
    %cst_61 = arith.constant dense<0.000000e+00> : vector<2x8xf32>
    %146 = tpu.matmul %145, %0, %cst_61 {dimension_numbers = #tpu.dot_dimension_numbers<[1], [0], [0], [1], [0, 0, 1, 1], [], []>} : vector<2x16xf32>, vector<16x8xf32>, vector<2x8xf32> -> vector<2x8xf32>
    %147 = math.tanh %146 : vector<2x8xf32>
    %cst_62 = arith.constant dense<0.000000e+00> : vector<2x8xf32>
    %148 = tpu.matmul %147, %1, %cst_62 {dimension_numbers = #tpu.dot_dimension_numbers<[1], [0], [0], [1], [0, 0, 1, 1], [], []>} : vector<2x8xf32>, vector<8x8xf32>, vector<2x8xf32> -> vector<2x8xf32>
    %cst_63 = arith.constant dense<0xFF800000> : vector<8xf32>
    %149 = vector.multi_reduction <maximumf>, %148, %cst_63 [0] : vector<2x8xf32> to vector<8xf32>
    %150 = vector.shape_cast %149 : vector<8xf32> to vector<1x8xf32>
    %151 = vector.broadcast %150 : vector<1x8xf32> to vector<2x8xf32>
    %152 = arith.subf %148, %151 : vector<2x8xf32>
    %153 = math.exp %152 : vector<2x8xf32>
    %cst_64 = arith.constant dense<0.000000e+00> : vector<8xf32>
    %154 = vector.multi_reduction <add>, %153, %cst_64 [0] : vector<2x8xf32> to vector<8xf32>
    %155 = vector.shape_cast %154 : vector<8xf32> to vector<1x8xf32>
    %156 = vector.broadcast %155 : vector<1x8xf32> to vector<2x8xf32>
    %157 = arith.divf %153, %156 : vector<2x8xf32>
    %cst_65 = arith.constant dense<0.000000e+00> : vector<8x16xf32>
    %158 = tpu.matmul %157, %145, %cst_65 {dimension_numbers = #tpu.dot_dimension_numbers<[0], [0], [1], [1], [0, 1, 1, 1], [], []>} : vector<2x8xf32>, vector<2x16xf32>, vector<8x16xf32> -> vector<8x16xf32>
    %cst_66 = arith.constant dense<0.000000e+00> : vector<8x3xf32>
    %159 = tpu.matmul %158, %2, %cst_66 {dimension_numbers = #tpu.dot_dimension_numbers<[1], [0], [0], [1], [0, 0, 1, 1], [], []>} : vector<8x16xf32>, vector<16x3xf32>, vector<8x3xf32> -> vector<8x3xf32>
    %cst_67 = arith.constant dense<0xFF800000> : vector<3xf32>
    %160 = vector.multi_reduction <maximumf>, %159, %cst_67 [0] : vector<8x3xf32> to vector<3xf32>
    %161 = vector.shape_cast %160 : vector<3xf32> to vector<1x3xf32>
    %162 = vector.broadcast %161 : vector<1x3xf32> to vector<8x3xf32>
    %163 = arith.subf %159, %162 : vector<8x3xf32>
    %164 = math.exp %163 : vector<8x3xf32>
    %cst_68 = arith.constant dense<0.000000e+00> : vector<3xf32>
    %165 = vector.multi_reduction <add>, %164, %cst_68 [0] : vector<8x3xf32> to vector<3xf32>
    %166 = vector.shape_cast %165 : vector<3xf32> to vector<1x3xf32>
    %167 = vector.broadcast %166 : vector<1x3xf32> to vector<8x3xf32>
    %168 = arith.divf %164, %167 : vector<8x3xf32>
    %cst_69 = arith.constant dense<0.000000e+00> : vector<5x3xf32>
    %169 = tpu.matmul %3, %168, %cst_69 {dimension_numbers = #tpu.dot_dimension_numbers<[0], [0], [1], [1], [0, 1, 1, 1], [], []>} : vector<8x5xf32>, vector<8x3xf32>, vector<5x3xf32> -> vector<5x3xf32>
    %cst_70 = arith.constant dense<0xFF800000> : vector<3xf32>
    %170 = vector.multi_reduction <maximumf>, %169, %cst_70 [0] : vector<5x3xf32> to vector<3xf32>
    %171 = vector.shape_cast %170 : vector<3xf32> to vector<1x3xf32>
    %172 = vector.broadcast %171 : vector<1x3xf32> to vector<5x3xf32>
    %173 = arith.subf %169, %172 : vector<5x3xf32>
    %174 = math.exp %173 : vector<5x3xf32>
    %cst_71 = arith.constant dense<0.000000e+00> : vector<3xf32>
    %175 = vector.multi_reduction <add>, %174, %cst_71 [0] : vector<5x3xf32> to vector<3xf32>
    %176 = vector.shape_cast %175 : vector<3xf32> to vector<1x3xf32>
    %177 = vector.broadcast %176 : vector<1x3xf32> to vector<5x3xf32>
    %178 = arith.divf %174, %177 : vector<5x3xf32>
    %c5 = arith.constant 5 : index
    %c0_72 = arith.constant 0 : index
    %c0_73 = arith.constant 0 : index
    %179 = vector.load %arg0[%c5, %c0_72, %c0_73] : memref<8x2x16xf32, #tpu.memory_space<vmem>>, vector<1x2x16xf32>
    %180 = vector.shape_cast %179 : vector<1x2x16xf32> to vector<2x16xf32>
    %cst_74 = arith.constant dense<0.000000e+00> : vector<2x8xf32>
    %181 = tpu.matmul %180, %0, %cst_74 {dimension_numbers = #tpu.dot_dimension_numbers<[1], [0], [0], [1], [0, 0, 1, 1], [], []>} : vector<2x16xf32>, vector<16x8xf32>, vector<2x8xf32> -> vector<2x8xf32>
    %182 = math.tanh %181 : vector<2x8xf32>
    %cst_75 = arith.constant dense<0.000000e+00> : vector<2x8xf32>
    %183 = tpu.matmul %182, %1, %cst_75 {dimension_numbers = #tpu.dot_dimension_numbers<[1], [0], [0], [1], [0, 0, 1, 1], [], []>} : vector<2x8xf32>, vector<8x8xf32>, vector<2x8xf32> -> vector<2x8xf32>
    %cst_76 = arith.constant dense<0xFF800000> : vector<8xf32>
    %184 = vector.multi_reduction <maximumf>, %183, %cst_76 [0] : vector<2x8xf32> to vector<8xf32>
    %185 = vector.shape_cast %184 : vector<8xf32> to vector<1x8xf32>
    %186 = vector.broadcast %185 : vector<1x8xf32> to vector<2x8xf32>
    %187 = arith.subf %183, %186 : vector<2x8xf32>
    %188 = math.exp %187 : vector<2x8xf32>
    %cst_77 = arith.constant dense<0.000000e+00> : vector<8xf32>
    %189 = vector.multi_reduction <add>, %188, %cst_77 [0] : vector<2x8xf32> to vector<8xf32>
    %190 = vector.shape_cast %189 : vector<8xf32> to vector<1x8xf32>
    %191 = vector.broadcast %190 : vector<1x8xf32> to vector<2x8xf32>
    %192 = arith.divf %188, %191 : vector<2x8xf32>
    %cst_78 = arith.constant dense<0.000000e+00> : vector<8x16xf32>
    %193 = tpu.matmul %192, %180, %cst_78 {dimension_numbers = #tpu.dot_dimension_numbers<[0], [0], [1], [1], [0, 1, 1, 1], [], []>} : vector<2x8xf32>, vector<2x16xf32>, vector<8x16xf32> -> vector<8x16xf32>
    %cst_79 = arith.constant dense<0.000000e+00> : vector<8x3xf32>
    %194 = tpu.matmul %193, %2, %cst_79 {dimension_numbers = #tpu.dot_dimension_numbers<[1], [0], [0], [1], [0, 0, 1, 1], [], []>} : vector<8x16xf32>, vector<16x3xf32>, vector<8x3xf32> -> vector<8x3xf32>
    %cst_80 = arith.constant dense<0xFF800000> : vector<3xf32>
    %195 = vector.multi_reduction <maximumf>, %194, %cst_80 [0] : vector<8x3xf32> to vector<3xf32>
    %196 = vector.shape_cast %195 : vector<3xf32> to vector<1x3xf32>
    %197 = vector.broadcast %196 : vector<1x3xf32> to vector<8x3xf32>
    %198 = arith.subf %194, %197 : vector<8x3xf32>
    %199 = math.exp %198 : vector<8x3xf32>
    %cst_81 = arith.constant dense<0.000000e+00> : vector<3xf32>
    %200 = vector.multi_reduction <add>, %199, %cst_81 [0] : vector<8x3xf32> to vector<3xf32>
    %201 = vector.shape_cast %200 : vector<3xf32> to vector<1x3xf32>
    %202 = vector.broadcast %201 : vector<1x3xf32> to vector<8x3xf32>
    %203 = arith.divf %199, %202 : vector<8x3xf32>
    %cst_82 = arith.constant dense<0.000000e+00> : vector<5x3xf32>
    %204 = tpu.matmul %3, %203, %cst_82 {dimension_numbers = #tpu.dot_dimension_numbers<[0], [0], [1], [1], [0, 1, 1, 1], [], []>} : vector<8x5xf32>, vector<8x3xf32>, vector<5x3xf32> -> vector<5x3xf32>
    %cst_83 = arith.constant dense<0xFF800000> : vector<3xf32>
    %205 = vector.multi_reduction <maximumf>, %204, %cst_83 [0] : vector<5x3xf32> to vector<3xf32>
    %206 = vector.shape_cast %205 : vector<3xf32> to vector<1x3xf32>
    %207 = vector.broadcast %206 : vector<1x3xf32> to vector<5x3xf32>
    %208 = arith.subf %204, %207 : vector<5x3xf32>
    %209 = math.exp %208 : vector<5x3xf32>
    %cst_84 = arith.constant dense<0.000000e+00> : vector<3xf32>
    %210 = vector.multi_reduction <add>, %209, %cst_84 [0] : vector<5x3xf32> to vector<3xf32>
    %211 = vector.shape_cast %210 : vector<3xf32> to vector<1x3xf32>
    %212 = vector.broadcast %211 : vector<1x3xf32> to vector<5x3xf32>
    %213 = arith.divf %209, %212 : vector<5x3xf32>
    %c6 = arith.constant 6 : index
    %c0_85 = arith.constant 0 : index
    %c0_86 = arith.constant 0 : index
    %214 = vector.load %arg0[%c6, %c0_85, %c0_86] : memref<8x2x16xf32, #tpu.memory_space<vmem>>, vector<1x2x16xf32>
    %215 = vector.shape_cast %214 : vector<1x2x16xf32> to vector<2x16xf32>
    %cst_87 = arith.constant dense<0.000000e+00> : vector<2x8xf32>
    %216 = tpu.matmul %215, %0, %cst_87 {dimension_numbers = #tpu.dot_dimension_numbers<[1], [0], [0], [1], [0, 0, 1, 1], [], []>} : vector<2x16xf32>, vector<16x8xf32>, vector<2x8xf32> -> vector<2x8xf32>
    %217 = math.tanh %216 : vector<2x8xf32>
    %cst_88 = arith.constant dense<0.000000e+00> : vector<2x8xf32>
    %218 = tpu.matmul %217, %1, %cst_88 {dimension_numbers = #tpu.dot_dimension_numbers<[1], [0], [0], [1], [0, 0, 1, 1], [], []>} : vector<2x8xf32>, vector<8x8xf32>, vector<2x8xf32> -> vector<2x8xf32>
    %cst_89 = arith.constant dense<0xFF800000> : vector<8xf32>
    %219 = vector.multi_reduction <maximumf>, %218, %cst_89 [0] : vector<2x8xf32> to vector<8xf32>
    %220 = vector.shape_cast %219 : vector<8xf32> to vector<1x8xf32>
    %221 = vector.broadcast %220 : vector<1x8xf32> to vector<2x8xf32>
    %222 = arith.subf %218, %221 : vector<2x8xf32>
    %223 = math.exp %222 : vector<2x8xf32>
    %cst_90 = arith.constant dense<0.000000e+00> : vector<8xf32>
    %224 = vector.multi_reduction <add>, %223, %cst_90 [0] : vector<2x8xf32> to vector<8xf32>
    %225 = vector.shape_cast %224 : vector<8xf32> to vector<1x8xf32>
    %226 = vector.broadcast %225 : vector<1x8xf32> to vector<2x8xf32>
    %227 = arith.divf %223, %226 : vector<2x8xf32>
    %cst_91 = arith.constant dense<0.000000e+00> : vector<8x16xf32>
    %228 = tpu.matmul %227, %215, %cst_91 {dimension_numbers = #tpu.dot_dimension_numbers<[0], [0], [1], [1], [0, 1, 1, 1], [], []>} : vector<2x8xf32>, vector<2x16xf32>, vector<8x16xf32> -> vector<8x16xf32>
    %cst_92 = arith.constant dense<0.000000e+00> : vector<8x3xf32>
    %229 = tpu.matmul %228, %2, %cst_92 {dimension_numbers = #tpu.dot_dimension_numbers<[1], [0], [0], [1], [0, 0, 1, 1], [], []>} : vector<8x16xf32>, vector<16x3xf32>, vector<8x3xf32> -> vector<8x3xf32>
    %cst_93 = arith.constant dense<0xFF800000> : vector<3xf32>
    %230 = vector.multi_reduction <maximumf>, %229, %cst_93 [0] : vector<8x3xf32> to vector<3xf32>
    %231 = vector.shape_cast %230 : vector<3xf32> to vector<1x3xf32>
    %232 = vector.broadcast %231 : vector<1x3xf32> to vector<8x3xf32>
    %233 = arith.subf %229, %232 : vector<8x3xf32>
    %234 = math.exp %233 : vector<8x3xf32>
    %cst_94 = arith.constant dense<0.000000e+00> : vector<3xf32>
    %235 = vector.multi_reduction <add>, %234, %cst_94 [0] : vector<8x3xf32> to vector<3xf32>
    %236 = vector.shape_cast %235 : vector<3xf32> to vector<1x3xf32>
    %237 = vector.broadcast %236 : vector<1x3xf32> to vector<8x3xf32>
    %238 = arith.divf %234, %237 : vector<8x3xf32>
    %cst_95 = arith.constant dense<0.000000e+00> : vector<5x3xf32>
    %239 = tpu.matmul %3, %238, %cst_95 {dimension_numbers = #tpu.dot_dimension_numbers<[0], [0], [1], [1], [0, 1, 1, 1], [], []>} : vector<8x5xf32>, vector<8x3xf32>, vector<5x3xf32> -> vector<5x3xf32>
    %cst_96 = arith.constant dense<0xFF800000> : vector<3xf32>
    %240 = vector.multi_reduction <maximumf>, %239, %cst_96 [0] : vector<5x3xf32> to vector<3xf32>
    %241 = vector.shape_cast %240 : vector<3xf32> to vector<1x3xf32>
    %242 = vector.broadcast %241 : vector<1x3xf32> to vector<5x3xf32>
    %243 = arith.subf %239, %242 : vector<5x3xf32>
    %244 = math.exp %243 : vector<5x3xf32>
    %cst_97 = arith.constant dense<0.000000e+00> : vector<3xf32>
    %245 = vector.multi_reduction <add>, %244, %cst_97 [0] : vector<5x3xf32> to vector<3xf32>
    %246 = vector.shape_cast %245 : vector<3xf32> to vector<1x3xf32>
    %247 = vector.broadcast %246 : vector<1x3xf32> to vector<5x3xf32>
    %248 = arith.divf %244, %247 : vector<5x3xf32>
    %c7 = arith.constant 7 : index
    %c0_98 = arith.constant 0 : index
    %c0_99 = arith.constant 0 : index
    %249 = vector.load %arg0[%c7, %c0_98, %c0_99] : memref<8x2x16xf32, #tpu.memory_space<vmem>>, vector<1x2x16xf32>
    %250 = vector.shape_cast %249 : vector<1x2x16xf32> to vector<2x16xf32>
    %cst_100 = arith.constant dense<0.000000e+00> : vector<2x8xf32>
    %251 = tpu.matmul %250, %0, %cst_100 {dimension_numbers = #tpu.dot_dimension_numbers<[1], [0], [0], [1], [0, 0, 1, 1], [], []>} : vector<2x16xf32>, vector<16x8xf32>, vector<2x8xf32> -> vector<2x8xf32>
    %252 = math.tanh %251 : vector<2x8xf32>
    %cst_101 = arith.constant dense<0.000000e+00> : vector<2x8xf32>
    %253 = tpu.matmul %252, %1, %cst_101 {dimension_numbers = #tpu.dot_dimension_numbers<[1], [0], [0], [1], [0, 0, 1, 1], [], []>} : vector<2x8xf32>, vector<8x8xf32>, vector<2x8xf32> -> vector<2x8xf32>
    %cst_102 = arith.constant dense<0xFF800000> : vector<8xf32>
    %254 = vector.multi_reduction <maximumf>, %253, %cst_102 [0] : vector<2x8xf32> to vector<8xf32>
    %255 = vector.shape_cast %254 : vector<8xf32> to vector<1x8xf32>
    %256 = vector.broadcast %255 : vector<1x8xf32> to vector<2x8xf32>
    %257 = arith.subf %253, %256 : vector<2x8xf32>
    %258 = math.exp %257 : vector<2x8xf32>
    %cst_103 = arith.constant dense<0.000000e+00> : vector<8xf32>
    %259 = vector.multi_reduction <add>, %258, %cst_103 [0] : vector<2x8xf32> to vector<8xf32>
    %260 = vector.shape_cast %259 : vector<8xf32> to vector<1x8xf32>
    %261 = vector.broadcast %260 : vector<1x8xf32> to vector<2x8xf32>
    %262 = arith.divf %258, %261 : vector<2x8xf32>
    %cst_104 = arith.constant dense<0.000000e+00> : vector<8x16xf32>
    %263 = tpu.matmul %262, %250, %cst_104 {dimension_numbers = #tpu.dot_dimension_numbers<[0], [0], [1], [1], [0, 1, 1, 1], [], []>} : vector<2x8xf32>, vector<2x16xf32>, vector<8x16xf32> -> vector<8x16xf32>
    %cst_105 = arith.constant dense<0.000000e+00> : vector<8x3xf32>
    %264 = tpu.matmul %263, %2, %cst_105 {dimension_numbers = #tpu.dot_dimension_numbers<[1], [0], [0], [1], [0, 0, 1, 1], [], []>} : vector<8x16xf32>, vector<16x3xf32>, vector<8x3xf32> -> vector<8x3xf32>
    %cst_106 = arith.constant dense<0xFF800000> : vector<3xf32>
    %265 = vector.multi_reduction <maximumf>, %264, %cst_106 [0] : vector<8x3xf32> to vector<3xf32>
    %266 = vector.shape_cast %265 : vector<3xf32> to vector<1x3xf32>
    %267 = vector.broadcast %266 : vector<1x3xf32> to vector<8x3xf32>
    %268 = arith.subf %264, %267 : vector<8x3xf32>
    %269 = math.exp %268 : vector<8x3xf32>
    %cst_107 = arith.constant dense<0.000000e+00> : vector<3xf32>
    %270 = vector.multi_reduction <add>, %269, %cst_107 [0] : vector<8x3xf32> to vector<3xf32>
    %271 = vector.shape_cast %270 : vector<3xf32> to vector<1x3xf32>
    %272 = vector.broadcast %271 : vector<1x3xf32> to vector<8x3xf32>
    %273 = arith.divf %269, %272 : vector<8x3xf32>
    %cst_108 = arith.constant dense<0.000000e+00> : vector<5x3xf32>
    %274 = tpu.matmul %3, %273, %cst_108 {dimension_numbers = #tpu.dot_dimension_numbers<[0], [0], [1], [1], [0, 1, 1, 1], [], []>} : vector<8x5xf32>, vector<8x3xf32>, vector<5x3xf32> -> vector<5x3xf32>
    %cst_109 = arith.constant dense<0xFF800000> : vector<3xf32>
    %275 = vector.multi_reduction <maximumf>, %274, %cst_109 [0] : vector<5x3xf32> to vector<3xf32>
    %276 = vector.shape_cast %275 : vector<3xf32> to vector<1x3xf32>
    %277 = vector.broadcast %276 : vector<1x3xf32> to vector<5x3xf32>
    %278 = arith.subf %274, %277 : vector<5x3xf32>
    %279 = math.exp %278 : vector<5x3xf32>
    %cst_110 = arith.constant dense<0.000000e+00> : vector<3xf32>
    %280 = vector.multi_reduction <add>, %279, %cst_110 [0] : vector<5x3xf32> to vector<3xf32>
    %281 = vector.shape_cast %280 : vector<3xf32> to vector<1x3xf32>
    %282 = vector.broadcast %281 : vector<1x3xf32> to vector<5x3xf32>
    %283 = arith.divf %279, %282 : vector<5x3xf32>
    %284 = vector.shape_cast %38 : vector<5x3xf32> to vector<1x5x3xf32>
    %285 = vector.shape_cast %73 : vector<5x3xf32> to vector<1x5x3xf32>
    %286 = vector.shape_cast %108 : vector<5x3xf32> to vector<1x5x3xf32>
    %287 = vector.shape_cast %143 : vector<5x3xf32> to vector<1x5x3xf32>
    %288 = vector.shape_cast %178 : vector<5x3xf32> to vector<1x5x3xf32>
    %289 = vector.shape_cast %213 : vector<5x3xf32> to vector<1x5x3xf32>
    %290 = vector.shape_cast %248 : vector<5x3xf32> to vector<1x5x3xf32>
    %291 = vector.shape_cast %283 : vector<5x3xf32> to vector<1x5x3xf32>
    %292 = tpu.concatenate %284, %285, %286, %287, %288, %289, %290, %291 in 0 : vector<1x5x3xf32>, vector<1x5x3xf32>, vector<1x5x3xf32>, vector<1x5x3xf32>, vector<1x5x3xf32>, vector<1x5x3xf32>, vector<1x5x3xf32>, vector<1x5x3xf32> -> vector<8x5x3xf32>
    %c0_111 = arith.constant 0 : index
    %c0_112 = arith.constant 0 : index
    %c0_113 = arith.constant 0 : index
    %293 = vector.load %arg5[%c0_111, %c0_112, %c0_113] : memref<8x5x3xf32, #tpu.memory_space<vmem>>, vector<8x5x3xf32>
    tpu.vector_store %arg5[%c0_111, %c0_112, %c0_113], %292 {strides = array<i32>} : memref<8x5x3xf32, #tpu.memory_space<vmem>>, vector<8x5x3xf32>,
    return
  }
}

</mosaic_0001>

<bundles_post_ra>
// kernel: sabirnn_forward.5
= control target key start
LH: loop header
LB: loop body
LE: loop exit
PB: predicated region body
PF: predicated region fallthrough
CT: control target
= control target key end

     0   :  { %v896_v1 = vmov 0.0   ;;  %vm897_vm0 = vmmov 0   ;;  %s1054_s0 = inlined_call_operand.vmem [shape: f32[2,8,32], index: 0, kind: input, shape index: {}]   ;;  %s1055_s1 = inlined_call_operand.vmem [shape: f32[32,16], index: 1, kind: input, shape index: {}]   ;;  %s1056_s2 = inlined_call_operand.vmem [shape: f32[16,4], index: 2, kind: input, shape index: {}]   ;;  %s1057_s3 = inlined_call_operand.vmem [shape: f32[32,8], index: 3, kind: input, shape index: {}]   ;;  %s1058_s4 = inlined_call_operand.vmem [shape: f32[2,8,4], index: 4, kind: output, shape index: {0}]   ;;  %s1059_s5 = inlined_call_operand.hbm [shape: f32[2,4,8], index: 5, kind: output, shape index: {1}]  }
   0x1   :  { %v934_v0 = vld [vmem:[%s1055_s1 + $0x18] sm:$0xff]  ;;  %789 = vmatprep.subr.mxu0 %v896_v1  ;;  %v940_v2 = vld [vmem:[%s1055_s1 + $0x10] sm:$0xff]  ;;  %797 = vmatprep.mubr.msk.f32.mxu0 %vm897_vm0, %v896_v1 }
   0x2   :  { %11 = vsyncpa [#allocation3], 0  ;;  %790 = vmatpush3.msra.mxu0 %v934_v0  ;;  %800 = vmatprep.subr.mxu1 %v896_v1  ;;  %v950_v3 = vld [vmem:[%s1055_s1 + $0x8] sm:$0xff]  ;;  %v959_v4 = vld [vmem:[%s1055_s1] sm:$0xff]  ;;  %vm31_vm1 = vcmask 261120   ;;  %vm106_vm2 = vcmask 130048  }
   0x3   :  { %791 = vmatprep.subr.mxu0 %v896_v1  ;;  %804 = vmatprep.mubr.msk.f32.mxu1 %vm897_vm0, %v896_v1  ;;  %v30_v5 = vld [vmem:[%s1054_s0] sm:$0xff]  ;;  %v974_v6 = vld [vmem:[%s1056_s2 + $0x8] sm:$0xff]  ;;  %vm180_vm3 = vcmask 31744   ;;  %v29_v32 = vld [vmem:[%s1057_s3 + $0x18] sm:$0xff]  ;;  %vm232_vm4 = vcmask 64512   ;;  %vm727_vm5 = vcmask 60416  }
   0x4   :  { %792 = vmatpush3.msra.mxu0 %v940_v2  ;;  %v979_v7 = vld [vmem:[%s1056_s2] sm:$0xff]  ;;  %801 = vmatpush3.msra.mxu1 %v974_v6  ;;  %v28_v33 = vld [vmem:[%s1057_s3 + $0x10] sm:$0xff]  ;;  %v27_v34 = vld [vmem:[%s1057_s3 + $0x8] sm:$0xff]  ;;  %s898_s17 = smov [#allocation2]  }
   0x5   :  { %793 = vmatprep.subr.mxu0 %v896_v1  ;;  %802 = vmatprep.subr.mxu1 %v896_v1  ;;  %v754_v36 = vld [vmem:[%s1054_s0 + $0x8] sm:$0xff]  ;;  %v26_v37 = vld [vmem:[%s1057_s3] sm:$0xff]  ;;  %s737_s18 = sshll.u32 %s898_s17, 4  ;;  %s738_s18 = int_to_ptr.vmem [resolvable:$true] %s737_s18 }
   0x6   :  { %794 = vmatpush3.msra.mxu0 %v950_v3  ;;  %803 = vmatpush3.msra.mxu1 %v979_v7  ;;  %s874_s19 = scalar_lea.vmem %s738_s18, 128  ;;  %p879_p1 = scmp.lt.s32.totalorder %s738_s18, %s738_s18 }
   0x7   :  { %795 = vmatprep.subr.mxu0 %v896_v1  ;;  %807 = vmatprep.subr.mxu1 %v896_v1  ;;  %p875_p0 = scmp.ne.s32.totalorder %s738_s18, %s874_s19  ;;  %p880_p2 = scmp.lt.s32.totalorder %s874_s19, %s874_s19 }
   0x8   :  { %796 = vmatpush3.msra.mxu0 %v959_v4 }
   0x9   :  { %798 = vmatmul.mubr.msk.f32.vlgmr.msra.gmra.mxu0 %vm31_vm1, %v30_v5  ;;  %812 = vmatprep.subr.mxu0 %v896_v1  ;;  %p881_p3 = por %p880_p2, %p879_p1 }
   0xa   :  { %820 = vmatprep.mubr.msk.f32.mxu0 %vm897_vm0, %v896_v1  ;;  %813 = vmatpush3.msra.mxu0 %v29_v32 }
   0xb   :  { %814 = vmatprep.subr.mxu0 %v896_v1  ;;  %p882_p4 = pnand %p881_p3, %p875_p0 }
   0xc   :  { %815 = vmatpush3.msra.mxu0 %v28_v33 }
   0xd   :  { %816 = vmatprep.subr.mxu0 %v896_v1 }
   0xe   :  { %817 = vmatpush3.msra.mxu0 %v27_v34 }
   0xf   :  { %818 = vmatprep.subr.mxu0 %v896_v1 }
  0x10   :  { %819 = vmatpush3.msra.mxu0 %v26_v37 }
  0x11   :  { %846 = vmatprep.subr.mxu0 %v896_v1 }
  0xc9   :  { %v101_v8 = vpop.f32.mrf.mxu0 }
  0xca   :  { %862 = vtanh.f32 %v101_v8 }
  0xcb   :  { %v799_v9 = vpop.f32.mrf.mxu0 }
  0xd7   :  { %v863_v10 = vpop.eup %862 }
  0xd8   :  { %805 = vmatmul.mubr.msk.f32.vlgmr.msra.gmra.mxu1 %vm106_vm2, %v863_v10 }
  0xd9   :  { %808 = vmatpush3.msra.mxu1 %v30_v5  ;;  %809 = vmatprep.mubr.msk.f32.mxu1 %vm897_vm0, %v896_v1 }
  0xda   :  { %823 = vmatprep.subr.mxu1 %v896_v1 }
 0x198   :  { %v176_v11 = vpop.f32.mrf.mxu1 }
 0x199   :  { %v181_v12 = vsel %vm180_vm3, %v176_v11, -inf }
 0x19a   :  { %v182_v13 = vrot.slane %v181_v12, 4  ;;  %v806_v14 = vpop.f32.mrf.mxu1 }
 0x19c   :  { %v183_v15 = vmax.f32 %v181_v12, %v182_v13 }
 0x19e   :  { %v184_v16 = vrot.slane %v183_v15, 2 }
 0x1a0   :  { %v185_v17 = vmax.f32 %v183_v15, %v184_v16 }
 0x1a2   :  { %v186_v18 = vrot.slane %v185_v17, 1 }
 0x1a4   :  { %v187_v19 = vmax.f32 %v185_v17, %v186_v18 }
 0x1a6   :  { %v188_v20 = vsub.f32 %v176_v11, %v187_v19 }
 0x1a8   :  { %v189_v21 = vmul.f32 1.442695, %v188_v20 }
 0x1aa   :  { %864 = vpow2.f32 %v189_v21 }
 0x1b7   :  { %v865_v22 = vpop.eup %864 }
 0x1b8   :  { %v191_v23 = vsel %vm180_vm3, %v865_v22, 0.0 }
 0x1b9   :  { %v192_v24 = vrot.slane %v191_v23, 4 }
 0x1bb   :  { %v193_v25 = vadd.f32 %v192_v24, %v191_v23 }
 0x1bd   :  { %v194_v26 = vrot.slane %v193_v25, 2 }
 0x1bf   :  { %v195_v27 = vadd.f32 %v194_v26, %v193_v25 }
 0x1c1   :  { %v196_v28 = vrot.slane %v195_v27, 1 }
 0x1c3   :  { %v197_v29 = vadd.f32 %v196_v28, %v195_v27 }
 0x1c5   :  { %866 = vrcp.f32 %v197_v29 }
 0x1d2   :  { %v867_v30 = vpop.eup %866 }
 0x1d3   :  { %v199_v31 = vmul.f32 %v867_v30, %v865_v22 }
 0x1d5   :  { %200 = vxpose.xlu0.b32.start.end [1/1] (short) (narrow) %v199_v31, 8  ;;  %725 = vst.msk [vmem:[%s1058_s4] sm:$0xff] %vm180_vm3, %v199_v31 }
 0x251   :  { %v216_v35 = vpop.trf.xlu0 }
 0x252   :  { %810 = vmatmul.mubr.msk.f32.vlgmr.msra.gmra.mxu1 %vm232_vm4, %v216_v35 }
 0x253   :  { %824 = vmatpush3.msra.mxu1 %v934_v0  ;;  %831 = vmatprep.mubr.msk.f32.mxu1 %vm897_vm0, %v896_v1 }
 0x254   :  { %825 = vmatprep.subr.mxu1 %v896_v1 }
 0x255   :  { %826 = vmatpush3.msra.mxu1 %v940_v2 }
 0x256   :  { %827 = vmatprep.subr.mxu1 %v896_v1 }
 0x257   :  { %828 = vmatpush3.msra.mxu1 %v950_v3 }
 0x258   :  { %829 = vmatprep.subr.mxu1 %v896_v1 }
 0x259   :  { %830 = vmatpush3.msra.mxu1 %v959_v4 }
 0x25a   :  { %832 = vmatmul.mubr.msk.f32.vlgmr.msra.gmra.mxu1 %vm31_vm1, %v754_v36  ;;  %834 = vmatprep.subr.mxu1 %v896_v1 }
 0x25b   :  { %835 = vmatpush3.msra.mxu1 %v974_v6  ;;  %838 = vmatprep.mubr.msk.f32.mxu1 %vm897_vm0, %v896_v1 }
 0x25c   :  { %836 = vmatprep.subr.mxu1 %v896_v1 }
 0x25d   :  { %837 = vmatpush3.msra.mxu1 %v979_v7 }
 0x25e   :  { %841 = vmatprep.subr.mxu1 %v896_v1 }
 0x312   :  { %v302_v38 = vpop.f32.mrf.mxu1 }
 0x313   :  { %821 = vmatmul.mubr.msk.f32.vlgmr.msra.gmra.mxu0 %vm31_vm1, %v302_v38 }
 0x314   :  { %v811_v39 = vpop.f32.mrf.mxu1  ;;  %847 = vmatpush3.msra.mxu0 %v29_v32  ;;  %854 = vmatprep.mubr.msk.f32.mxu0 %vm897_vm0, %v896_v1 }
 0x315   :  { %848 = vmatprep.subr.mxu0 %v896_v1 }
 0x316   :  { %849 = vmatpush3.msra.mxu0 %v28_v33 }
 0x317   :  { %850 = vmatprep.subr.mxu0 %v896_v1 }
 0x318   :  { %851 = vmatpush3.msra.mxu0 %v27_v34 }
 0x319   :  { %852 = vmatprep.subr.mxu0 %v896_v1 }
 0x31a   :  { %v450_v40 = vpop.f32.mrf.mxu1  ;;  %853 = vmatpush3.msra.mxu0 %v26_v37 }
 0x31b   :  { %868 = vtanh.f32 %v450_v40 }
 0x31c   :  { %v833_v41 = vpop.f32.mrf.mxu1 }
 0x328   :  { %v869_v42 = vpop.eup %868 }
 0x329   :  { %839 = vmatmul.mubr.msk.f32.vlgmr.msra.gmra.mxu1 %vm106_vm2, %v869_v42 }
 0x32a   :  { %842 = vmatpush3.msra.mxu1 %v754_v36  ;;  %843 = vmatprep.mubr.msk.f32.mxu1 %vm897_vm0, %v896_v1 }
 0x3d3   :  { %v375_v43 = vpop.f32.mrf.mxu0 }
 0x3d4   :  { %728 = vst.msk [vmem:[#allocation2] sm:$0xf] %vm727_vm5, %v375_v43 }
 0x3d5   :  { %v822_v44 = vpop.f32.mrf.mxu0 }
 0x3e9   :  { %v524_v45 = vpop.f32.mrf.mxu1 }
 0x3ea   :  { %v528_v46 = vsel %vm180_vm3, %v524_v45, -inf }
 0x3eb   :  { %v529_v47 = vrot.slane %v528_v46, 4  ;;  %v840_v48 = vpop.f32.mrf.mxu1 }
 0x3ed   :  { %v530_v49 = vmax.f32 %v528_v46, %v529_v47 }
 0x3ef   :  { %v531_v50 = vrot.slane %v530_v49, 2 }
 0x3f1   :  { %v532_v51 = vmax.f32 %v530_v49, %v531_v50 }
 0x3f3   :  { %v533_v52 = vrot.slane %v532_v51, 1 }
 0x3f5   :  { %v534_v53 = vmax.f32 %v532_v51, %v533_v52 }
 0x3f7   :  { %v535_v54 = vsub.f32 %v524_v45, %v534_v53 }
 0x3f9   :  { %v536_v55 = vmul.f32 1.442695, %v535_v54 }
 0x3fb   :  { %870 = vpow2.f32 %v536_v55 }
 0x408   :  { %v871_v56 = vpop.eup %870 }
 0x409   :  { %v538_v57 = vsel %vm180_vm3, %v871_v56, 0.0 }
 0x40a   :  { %v539_v58 = vrot.slane %v538_v57, 4 }
 0x40c   :  { %v540_v59 = vadd.f32 %v539_v58, %v538_v57 }
 0x40e   :  { %v541_v60 = vrot.slane %v540_v59, 2 }
 0x410   :  { %v542_v61 = vadd.f32 %v541_v60, %v540_v59 }
 0x412   :  { %v543_v62 = vrot.slane %v542_v61, 1 }
 0x414   :  { %v544_v63 = vadd.f32 %v543_v62, %v542_v61 }
 0x416   :  { %872 = vrcp.f32 %v544_v63 }
 0x423   :  { %v873_v0 = vpop.eup %872 }
 0x424   :  { %v546_v1 = vmul.f32 %v873_v0, %v871_v56 }
 0x426   :  { %547 = vxpose.xlu0.b32.start.end [1/1] (short) (narrow) %v546_v1, 8  ;;  %726 = vst.msk [vmem:[%s1058_s4 + $0x8] sm:$0xff] %vm180_vm3, %v546_v1 }
 0x4a2   :  { %v563_v2 = vpop.trf.xlu0 }
 0x4a3   :  { %844 = vmatmul.mubr.msk.f32.vlgmr.msra.gmra.mxu1 %vm232_vm4, %v563_v2 }
 0x563   :  { %v648_v3 = vpop.f32.mrf.mxu1 }
 0x564   :  { %855 = vmatmul.mubr.msk.f32.vlgmr.msra.gmra.mxu0 %vm31_vm1, %v648_v3 }
 0x565   :  { %v845_v4 = vpop.f32.mrf.mxu1 }
 0x624   :  { %v721_v5 = vpop.f32.mrf.mxu0 }
 0x625   :  { %729 = vst.msk [vmem:[#allocation2 + $0x4] sm:$0xf] %vm727_vm5, %v721_v5 }
 0x626   :  { %v856_v6 = vpop.f32.mrf.mxu0 }
 0x627   :  { %885 = shalt.err (!%p882_p4)
}
 0x628   :  { %s899_s4 = smov 64   ;;  %s900_s20 = smov 4  }
 0x629   :  { %743 = dma.vmem_to_hbm [thread:$0]  %s738_s18, 128, %s1059_s5, [#allocation3], %s899_s4, %s899_s4, %s900_s20  }
 0x62a   :  { %894 = dma.done.wait [#allocation3], 128  }
 0x62b   :  { %895 = vsyncadd [#allocation3], 4294967168 }
 0x62c   :  { %749 = vsyncpa [#allocation3], 1 }

// kernel: sabirnn_forward.6
= control target key start
LH: loop header
LB: loop body
LE: loop exit
PB: predicated region body
PF: predicated region fallthrough
CT: control target
= control target key end

     0   :  { %vm37_vm0 = vcmask 1043456   ;;  %vm30_vm1 = vcmask 31744   ;;  %v436_v0 = vmov 0.0   ;;  %vm437_vm2 = vmmov 0   ;;  %s438_s29 = smov 96   ;;  %s441_s30 = smov 16   ;;  %s523_s1 = inlined_call_operand.vmem [shape: f32[4,48], index: 1, kind: input, shape index: {}]   ;;  %s524_s3 = inlined_call_operand.vmem [shape: f32[16,48], index: 3, kind: input, shape index: {}]   ;;  %s525_s0 = inlined_call_operand.vmem [shape: f32[16,4], index: 0, kind: input, shape index: {}]   ;;  %s526_s2 = inlined_call_operand.vmem [shape: f32[1,48], index: 2, kind: input, shape index: {}]   ;;  %s527_s4 = inlined_call_operand.vmem [shape: f32[1,48], index: 4, kind: input, shape index: {}]   ;;  %s528_s5 = inlined_call_operand.vmem [shape: f32[2,8,16], index: 5, kind: output, shape index: {}]  }
   0x1   :  { %402 = vmatprep.subr.mxu1 %v436_v0  ;;  %v22_v1 = vld [vmem:[%s523_s1] sm:$0xf]  ;;  %v117_v2 = vld [vmem:[%s524_s3 + $0x8] sm:$0xff]  ;;  %406 = vmatprep.mubr.msk.f32.mxu1 %vm437_vm2, %v436_v0  ;;  %v125_v6 = vlaneseq  ;;  %vm243_vm12 = vcmask 64512   ;;  %vm137_vm13 = vcmask 130048   ;;  %s442_s8 = smov 88  }
   0x2   :  { %v20_v3 = vld [vmem:[%s525_s0] sm:$0xff]  ;;  %397 = vmatprep.subr.msk.mxu0 %vm37_vm0, %v22_v1  ;;  %403 = vmatpush3.msra.mxu1 %v117_v2  ;;  %v21_v4 = vld [vmem:[%s525_s0 + $0x8] sm:$0xff]  ;;  %s443_s9 = smov 8   ;;  %vm375_vm14 = vcmask 130112  }
   0x3   :  { %v116_v5 = vld [vmem:[%s524_s3] sm:$0xff]  ;;  %398 = vmatpush3.msk.msra.mxu0 %vm37_vm0, %v22_v1  ;;  %399 = vmatprep.mubr.msk.f32.mxu0 %vm30_vm1, %v20_v3  ;;  %v126_v7 = vand.u32 127, %v125_v6 }
   0x4   :  { %404 = vmatprep.subr.mxu1 %v436_v0  ;;  %400 = vmatmul.mubr.msk.f32.vlgmr.msra.gmra.mxu0 %vm30_vm1, %v21_v4  ;;  %v382_v9 = vld [vmem:[%s526_s2] ss:$0 sm:$0xff]  ;;  %s439_s2 = smov 32  }
   0x5   :  { %405 = vmatpush3.msra.mxu1 %v116_v5  ;;  %409 = vmatprep.subr.mxu0 %v436_v0  ;;  %vm128_vm3 = vcmp.ge.s32.totalorder %v126_v7, 16  ;;  %vm129_vm4 = vcmp.lt.s32.totalorder %v126_v7, 24  ;;  %vm127_vm5 = vcmp.lt.s32.totalorder %v126_v7, 8  ;;  %vm132_vm7 = vcmp.ge.s32.totalorder %v126_v7, 32  ;;  %v386_v10 = vld [vmem:[%s527_s4] ss:$0 sm:$0xff] }
   0x6   :  { %407 = vmatmul.mubr.f32.vlgmr.msra.gmra.mxu1 %v436_v0  ;;  %410 = vmatpush3.msra.mxu0 %v117_v2  ;;  %vm130_vm6 = vmand %vm128_vm3, %vm129_vm4  ;;  %vm133_vm8 = vcmp.lt.s32.totalorder %v126_v7, 40  ;;  %s440_s4 = smov 112  }
   0x7   :  { %411 = vmatprep.subr.mxu0 %v436_v0  ;;  %413 = vmatprep.mubr.msk.f32.mxu0 %vm437_vm2, %v436_v0  ;;  %vm131_vm9 = vmor %vm127_vm5, %vm130_vm6 }
   0x8   :  { %412 = vmatpush3.msra.mxu0 %v116_v5  ;;  %vm134_vm10 = vmand %vm132_vm7, %vm133_vm8 }
   0x9   :  { %vm135_vm11 = vmor %vm131_vm9, %vm134_vm10 }
  0xc4   :  { %v401_v8 = vpop.f32.mrf.mxu0 }
  0xc5   :  { %v113_v13 = vadd.f32 %v401_v8, %v382_v9 }
  0xc6   :  { %v207_v11 = vpop.f32.mrf.mxu1  ;;  %v107_v12 = vpop.f32.mrf.mxu0 }
  0xc7   :  { %v208_v14 = vadd.f32 %v386_v10, %v207_v11  ;;  %v108_v15 = vadd.f32 %v382_v9, %v107_v12 }
  0xc8   :  { %v408_v16 = vpop.f32.mrf.mxu1 }
  0xc9   :  { %218 = vrot.lane.b32.xlu0 %v208_v14, %s438_s29  ;;  %v250_v17 = vsel %vm135_vm11, %v113_v13, %v108_v15  ;;  %v136_v18 = vsel %vm135_vm11, %v108_v15, %v113_v13 }
  0xca   :  { %v211_v19 = vadd.f32 %v208_v14, %v136_v18 }
  0xcc   :  { %v212_v20 = vsub.f32 0.0, %v211_v19 }
  0xce   :  { %v213_v21 = vmul.f32 1.442695, %v212_v20 }
  0xd0   :  { %424 = vpow2.f32 %v213_v21 }
  0xdd   :  { %v425_v22 = vpop.eup %424 }
  0xde   :  { %v215_v23 = vadd.f32 1.0, %v425_v22 }
  0xe0   :  { %426 = vrcp.f32 %v215_v23 }
  0xed   :  { %v427_v24 = vpop.eup %426 }
 0x13b   :  { %v219_v25 = vpop.permute.xlu0 %218 }
 0x13c   :  { %v221_v26 = vmul.f32 %v427_v24, %v219_v25 }
 0x13e   :  { %223 = vrot.lane.b32.xlu0 %v221_v26, %s439_s2 }
 0x1b0   :  { %v224_v27 = vpop.permute.xlu0 %223 }
 0x1b1   :  { %v226_v28 = vadd.f32 %v224_v27, %v136_v18 }
 0x1b3   :  { %428 = vtanh.f32 %v226_v28 }
 0x1c0   :  { %v429_v29 = vpop.eup %428 }
 0x1c1   :  { %v228_v30 = vsub.f32 0.0, %v429_v29 }
 0x1c3   :  { %230 = vrot.lane.b32.xlu1 %v228_v30, %s440_s4 }
 0x235   :  { %v231_v31 = vpop.permute.xlu1 %230 }
 0x236   :  { %v233_v32 = vmul.f32 %v427_v24, %v231_v31 }
 0x238   :  { %235 = vrot.lane.b32.xlu1 %v233_v32, %s441_s30 }
 0x2aa   :  { %v236_v33 = vpop.permute.xlu1 %235 }
 0x2ab   :  { %v238_v34 = vadd.f32 %v429_v29, %v236_v33 }
 0x2ad   :  { %240 = vrot.lane.b32.xlu0 %v238_v34, %s438_s29 }
 0x31f   :  { %v241_v35 = vpop.permute.xlu0 %240 }
 0x320   :  { %244 = vst.msk [vmem:[#allocation2] sm:$0xff] %vm243_vm12, %v241_v35  ;;  %414 = vmatmul.mubr.msk.f32.vlgmr.msra.gmra.mxu0 %vm137_vm13, %v241_v35 }
 0x327   :  { %v361_v36 = vld [vmem:[#allocation2] sm:$0xff] }
 0x328   :  { %363 = vst.msk [vmem:[%s528_s5] sm:$0xff] %vm243_vm12, %v361_v36 }
 0x3e0   :  { %v319_v37 = vpop.f32.mrf.mxu0 }
 0x3e1   :  { %v320_v38 = vadd.f32 %v386_v10, %v319_v37 }
 0x3e2   :  { %v415_v39 = vpop.f32.mrf.mxu0 }
 0x3e3   :  { %330 = vrot.lane.b32.xlu1 %v320_v38, %s438_s29  ;;  %v323_v40 = vadd.f32 %v320_v38, %v250_v17 }
 0x3e5   :  { %v324_v41 = vsub.f32 0.0, %v323_v40 }
 0x3e7   :  { %v325_v42 = vmul.f32 1.442695, %v324_v41 }
 0x3e9   :  { %430 = vpow2.f32 %v325_v42 }
 0x3f6   :  { %v431_v43 = vpop.eup %430 }
 0x3f7   :  { %v327_v44 = vadd.f32 1.0, %v431_v43 }
 0x3f9   :  { %432 = vrcp.f32 %v327_v44 }
 0x406   :  { %v433_v45 = vpop.eup %432 }
 0x455   :  { %v331_v46 = vpop.permute.xlu1 %330 }
 0x456   :  { %v333_v47 = vmul.f32 %v433_v45, %v331_v46 }
 0x458   :  { %335 = vrot.lane.b32.xlu0 %v333_v47, %s439_s2 }
 0x4ca   :  { %v336_v48 = vpop.permute.xlu0 %335 }
 0x4cb   :  { %v338_v49 = vadd.f32 %v336_v48, %v250_v17 }
 0x4cd   :  { %434 = vtanh.f32 %v338_v49 }
 0x4da   :  { %v435_v50 = vpop.eup %434 }
 0x4db   :  { %v340_v51 = vsub.f32 %v238_v34, %v435_v50 }
 0x4dd   :  { %342 = vrot.lane.b32.xlu1 %v340_v51, %s440_s4 }
 0x4e1   :  { %245 = vrot.lane.b32.xlu1 %v238_v34, %s442_s8 }
 0x54f   :  { %v343_v52 = vpop.permute.xlu1 %342 }
 0x550   :  { %v345_v53 = vmul.f32 %v433_v45, %v343_v52 }
 0x552   :  { %347 = vrot.lane.b32.xlu0 %v345_v53, %s441_s30 }
 0x553   :  { %v246_v54 = vpop.permute.xlu1 %245 }
 0x554   :  { %249 = vst.msk [vmem:[#allocation3 + $0x8] sm:$0xff] %vm243_vm12, %v246_v54 }
 0x55b   :  { %v366_v57 = vld [vmem:[#allocation3 + $0x8] sm:$0xff] }
 0x5c4   :  { %v348_v55 = vpop.permute.xlu0 %347 }
 0x5c5   :  { %v350_v56 = vadd.f32 %v435_v50, %v348_v55 }
 0x5c7   :  { %352 = vrot.lane.b32.xlu1 %v350_v56, %s438_s29  ;;  %357 = vrot.lane.b32.xlu0 %v350_v56, %s442_s8 }
 0x5cb   :  { %371 = vrot.lane.b32.xlu1 %v366_v57, %s443_s9 }
 0x639   :  { %v358_v58 = vpop.permute.xlu0 %357  ;;  %v353_v59 = vpop.permute.xlu1 %352 }
 0x63a   :  { %360 = vst.msk [vmem:[#allocation3] sm:$0xff] %vm243_vm12, %v358_v58  ;;  %356 = vst.msk [vmem:[#allocation2 + $0x8] sm:$0xff] %vm243_vm12, %v353_v59 }
 0x63d   :  { %v372_v62 = vpop.permute.xlu1 %371 }
 0x641   :  { %v362_v60 = vld [vmem:[#allocation2 + $0x8] sm:$0xff]  ;;  %v365_v61 = vld [vmem:[#allocation3] sm:$0xff] }
 0x642   :  { %364 = vst.msk [vmem:[%s528_s5 + $0x8] sm:$0xff] %vm243_vm12, %v362_v60  ;;  %369 = vrot.lane.b32.xlu0 %v365_v61, %s443_s9 }
 0x643   :  { %377 = vst.msk [vmem:[%s528_s5 + $0x8] sm:$0xff] %vm375_vm14, %v372_v62 }
 0x6b4   :  { %v370_v63 = vpop.permute.xlu0 %369 }
 0x6b5   :  { %376 = vst.msk [vmem:[%s528_s5] sm:$0xff] %vm375_vm14, %v370_v63 }

// kernel: sabirnn_forward.4
= control target key start
LH: loop header
LB: loop body
LE: loop exit
PB: predicated region body
PF: predicated region fallthrough
CT: control target
= control target key end

     0   :  { %v1370_v0 = vmov 0.0   ;;  %vm1371_vm0 = vmmov 0   ;;  %vm31_vm1 = vcmask 130048   ;;  %v124_v9 = vlaneseq  ;;  %s1374_s10 = smov 32   ;;  %s1375_s15 = smov 48   ;;  %s1734_s1 = inlined_call_operand.vmem [shape: f32[16,96], index: 1, kind: input, shape index: {}]   ;;  %s1735_s3 = inlined_call_operand.vmem [shape: f32[32,96], index: 3, kind: input, shape index: {}]   ;;  %s1736_s0 = inlined_call_operand.vmem [shape: f32[16,16], index: 0, kind: input, shape index: {}]   ;;  %s1737_s2 = inlined_call_operand.vmem [shape: f32[1,96], index: 2, kind: input, shape index: {}]   ;;  %s1738_s4 = inlined_call_operand.vmem [shape: f32[1,96], index: 4, kind: input, shape index: {}]   ;;  %s1739_s5 = inlined_call_operand.vmem [shape: f32[8,2,32], index: 5, kind: output, shape index: {}]  }
   0x1   :  { %1227 = vmatprep.subr.mxu1 %v1370_v0  ;;  %v23_v1 = vld [vmem:[%s1734_s1 + $0x8] sm:$0xff]  ;;  %v1414_v2 = vld [vmem:[%s1735_s3 + $0x18] sm:$0xff]  ;;  %v22_v3 = vld [vmem:[%s1734_s1] sm:$0xff]  ;;  %1235 = vmatprep.mubr.msk.f32.mxu1 %vm1371_vm0, %v1370_v0  ;;  %vm245_vm11 = vcmask 123904   ;;  %vm139_vm12 = vcmask 261120   ;;  %vm487_vm13 = vcmask 128004  }
   0x2   :  { %1220 = vmatprep.subr.mxu0 %v23_v1  ;;  %1228 = vmatpush3.msra.mxu1 %v1414_v2  ;;  %v1425_v4 = vld [vmem:[%s1735_s3 + $0x10] sm:$0xff]  ;;  %v20_v5 = vld [vmem:[%s1736_s0] sm:$0xff]  ;;  %v21_v6 = vld [vmem:[%s1736_s0 + $0x8] sm:$0xff]  ;;  %v125_v10 = vand.u32 127, %v124_v9  ;;  %vm366_vm14 = vcmask 125954   ;;  %vm608_vm15 = vcmask 130054  }
   0x3   :  { %1221 = vmatpush3.msra.mxu0 %v23_v1  ;;  %1229 = vmatprep.subr.mxu1 %v1370_v0  ;;  %v1438_v7 = vld [vmem:[%s1735_s3 + $0x8] sm:$0xff]  ;;  %v1444_v8 = vld [vmem:[%s1735_s3] sm:$0xff]  ;;  %s1376_s22 = smov 16  }
   0x4   :  { %1222 = vmatprep.subr.mxu0 %v22_v3  ;;  %1230 = vmatpush3.msra.mxu1 %v1425_v4  ;;  %vm127_vm2 = vcmp.ge.s32.totalorder %v125_v10, 32  ;;  %vm128_vm3 = vcmp.lt.s32.totalorder %v125_v10, 48  ;;  %v1165_v11 = vld [vmem:[%s1737_s2] ss:$0 sm:$0xff]  ;;  %vm126_vm4 = vcmp.lt.s32.totalorder %v125_v10, 16  ;;  %vm131_vm6 = vcmp.ge.s32.totalorder %v125_v10, 64 }
   0x5   :  { %1223 = vmatpush3.msra.mxu0 %v22_v3  ;;  %1224 = vmatprep.mubr.msk.f32.mxu0 %vm31_vm1, %v20_v5  ;;  %vm129_vm5 = vmand %vm127_vm2, %vm128_vm3  ;;  %vm132_vm7 = vcmp.lt.s32.totalorder %v125_v10, 80  ;;  %v1478_v15 = vld [vmem:[%s1738_s4] ss:$0 sm:$0xff]  ;;  %s1372_s2 = smov 64   ;;  %s1373_s4 = smov 96  }
   0x6   :  { %1231 = vmatprep.subr.mxu1 %v1370_v0  ;;  %1225 = vmatmul.mubr.msk.f32.vlgmr.msra.gmra.mxu0 %vm31_vm1, %v21_v6  ;;  %vm130_vm8 = vmor %vm126_vm4, %vm129_vm5 }
   0x7   :  { %1232 = vmatpush3.msra.mxu1 %v1438_v7  ;;  %1238 = vmatprep.subr.mxu0 %v1370_v0  ;;  %vm133_vm9 = vmand %vm131_vm6, %vm132_vm7 }
   0x8   :  { %1233 = vmatprep.subr.mxu1 %v1370_v0  ;;  %1239 = vmatpush3.msra.mxu0 %v1414_v2  ;;  %vm134_vm10 = vmor %vm130_vm8, %vm133_vm9 }
   0x9   :  { %1234 = vmatpush3.msra.mxu1 %v1444_v8  ;;  %1240 = vmatprep.subr.mxu0 %v1370_v0 }
   0xa   :  { %1236 = vmatmul.mubr.f32.vlgmr.msra.gmra.mxu1 %v1370_v0  ;;  %1241 = vmatpush3.msra.mxu0 %v1425_v4 }
   0xb   :  { %1242 = vmatprep.subr.mxu0 %v1370_v0  ;;  %1246 = vmatprep.mubr.msk.f32.mxu0 %vm1371_vm0, %v1370_v0 }
   0xc   :  { %1243 = vmatpush3.msra.mxu0 %v1438_v7  ;;  %1249 = vmatprep.subr.mxu1 %v1370_v0 }
   0xd   :  { %1244 = vmatprep.subr.mxu0 %v1370_v0  ;;  %1250 = vmatpush3.msra.mxu1 %v1414_v2 }
   0xe   :  { %1245 = vmatpush3.msra.mxu0 %v1444_v8  ;;  %1251 = vmatprep.subr.mxu1 %v1370_v0 }
   0xf   :  { %1252 = vmatpush3.msra.mxu1 %v1425_v4  ;;  %1257 = vmatprep.mubr.msk.f32.mxu1 %vm1371_vm0, %v1370_v0 }
  0x10   :  { %1253 = vmatprep.subr.mxu1 %v1370_v0  ;;  %1260 = vmatprep.subr.mxu0 %v1370_v0 }
  0x11   :  { %1254 = vmatpush3.msra.mxu1 %v1438_v7 }
  0x12   :  { %1255 = vmatprep.subr.mxu1 %v1370_v0 }
  0x13   :  { %1256 = vmatpush3.msra.mxu1 %v1444_v8 }
  0x14   :  { %1271 = vmatprep.subr.mxu1 %v1370_v0 }
  0xc6   :  { %v1226_v12 = vpop.f32.mrf.mxu0 }
  0xc7   :  { %v110_v13 = vadd.f32 %v1226_v12, %v1165_v11 }
  0xc8   :  { %v104_v14 = vpop.f32.mrf.mxu0 }
  0xc9   :  { %v252_v16 = vrot.slane %v110_v13, 2  ;;  %v105_v17 = vadd.f32 %v1165_v11, %v104_v14  ;;  %v136_v26 = vrot.slane %v110_v13, 6 }
  0xca   :  { %v209_v18 = vpop.f32.mrf.mxu1 }
  0xcb   :  { %v616_v19 = vrot.slane %v105_v17, 6  ;;  %v737_v20 = vrot.slane %v105_v17, 2  ;;  %v210_v21 = vadd.f32 %v1478_v15, %v209_v18  ;;  %v1481_v23 = vsel %vm134_vm10, %v105_v17, %v252_v16 }
  0xcc   :  { %v1237_v22 = vpop.f32.mrf.mxu1  ;;  %v1488_v27 = vsel %vm134_vm10, %v105_v17, %v136_v26 }
  0xcd   :  { %220 = vrot.lane.b32.xlu0 %v210_v21, %s1372_s2  ;;  %v1484_v24 = vsel %vm134_vm10, %v110_v13, %v616_v19  ;;  %v1486_v25 = vsel %vm134_vm10, %v110_v13, %v737_v20  ;;  %v213_v28 = vadd.f32 %v210_v21, %v1488_v27 }
  0xcf   :  { %v214_v29 = vsub.f32 0.0, %v213_v28 }
  0xd1   :  { %v215_v30 = vmul.f32 1.442695, %v214_v29 }
  0xd3   :  { %1322 = vpow2.f32 %v215_v30 }
  0xe0   :  { %v1323_v31 = vpop.eup %1322 }
  0xe1   :  { %v217_v32 = vadd.f32 1.0, %v1323_v31 }
  0xe3   :  { %1324 = vrcp.f32 %v217_v32 }
  0xf0   :  { %v1325_v33 = vpop.eup %1324 }
 0x13f   :  { %v221_v34 = vpop.permute.xlu0 %220 }
 0x140   :  { %v223_v35 = vmul.f32 %v1325_v33, %v221_v34 }
 0x142   :  { %225 = vrot.lane.b32.xlu0 %v223_v35, %s1372_s2 }
 0x1b4   :  { %v226_v36 = vpop.permute.xlu0 %225 }
 0x1b5   :  { %v228_v37 = vadd.f32 %v226_v36, %v1488_v27 }
 0x1b7   :  { %1326 = vtanh.f32 %v228_v37 }
 0x1c4   :  { %v1327_v38 = vpop.eup %1326 }
 0x1c5   :  { %v230_v39 = vsub.f32 0.0, %v1327_v38 }
 0x1c7   :  { %232 = vrot.lane.b32.xlu1 %v230_v39, %s1373_s4 }
 0x239   :  { %v233_v40 = vpop.permute.xlu1 %232 }
 0x23a   :  { %v235_v41 = vmul.f32 %v1325_v33, %v233_v40 }
 0x23c   :  { %237 = vrot.lane.b32.xlu1 %v235_v41, %s1374_s10 }
 0x2ae   :  { %v238_v42 = vpop.permute.xlu1 %237 }
 0x2af   :  { %v1495_v43 = vadd.f32 %v1327_v38, %v238_v42 }
 0x2b1   :  { %242 = vrot.lane.b32.xlu0 %v1495_v43, %s1372_s2 }
 0x323   :  { %v243_v44 = vpop.permute.xlu0 %242 }
 0x324   :  { %246 = vst.msk [vmem:[#allocation2] sm:$0x3] %vm245_vm11, %v243_v44  ;;  %1247 = vmatmul.mubr.msk.f32.vlgmr.msra.gmra.mxu0 %vm139_vm12, %v243_v44 }
 0x325   :  { %1261 = vmatpush3.msra.mxu0 %v1414_v2  ;;  %1268 = vmatprep.mubr.msk.f32.mxu0 %vm1371_vm0, %v1370_v0 }
 0x326   :  { %1262 = vmatprep.subr.mxu0 %v1370_v0 }
 0x327   :  { %1263 = vmatpush3.msra.mxu0 %v1425_v4 }
 0x328   :  { %1264 = vmatprep.subr.mxu0 %v1370_v0 }
 0x329   :  { %1265 = vmatpush3.msra.mxu0 %v1438_v7 }
 0x32a   :  { %1266 = vmatprep.subr.mxu0 %v1370_v0 }
 0x32b   :  { %1267 = vmatpush3.msra.mxu0 %v1444_v8  ;;  %v1096_v45 = vld [vmem:[#allocation2] sm:$0x3] }
 0x32c   :  { %1282 = vmatprep.subr.mxu0 %v1370_v0  ;;  %1104 = vst.msk [vmem:[%s1739_s5] sm:$0x3] %vm245_vm11, %v1096_v45 }
 0x3e4   :  { %v323_v46 = vpop.f32.mrf.mxu0 }
 0x3e5   :  { %v324_v47 = vadd.f32 %v1478_v15, %v323_v46 }
 0x3e6   :  { %v1248_v48 = vpop.f32.mrf.mxu0 }
 0x3e7   :  { %v328_v49 = vrot.slane %v324_v47, 6 }
 0x3e9   :  { %336 = vrot.lane.b32.xlu1 %v328_v49, %s1372_s2  ;;  %v330_v50 = vadd.f32 %v328_v49, %v1481_v23 }
 0x3eb   :  { %v331_v51 = vsub.f32 0.0, %v330_v50 }
 0x3ed   :  { %v332_v52 = vmul.f32 1.442695, %v331_v51 }
 0x3ef   :  { %1328 = vpow2.f32 %v332_v52 }
 0x3fc   :  { %v1329_v53 = vpop.eup %1328 }
 0x3fd   :  { %v334_v54 = vadd.f32 1.0, %v1329_v53 }
 0x3ff   :  { %1330 = vrcp.f32 %v334_v54 }
 0x40c   :  { %v1331_v55 = vpop.eup %1330 }
 0x45b   :  { %v337_v56 = vpop.permute.xlu1 %336 }
 0x45c   :  { %v339_v57 = vmul.f32 %v1331_v55, %v337_v56 }
 0x45e   :  { %341 = vrot.lane.b32.xlu0 %v339_v57, %s1372_s2 }
 0x4d0   :  { %v342_v58 = vpop.permute.xlu0 %341 }
 0x4d1   :  { %v344_v59 = vadd.f32 %v342_v58, %v1481_v23 }
 0x4d3   :  { %1332 = vtanh.f32 %v344_v59 }
 0x4e0   :  { %v1333_v60 = vpop.eup %1332 }
 0x4e1   :  { %v347_v61 = vrot.slane %v1333_v60, 2 }
 0x4e3   :  { %v349_v62 = vsub.f32 %v1495_v43, %v347_v61 }
 0x4e5   :  { %v351_v63 = vrot.slane %v349_v62, 6 }
 0x4e7   :  { %352 = vrot.lane.b32.xlu1 %v351_v63, %s1373_s4 }
 0x559   :  { %v353_v1 = vpop.permute.xlu1 %352 }
 0x55a   :  { %v355_v3 = vmul.f32 %v1331_v55, %v353_v1 }
 0x55c   :  { %357 = vrot.lane.b32.xlu0 %v355_v3, %s1374_s10 }
 0x5ce   :  { %v358_v5 = vpop.permute.xlu0 %357 }
 0x5cf   :  { %v1523_v6 = vadd.f32 %v1333_v60, %v358_v5 }
 0x5d1   :  { %v373_v9 = vrot.slane %v1523_v6, 2 }
 0x5d3   :  { %374 = vrot.lane.b32.xlu1 %v373_v9, %s1372_s2 }
 0x645   :  { %v375_v10 = vpop.permute.xlu1 %374 }
 0x646   :  { %1258 = vmatmul.mubr.msk.f32.vlgmr.msra.gmra.mxu1 %vm139_vm12, %v375_v10 }
 0x647   :  { %1272 = vmatpush3.msra.mxu1 %v1414_v2  ;;  %1279 = vmatprep.mubr.msk.f32.mxu1 %vm1371_vm0, %v1370_v0 }
 0x648   :  { %1273 = vmatprep.subr.mxu1 %v1370_v0 }
 0x649   :  { %1274 = vmatpush3.msra.mxu1 %v1425_v4 }
 0x64a   :  { %1275 = vmatprep.subr.mxu1 %v1370_v0 }
 0x64b   :  { %1276 = vmatpush3.msra.mxu1 %v1438_v7 }
 0x64c   :  { %1277 = vmatprep.subr.mxu1 %v1370_v0 }
 0x64d   :  { %1278 = vmatpush3.msra.mxu1 %v1444_v8 }
 0x64e   :  { %1293 = vmatprep.subr.mxu1 %v1370_v0 }
 0x706   :  { %v444_v11 = vpop.f32.mrf.mxu1 }
 0x707   :  { %v445_v12 = vadd.f32 %v1478_v15, %v444_v11 }
 0x708   :  { %v1259_v13 = vpop.f32.mrf.mxu1 }
 0x709   :  { %v449_v14 = vrot.slane %v445_v12, 4 }
 0x70b   :  { %457 = vrot.lane.b32.xlu0 %v449_v14, %s1372_s2  ;;  %v451_v16 = vadd.f32 %v449_v14, %v1488_v27 }
 0x70d   :  { %v452_v17 = vsub.f32 0.0, %v451_v16 }
 0x70f   :  { %v453_v18 = vmul.f32 1.442695, %v452_v17 }
 0x711   :  { %1334 = vpow2.f32 %v453_v18 }
 0x71e   :  { %v1335_v19 = vpop.eup %1334 }
 0x71f   :  { %v455_v20 = vadd.f32 1.0, %v1335_v19 }
 0x721   :  { %1336 = vrcp.f32 %v455_v20 }
 0x72e   :  { %v1337_v21 = vpop.eup %1336 }
 0x77d   :  { %v458_v22 = vpop.permute.xlu0 %457 }
 0x77e   :  { %v460_v26 = vmul.f32 %v1337_v21, %v458_v22 }
 0x780   :  { %462 = vrot.lane.b32.xlu1 %v460_v26, %s1372_s2 }
 0x7f2   :  { %v463_v28 = vpop.permute.xlu1 %462 }
 0x7f3   :  { %v465_v29 = vadd.f32 %v463_v28, %v1488_v27 }
 0x7f5   :  { %1338 = vtanh.f32 %v465_v29 }
 0x802   :  { %v1339_v30 = vpop.eup %1338 }
 0x803   :  { %v468_v31 = vrot.slane %v1339_v30, 2 }
 0x805   :  { %v470_v32 = vsub.f32 %v1523_v6, %v468_v31 }
 0x807   :  { %v472_v33 = vrot.slane %v470_v32, 6 }
 0x809   :  { %473 = vrot.lane.b32.xlu0 %v472_v33, %s1373_s4 }
 0x87b   :  { %v474_v34 = vpop.permute.xlu0 %473 }
 0x87c   :  { %v476_v35 = vmul.f32 %v1337_v21, %v474_v34 }
 0x87e   :  { %478 = vrot.lane.b32.xlu1 %v476_v35, %s1374_s10 }
 0x8f0   :  { %v479_v36 = vpop.permute.xlu1 %478 }
 0x8f1   :  { %v1546_v37 = vadd.f32 %v1339_v30, %v479_v36 }
 0x8f3   :  { %v494_v38 = vrot.slane %v1546_v37, 4 }
 0x8f5   :  { %495 = vrot.lane.b32.xlu0 %v494_v38, %s1372_s2 }
 0x967   :  { %v496_v27 = vpop.permute.xlu0 %495 }
 0x968   :  { %1269 = vmatmul.mubr.msk.f32.vlgmr.msra.gmra.mxu0 %vm139_vm12, %v496_v27 }
 0x969   :  { %1283 = vmatpush3.msra.mxu0 %v1414_v2  ;;  %1290 = vmatprep.mubr.msk.f32.mxu0 %vm1371_vm0, %v1370_v0 }
 0x96a   :  { %1284 = vmatprep.subr.mxu0 %v1370_v0 }
 0x96b   :  { %1285 = vmatpush3.msra.mxu0 %v1425_v4 }
 0x96c   :  { %1286 = vmatprep.subr.mxu0 %v1370_v0 }
 0x96d   :  { %1287 = vmatpush3.msra.mxu0 %v1438_v7 }
 0x96e   :  { %1288 = vmatprep.subr.mxu0 %v1370_v0 }
 0x96f   :  { %1289 = vmatpush3.msra.mxu0 %v1444_v8 }
 0x970   :  { %1304 = vmatprep.subr.mxu0 %v1370_v0 }
 0xa28   :  { %v565_v39 = vpop.f32.mrf.mxu0 }
 0xa29   :  { %v566_v40 = vadd.f32 %v1478_v15, %v565_v39 }
 0xa2a   :  { %v1270_v41 = vpop.f32.mrf.mxu0 }
 0xa2b   :  { %v570_v42 = vrot.slane %v566_v40, 2 }
 0xa2d   :  { %578 = vrot.lane.b32.xlu1 %v570_v42, %s1372_s2  ;;  %v572_v44 = vadd.f32 %v570_v42, %v1481_v23 }
 0xa2f   :  { %v573_v45 = vsub.f32 0.0, %v572_v44 }
 0xa31   :  { %v574_v46 = vmul.f32 1.442695, %v573_v45 }
 0xa33   :  { %1340 = vpow2.f32 %v574_v46 }
 0xa40   :  { %v1341_v47 = vpop.eup %1340 }
 0xa41   :  { %v576_v48 = vadd.f32 1.0, %v1341_v47 }
 0xa43   :  { %1342 = vrcp.f32 %v576_v48 }
 0xa50   :  { %v1343_v49 = vpop.eup %1342 }
 0xa9f   :  { %v579_v50 = vpop.permute.xlu1 %578 }
 0xaa0   :  { %v581_v51 = vmul.f32 %v1343_v49, %v579_v50 }
 0xaa2   :  { %583 = vrot.lane.b32.xlu0 %v581_v51, %s1372_s2 }
 0xb14   :  { %v584_v52 = vpop.permute.xlu0 %583 }
 0xb15   :  { %v586_v53 = vadd.f32 %v584_v52, %v1481_v23 }
 0xb17   :  { %1344 = vtanh.f32 %v586_v53 }
 0xb24   :  { %v1345_v54 = vpop.eup %1344 }
 0xb25   :  { %v589_v55 = vrot.slane %v1345_v54, 2 }
 0xb27   :  { %v591_v56 = vsub.f32 %v1546_v37, %v589_v55 }
 0xb29   :  { %v593_v57 = vrot.slane %v591_v56, 6 }
 0xb2b   :  { %594 = vrot.lane.b32.xlu1 %v593_v57, %s1373_s4 }
 0xb9d   :  { %v595_v58 = vpop.permute.xlu1 %594 }
 0xb9e   :  { %v597_v59 = vmul.f32 %v1343_v49, %v595_v58 }
 0xba0   :  { %599 = vrot.lane.b32.xlu0 %v597_v59, %s1374_s10 }
 0xc12   :  { %v600_v60 = vpop.permute.xlu0 %599 }
 0xc13   :  { %v1569_v61 = vadd.f32 %v1345_v54, %v600_v60 }
 0xc15   :  { %v619_v62 = vrot.slane %v1569_v61, 6 }
 0xc17   :  { %620 = vrot.lane.b32.xlu1 %v619_v62, %s1372_s2 }
 0xc89   :  { %v621_v23 = vpop.permute.xlu1 %620 }
 0xc8a   :  { %1280 = vmatmul.mubr.msk.f32.vlgmr.msra.gmra.mxu1 %vm139_vm12, %v621_v23 }
 0xc8b   :  { %1294 = vmatpush3.msra.mxu1 %v1414_v2  ;;  %1301 = vmatprep.mubr.msk.f32.mxu1 %vm1371_vm0, %v1370_v0 }
 0xc8c   :  { %1295 = vmatprep.subr.mxu1 %v1370_v0 }
 0xc8d   :  { %1296 = vmatpush3.msra.mxu1 %v1425_v4 }
 0xc8e   :  { %1297 = vmatprep.subr.mxu1 %v1370_v0 }
 0xc8f   :  { %1298 = vmatpush3.msra.mxu1 %v1438_v7 }
 0xc90   :  { %1299 = vmatprep.subr.mxu1 %v1370_v0 }
 0xc91   :  { %1300 = vmatpush3.msra.mxu1 %v1444_v8 }
 0xd4a   :  { %v690_v63 = vpop.f32.mrf.mxu1 }
 0xd4b   :  { %v691_v1 = vadd.f32 %v1478_v15, %v690_v63 }
 0xd4c   :  { %v1281_v3 = vpop.f32.mrf.mxu1 }
 0xd4d   :  { %701 = vrot.lane.b32.xlu0 %v691_v1, %s1372_s2  ;;  %v694_v5 = vadd.f32 %v691_v1, %v1484_v24 }
 0xd4f   :  { %v695_v9 = vsub.f32 0.0, %v694_v5 }
 0xd51   :  { %v696_v10 = vmul.f32 1.442695, %v695_v9 }
 0xd53   :  { %1346 = vpow2.f32 %v696_v10 }
 0xd60   :  { %v1347_v11 = vpop.eup %1346 }
 0xd61   :  { %v698_v12 = vadd.f32 1.0, %v1347_v11 }
 0xd63   :  { %1348 = vrcp.f32 %v698_v12 }
 0xd70   :  { %v1349_v13 = vpop.eup %1348 }
 0xdbf   :  { %v702_v14 = vpop.permute.xlu0 %701 }
 0xdc0   :  { %v704_v16 = vmul.f32 %v1349_v13, %v702_v14 }
 0xdc2   :  { %706 = vrot.lane.b32.xlu1 %v704_v16, %s1372_s2 }
 0xe34   :  { %v707_v17 = vpop.permute.xlu1 %706 }
 0xe35   :  { %v709_v18 = vadd.f32 %v707_v17, %v1484_v24 }
 0xe37   :  { %1350 = vtanh.f32 %v709_v18 }
 0xe44   :  { %v1351_v19 = vpop.eup %1350 }
 0xe45   :  { %v712_v20 = vrot.slane %v1351_v19, 2 }
 0xe47   :  { %v714_v21 = vsub.f32 %v1569_v61, %v712_v20 }
 0xe49   :  { %v716_v22 = vrot.slane %v714_v21, 6 }
 0xe4b   :  { %717 = vrot.lane.b32.xlu0 %v716_v22, %s1373_s4 }
 0xebd   :  { %v718_v26 = vpop.permute.xlu0 %717 }
 0xebe   :  { %v720_v28 = vmul.f32 %v1349_v13, %v718_v26 }
 0xec0   :  { %722 = vrot.lane.b32.xlu1 %v720_v28, %s1374_s10 }
 0xf32   :  { %v723_v29 = vpop.permute.xlu1 %722 }
 0xf33   :  { %v1591_v30 = vadd.f32 %v1351_v19, %v723_v29 }
 0xf35   :  { %727 = vrot.lane.b32.xlu0 %v1591_v30, %s1372_s2 }
 0xfa7   :  { %v728_v31 = vpop.permute.xlu0 %727 }
 0xfa8   :  { %731 = vst.msk [vmem:[#allocation2 + $0x8] sm:$0x3] %vm245_vm11, %v728_v31  ;;  %1291 = vmatmul.mubr.msk.f32.vlgmr.msra.gmra.mxu0 %vm139_vm12, %v728_v31 }
 0xfa9   :  { %1305 = vmatpush3.msra.mxu0 %v1414_v2  ;;  %1312 = vmatprep.mubr.msk.f32.mxu0 %vm1371_vm0, %v1370_v0  ;;  %vm1152_vm0 = vcmask 255104  }
 0xfaa   :  { %1306 = vmatprep.subr.mxu0 %v1370_v0 }
 0xfab   :  { %1307 = vmatpush3.msra.mxu0 %v1425_v4 }
 0xfac   :  { %1308 = vmatprep.subr.mxu0 %v1370_v0 }
 0xfad   :  { %1309 = vmatpush3.msra.mxu0 %v1438_v7 }
 0xfae   :  { %1310 = vmatprep.subr.mxu0 %v1370_v0 }
 0xfaf   :  { %1311 = vmatpush3.msra.mxu0 %v1444_v8  ;;  %v1100_v32 = vld [vmem:[#allocation2 + $0x8] sm:$0x3] }
 0xfb0   :  { %1108 = vst.msk [vmem:[%s1739_s5 + $0x8] sm:$0x3] %vm245_vm11, %v1100_v32 }
0x1068   :  { %v808_v2 = vpop.f32.mrf.mxu0 }
0x1069   :  { %v809_v33 = vadd.f32 %v1478_v15, %v808_v2 }
0x106a   :  { %v1292_v34 = vpop.f32.mrf.mxu0 }
0x106b   :  { %v813_v35 = vrot.slane %v809_v33, 6 }
0x106d   :  { %821 = vrot.lane.b32.xlu1 %v813_v35, %s1372_s2  ;;  %v815_v4 = vadd.f32 %v813_v35, %v1486_v25 }
0x106f   :  { %v816_v7 = vsub.f32 0.0, %v815_v4 }
0x1071   :  { %v817_v36 = vmul.f32 1.442695, %v816_v7 }
0x1073   :  { %1352 = vpow2.f32 %v817_v36 }
0x1080   :  { %v1353_v0 = vpop.eup %1352 }
0x1081   :  { %v819_v8 = vadd.f32 1.0, %v1353_v0 }
0x1083   :  { %1354 = vrcp.f32 %v819_v8 }
0x1090   :  { %v1355_v38 = vpop.eup %1354 }
0x10df   :  { %v822_v27 = vpop.permute.xlu1 %821 }
0x10e0   :  { %v824_v39 = vmul.f32 %v1355_v38, %v822_v27 }
0x10e2   :  { %826 = vrot.lane.b32.xlu0 %v824_v39, %s1372_s2 }
0x1154   :  { %v827_v40 = vpop.permute.xlu0 %826 }
0x1155   :  { %v829_v41 = vadd.f32 %v827_v40, %v1486_v25 }
0x1157   :  { %1356 = vtanh.f32 %v829_v41 }
0x1164   :  { %v1357_v42 = vpop.eup %1356 }
0x1165   :  { %v832_v44 = vrot.slane %v1357_v42, 2 }
0x1167   :  { %v834_v45 = vsub.f32 %v1591_v30, %v832_v44 }
0x1169   :  { %v836_v46 = vrot.slane %v834_v45, 6 }
0x116b   :  { %837 = vrot.lane.b32.xlu1 %v836_v46, %s1373_s4 }
0x11dd   :  { %v838_v47 = vpop.permute.xlu1 %837 }
0x11de   :  { %v840_v48 = vmul.f32 %v1355_v38, %v838_v47 }
0x11e0   :  { %842 = vrot.lane.b32.xlu0 %v840_v48, %s1374_s10 }
0x1252   :  { %v843_v49 = vpop.permute.xlu0 %842 }
0x1253   :  { %v1618_v50 = vadd.f32 %v1357_v42, %v843_v49 }
0x1255   :  { %v857_v51 = vrot.slane %v1618_v50, 2 }
0x1257   :  { %858 = vrot.lane.b32.xlu1 %v857_v51, %s1372_s2 }
0x12c9   :  { %v859_v52 = vpop.permute.xlu1 %858 }
0x12ca   :  { %1302 = vmatmul.mubr.msk.f32.vlgmr.msra.gmra.mxu1 %vm139_vm12, %v859_v52 }
0x138a   :  { %v928_v53 = vpop.f32.mrf.mxu1 }
0x138b   :  { %v929_v54 = vadd.f32 %v1478_v15, %v928_v53 }
0x138c   :  { %v1303_v55 = vpop.f32.mrf.mxu1 }
0x138d   :  { %v933_v56 = vrot.slane %v929_v54, 4 }
0x138f   :  { %941 = vrot.lane.b32.xlu0 %v933_v56, %s1372_s2  ;;  %v935_v57 = vadd.f32 %v933_v56, %v1484_v24 }
0x1391   :  { %v936_v58 = vsub.f32 0.0, %v935_v57 }
0x1393   :  { %v937_v59 = vmul.f32 1.442695, %v936_v58 }
0x1395   :  { %1358 = vpow2.f32 %v937_v59 }
0x13a2   :  { %v1359_v60 = vpop.eup %1358 }
0x13a3   :  { %v939_v62 = vadd.f32 1.0, %v1359_v60 }
0x13a5   :  { %1360 = vrcp.f32 %v939_v62 }
0x13b2   :  { %v1361_v23 = vpop.eup %1360 }
0x1401   :  { %v942_v63 = vpop.permute.xlu0 %941 }
0x1402   :  { %v944_v1 = vmul.f32 %v1361_v23, %v942_v63 }
0x1404   :  { %946 = vrot.lane.b32.xlu1 %v944_v1, %s1372_s2 }
0x1476   :  { %v947_v3 = vpop.permute.xlu1 %946 }
0x1477   :  { %v949_v5 = vadd.f32 %v947_v3, %v1484_v24 }
0x1479   :  { %1362 = vtanh.f32 %v949_v5 }
0x1486   :  { %v1363_v9 = vpop.eup %1362 }
0x1487   :  { %v952_v10 = vrot.slane %v1363_v9, 2 }
0x1489   :  { %v954_v11 = vsub.f32 %v1618_v50, %v952_v10 }
0x148b   :  { %v956_v12 = vrot.slane %v954_v11, 6 }
0x148d   :  { %957 = vrot.lane.b32.xlu0 %v956_v12, %s1373_s4 }
0x14ff   :  { %v958_v13 = vpop.permute.xlu0 %957 }
0x1500   :  { %v960_v14 = vmul.f32 %v1361_v23, %v958_v13 }
0x1502   :  { %962 = vrot.lane.b32.xlu1 %v960_v14, %s1374_s10 }
0x1574   :  { %v963_v16 = vpop.permute.xlu1 %962 }
0x1575   :  { %v965_v17 = vadd.f32 %v1363_v9, %v963_v16 }
0x1577   :  { %v977_v18 = vrot.slane %v965_v17, 4 }
0x1579   :  { %978 = vrot.lane.b32.xlu0 %v977_v18, %s1372_s2 }
0x15eb   :  { %v979_v19 = vpop.permute.xlu0 %978 }
0x15ec   :  { %1313 = vmatmul.mubr.msk.f32.vlgmr.msra.gmra.mxu0 %vm139_vm12, %v979_v19 }
0x16ac   :  { %v1048_v24 = vpop.f32.mrf.mxu0 }
0x16ad   :  { %v1049_v20 = vadd.f32 %v1478_v15, %v1048_v24 }
0x16ae   :  { %v1314_v21 = vpop.f32.mrf.mxu0 }
0x16af   :  { %v1053_v22 = vrot.slane %v1049_v20, 2 }
0x16b1   :  { %1061 = vrot.lane.b32.xlu1 %v1053_v22, %s1372_s2  ;;  %v1055_v26 = vadd.f32 %v1053_v22, %v1486_v25 }
0x16b3   :  { %v1056_v28 = vsub.f32 0.0, %v1055_v26 }
0x16b5   :  { %v1057_v29 = vmul.f32 1.442695, %v1056_v28 }
0x16b7   :  { %1364 = vpow2.f32 %v1057_v29 }
0x16c4   :  { %v1365_v31 = vpop.eup %1364 }
0x16c5   :  { %v1059_v32 = vadd.f32 1.0, %v1365_v31 }
0x16c7   :  { %1366 = vrcp.f32 %v1059_v32 }
0x16d4   :  { %v1367_v2 = vpop.eup %1366 }
0x1723   :  { %v1062_v33 = vpop.permute.xlu1 %1061 }
0x1724   :  { %v1064_v34 = vmul.f32 %v1367_v2, %v1062_v33 }
0x1726   :  { %1066 = vrot.lane.b32.xlu0 %v1064_v34, %s1372_s2 }
0x1798   :  { %v1067_v35 = vpop.permute.xlu0 %1066 }
0x1799   :  { %v1069_v15 = vadd.f32 %v1067_v35, %v1486_v25 }
0x179b   :  { %1368 = vtanh.f32 %v1069_v15 }
0x17a8   :  { %v1369_v4 = vpop.eup %1368 }
0x17a9   :  { %v1072_v7 = vrot.slane %v1369_v4, 2 }
0x17ab   :  { %v1074_v36 = vsub.f32 %v965_v17, %v1072_v7 }
0x17ad   :  { %v1076_v0 = vrot.slane %v1074_v36, 6 }
0x17af   :  { %1077 = vrot.lane.b32.xlu1 %v1076_v0, %s1373_s4 }
0x17b3   :  { %247 = vrot.lane.b32.xlu1 %v1495_v43, %s1375_s15 }
0x17b7   :  { %489 = vrot.lane.b32.xlu1 %v1546_v37, %s1375_s15 }
0x17bb   :  { %732 = vrot.lane.b32.xlu1 %v1591_v30, %s1375_s15 }
0x17bf   :  { %972 = vrot.lane.b32.xlu1 %v965_v17, %s1375_s15 }
0x17c3   :  { %362 = vrot.lane.b32.xlu1 %v1523_v6, %s1372_s2 }
0x17c7   :  { %604 = vrot.lane.b32.xlu1 %v1569_v61, %s1372_s2 }
0x17cb   :  { %967 = vrot.lane.b32.xlu1 %v965_v17, %s1372_s2 }
0x1821   :  { %v1078_v25 = vpop.permute.xlu1 %1077 }
0x1822   :  { %v1080_v8 = vmul.f32 %v1367_v2, %v1078_v25 }
0x1824   :  { %1082 = vrot.lane.b32.xlu0 %v1080_v8, %s1374_s10 }
0x1825   :  { %v248_v43 = vpop.permute.xlu1 %247 }
0x1826   :  { %251 = vst.msk [vmem:[#allocation3 + $0xe] sm:$0x3] %vm245_vm11, %v248_v43 }
0x1828   :  { %368 = vrot.lane.b32.xlu0 %v1523_v6, %s1375_s15 }
0x1829   :  { %v490_v30 = vpop.permute.xlu1 %489 }
0x182a   :  { %493 = vst.msk [vmem:[#allocation3 + $0x6] sm:$0x30] %vm487_vm13, %v490_v30 }
0x182c   :  { %610 = vrot.lane.b32.xlu0 %v1569_v61, %s1375_s15 }
0x182d   :  { %v733_v38 = vpop.permute.xlu1 %732  ;;  %v1119_v54 = vld [vmem:[#allocation3 + $0xe] sm:$0x3] }
0x182e   :  { %736 = vst.msk [vmem:[#allocation3 + $0x6] sm:$0x3] %vm245_vm11, %v733_v38 }
0x1830   :  { %852 = vrot.lane.b32.xlu0 %v1618_v50, %s1375_s15 }
0x1831   :  { %v973_v27 = vpop.permute.xlu1 %972 }
0x1832   :  { %976 = vst.msk [vmem:[#allocation3 - $0x2] sm:$0x30] %vm487_vm13, %v973_v27 }
0x1835   :  { %v363_v39 = vpop.permute.xlu1 %362  ;;  %v1115_v52 = vld [vmem:[#allocation3 + $0x6] sm:$0x3] }
0x1836   :  { %367 = vst.msk [vmem:[#allocation2] sm:$0xc] %vm366_vm14, %v363_v39 }
0x1839   :  { %v605_v6 = vpop.permute.xlu1 %604  ;;  %v1113_v49 = vld [vmem:[#allocation3 + $0x2] sm:$0x3] }
0x183a   :  { %609 = vst.msk [vmem:[#allocation2] sm:$0xc0] %vm608_vm15, %v605_v6 }
0x183d   :  { %v968_v40 = vpop.permute.xlu1 %967  ;;  %v1097_v41 = vld [vmem:[#allocation2 + $0x2] sm:$0x3] }
0x183e   :  { %971 = vst.msk [vmem:[#allocation2 + $0x8] sm:$0x30] %vm487_vm13, %v968_v40 }
0x183f   :  { %1105 = vst.msk [vmem:[%s1739_s5 + $0x2] sm:$0x3] %vm245_vm11, %v1097_v41 }
0x1841   :  { %v1099_v61 = vld [vmem:[#allocation2 + $0x6] sm:$0x3] }
0x1842   :  { %1107 = vst.msk [vmem:[%s1739_s5 + $0x6] sm:$0x3] %vm245_vm11, %v1099_v61 }
0x1845   :  { %v1102_v42 = vld [vmem:[#allocation2 + $0xc] sm:$0x3] }
0x1846   :  { %1110 = vst.msk [vmem:[%s1739_s5 + $0xc] sm:$0x3] %vm245_vm11, %v1102_v42 }
0x1896   :  { %v1083_v44 = vpop.permute.xlu0 %1082 }
0x1897   :  { %v1085_v45 = vadd.f32 %v1369_v4, %v1083_v44 }
0x1899   :  { %1092 = vrot.lane.b32.xlu0 %v1085_v45, %s1375_s15 }
0x189a   :  { %v369_v46 = vpop.permute.xlu0 %368 }
0x189b   :  { %372 = vst.msk [vmem:[#allocation3 + $0xa] sm:$0xc] %vm366_vm14, %v369_v46 }
0x189d   :  { %483 = vrot.lane.b32.xlu0 %v1546_v37, %s1372_s2  ;;  %v1117_v37 = vld [vmem:[#allocation3 + $0xa] sm:$0x3] }
0x189e   :  { %v611_v47 = vpop.permute.xlu0 %610 }
0x189f   :  { %614 = vst.msk [vmem:[#allocation3 + $0x2] sm:$0xc0] %vm608_vm15, %v611_v47 }
0x18a1   :  { %847 = vrot.lane.b32.xlu0 %v1618_v50, %s1372_s2 }
0x18a2   :  { %v853_v48 = vpop.permute.xlu0 %852  ;;  %v1118_v59 = vld [vmem:[#allocation3 + $0xc] sm:$0x3] }
0x18a3   :  { %856 = vst.msk [vmem:[#allocation3 + $0x2] sm:$0xc] %vm366_vm14, %v853_v48 }
0x18a5   :  { %1130 = vrot.lane.b32.xlu0 %v1113_v49, %s1376_s22 }
0x18a6   :  { %v1116_v53 = vld [vmem:[#allocation3 + $0x8] sm:$0x3] }
0x18a9   :  { %1087 = vrot.lane.b32.xlu0 %v1085_v45, %s1372_s2 }
0x18aa   :  { %v1114_v51 = vld [vmem:[#allocation3 + $0x4] sm:$0x3] }
0x18ab   :  { %1132 = vrot.lane.b32.xlu1 %v1114_v51, %s1376_s22 }
0x18ad   :  { %1134 = vrot.lane.b32.xlu0 %v1115_v52, %s1376_s22 }
0x18af   :  { %1136 = vrot.lane.b32.xlu1 %v1116_v53, %s1376_s22 }
0x18b1   :  { %1138 = vrot.lane.b32.xlu0 %v1117_v37, %s1376_s22 }
0x18b5   :  { %1142 = vrot.lane.b32.xlu0 %v1119_v54, %s1376_s22 }
0x190b   :  { %v1093_v55 = vpop.permute.xlu0 %1092 }
0x190c   :  { %1095 = vst.msk [vmem:[#allocation3 - $0x6] sm:$0xc0] %vm608_vm15, %v1093_v55 }
0x190f   :  { %v484_v50 = vpop.permute.xlu0 %483 }
0x1910   :  { %488 = vst.msk [vmem:[#allocation2] sm:$0x30] %vm487_vm13, %v484_v50 }
0x1913   :  { %v848_v56 = vpop.permute.xlu0 %847  ;;  %v1112_v57 = vld [vmem:[#allocation3] sm:$0x3] }
0x1914   :  { %851 = vst.msk [vmem:[#allocation2 + $0x8] sm:$0xc] %vm366_vm14, %v848_v56  ;;  %1128 = vrot.lane.b32.xlu1 %v1112_v57, %s1376_s22 }
0x1917   :  { %v1131_v58 = vpop.permute.xlu0 %1130  ;;  %v1098_v60 = vld [vmem:[#allocation2 + $0x4] sm:$0x3] }
0x1918   :  { %1154 = vst.msk [vmem:[%s1739_s5 + $0x2] sm:$0x3] %vm1152_vm0, %v1131_v58  ;;  %1140 = vrot.lane.b32.xlu1 %v1118_v59, %s1376_s22 }
0x1919   :  { %1106 = vst.msk [vmem:[%s1739_s5 + $0x4] sm:$0x3] %vm245_vm11, %v1098_v60 }
0x191b   :  { %v1088_v62 = vpop.permute.xlu0 %1087  ;;  %v1101_v23 = vld [vmem:[#allocation2 + $0xa] sm:$0x3] }
0x191c   :  { %1091 = vst.msk [vmem:[#allocation2 + $0x8] sm:$0xc0] %vm608_vm15, %v1088_v62 }
0x191d   :  { %1109 = vst.msk [vmem:[%s1739_s5 + $0xa] sm:$0x3] %vm245_vm11, %v1101_v23  ;;  %v1133_v63 = vpop.permute.xlu1 %1132 }
0x191e   :  { %1155 = vst.msk [vmem:[%s1739_s5 + $0x4] sm:$0x3] %vm1152_vm0, %v1133_v63 }
0x191f   :  { %v1135_v1 = vpop.permute.xlu0 %1134 }
0x1920   :  { %1156 = vst.msk [vmem:[%s1739_s5 + $0x6] sm:$0x3] %vm1152_vm0, %v1135_v1 }
0x1921   :  { %v1137_v3 = vpop.permute.xlu1 %1136 }
0x1922   :  { %1157 = vst.msk [vmem:[%s1739_s5 + $0x8] sm:$0x3] %vm1152_vm0, %v1137_v3 }
0x1923   :  { %v1139_v5 = vpop.permute.xlu0 %1138  ;;  %v1103_v9 = vld [vmem:[#allocation2 + $0xe] sm:$0x3] }
0x1924   :  { %1158 = vst.msk [vmem:[%s1739_s5 + $0xa] sm:$0x3] %vm1152_vm0, %v1139_v5 }
0x1925   :  { %1111 = vst.msk [vmem:[%s1739_s5 + $0xe] sm:$0x3] %vm245_vm11, %v1103_v9 }
0x1927   :  { %v1143_v10 = vpop.permute.xlu0 %1142 }
0x1928   :  { %1160 = vst.msk [vmem:[%s1739_s5 + $0xe] sm:$0x3] %vm1152_vm0, %v1143_v10 }
0x1986   :  { %v1129_v11 = vpop.permute.xlu1 %1128 }
0x1987   :  { %1153 = vst.msk [vmem:[%s1739_s5] sm:$0x3] %vm1152_vm0, %v1129_v11 }
0x198a   :  { %v1141_v12 = vpop.permute.xlu1 %1140 }
0x198b   :  { %1159 = vst.msk [vmem:[%s1739_s5 + $0xc] sm:$0x3] %vm1152_vm0, %v1141_v12 }

// kernel: sabirnn_forward.7
= control target key start
LH: loop header
LB: loop body
LE: loop exit
PB: predicated region body
PF: predicated region fallthrough
CT: control target
= control target key end

     0   :  { %v4229_v0 = vmov 0.0   ;;  %vm4230_vm0 = vmmov 0   ;;  %vm27_vm1 = vcmask 130048   ;;  %vm102_vm2 = vcmask 64512   ;;  %s4652_s1 = inlined_call_operand.vmem [shape: f32[16,8], index: 1, kind: input, shape index: {}]   ;;  %s4653_s0 = inlined_call_operand.vmem [shape: f32[8,2,16], index: 0, kind: input, shape index: {}]   ;;  %s4654_s2 = inlined_call_operand.vmem [shape: f32[8,8], index: 2, kind: input, shape index: {}]   ;;  %s4655_s3 = inlined_call_operand.vmem [shape: f32[16,3], index: 3, kind: input, shape index: {}]   ;;  %s4656_s4 = inlined_call_operand.vmem [shape: f32[8,5], index: 4, kind: input, shape index: {}]   ;;  %s4657_s5 = inlined_call_operand.vmem [shape: f32[8,5,3], index: 5, kind: output, shape index: {}]  }
   0x1   :  { %3878 = vmatprep.subr.mxu0 %v4229_v0  ;;  %v4265_v1 = vld [vmem:[%s4652_s1 + $0x8] sm:$0xff]  ;;  %v4270_v2 = vld [vmem:[%s4652_s1] sm:$0xff]  ;;  %3882 = vmatprep.mubr.msk.f32.mxu0 %vm4230_vm0, %v4229_v0  ;;  %vm232_vm3 = vcmask 1041408   ;;  %vm176_vm4 = vcmask 58368   ;;  %vm228_vm5 = vcmask 15360   ;;  %vm378_vm6 = vcmask 23552  }
   0x2   :  { %3879 = vmatpush3.msra.mxu0 %v4265_v1  ;;  %v26_v3 = vld [vmem:[%s4653_s0] sm:$0x3]  ;;  %3885 = vmatprep.subr.mxu1 %v4229_v0  ;;  %v4304_v29 = vld [vmem:[%s4655_s3 + $0x8] sm:$0xff]  ;;  %v3733_v35 = vld [vmem:[%s4653_s0 + $0x2] sm:$0x3]  ;;  %vm503_vm7 = vcmask 20480  }
   0x3   :  { %3880 = vmatprep.subr.mxu0 %v4229_v0  ;;  %3887 = vmatprep.mubr.msk.f32.mxu1 %vm4230_vm0, %v4229_v0  ;;  %v4290_v4 = vld [vmem:[%s4654_s2] sm:$0xff] }
   0x4   :  { %3881 = vmatpush3.msra.mxu0 %v4270_v2  ;;  %3886 = vmatpush3.msra.mxu1 %v4290_v4  ;;  %v4314_v31 = vld [vmem:[%s4655_s3] sm:$0xff] }
   0x5   :  { %3883 = vmatmul.mubr.msk.f32.vlgmr.msra.gmra.mxu0 %vm27_vm1, %v26_v3  ;;  %3895 = vmatprep.subr.mxu0 %v4229_v0  ;;  %v25_v32 = vld [vmem:[%s4656_s4] sm:$0xff] }
   0x6   :  { %3899 = vmatprep.mubr.msk.f32.mxu0 %vm4230_vm0, %v4229_v0  ;;  %3890 = vmatprep.subr.mxu1 %v4229_v0 }
   0x7   :  { %3896 = vmatpush3.msra.mxu0 %v4304_v29 }
   0x8   :  { %3897 = vmatprep.subr.mxu0 %v4229_v0 }
   0x9   :  { %3898 = vmatpush3.msra.mxu0 %v4314_v31 }
   0xa   :  { %3907 = vmatprep.subr.mxu0 %v4229_v0 }
  0xc5   :  { %v97_v5 = vpop.f32.mrf.mxu0 }
  0xc6   :  { %4112 = vtanh.f32 %v97_v5 }
  0xc7   :  { %v3884_v6 = vpop.f32.mrf.mxu0 }
  0xd3   :  { %v4113_v7 = vpop.eup %4112 }
  0xd4   :  { %3888 = vmatmul.mubr.msk.f32.vlgmr.msra.gmra.mxu1 %vm102_vm2, %v4113_v7 }
  0xd5   :  { %3892 = vmatprep.mubr.msk.f32.mxu1 %vm4230_vm0, %v4229_v0  ;;  %3891 = vmatpush3.msk.msra.mxu1 %vm232_vm3, %v26_v3 }
  0xd6   :  { %3902 = vmatprep.subr.mxu1 %v4229_v0 }
 0x194   :  { %v172_v8 = vpop.f32.mrf.mxu1 }
 0x195   :  { %v177_v9 = vsel %vm176_vm4, %v172_v8, -inf }
 0x196   :  { %v178_v10 = vrot.slane %v177_v9, 4  ;;  %v3889_v11 = vpop.f32.mrf.mxu1 }
 0x198   :  { %v179_v12 = vmax.f32 %v177_v9, %v178_v10 }
 0x19a   :  { %v180_v13 = vrot.slane %v179_v12, 2 }
 0x19c   :  { %v181_v14 = vmax.f32 %v179_v12, %v180_v13 }
 0x19e   :  { %v182_v15 = vrot.slane %v181_v14, 1 }
 0x1a0   :  { %v183_v16 = vmax.f32 %v181_v14, %v182_v15 }
 0x1a2   :  { %v184_v17 = vsub.f32 %v172_v8, %v183_v16 }
 0x1a4   :  { %v185_v18 = vmul.f32 1.442695, %v184_v17 }
 0x1a6   :  { %4114 = vpow2.f32 %v185_v18 }
 0x1b3   :  { %v4115_v19 = vpop.eup %4114 }
 0x1b4   :  { %v187_v20 = vsel %vm176_vm4, %v4115_v19, 0.0 }
 0x1b5   :  { %v188_v21 = vrot.slane %v187_v20, 4 }
 0x1b7   :  { %v189_v22 = vadd.f32 %v188_v21, %v187_v20 }
 0x1b9   :  { %v190_v23 = vrot.slane %v189_v22, 2 }
 0x1bb   :  { %v191_v24 = vadd.f32 %v190_v23, %v189_v22 }
 0x1bd   :  { %v192_v25 = vrot.slane %v191_v24, 1 }
 0x1bf   :  { %v193_v26 = vadd.f32 %v192_v25, %v191_v24 }
 0x1c1   :  { %4116 = vrcp.f32 %v193_v26 }
 0x1ce   :  { %v4117_v27 = vpop.eup %4116 }
 0x1cf   :  { %v195_v28 = vmul.f32 %v4117_v27, %v4115_v19 }
 0x1d1   :  { %196 = vxpose.xlu0.b32.start.end [1/1] (short) (narrow) %v195_v28, 8 }
 0x1d5   :  { %398 = vxpose.xlu0.b32.start.end [1/1] (short) (narrow) %v25_v32, 8 }
 0x24d   :  { %v212_v30 = vpop.trf.xlu0 }
 0x24e   :  { %3893 = vmatmul.mubr.msk.f32.vlgmr.msra.gmra.mxu1 %vm228_vm5, %v212_v30 }
 0x24f   :  { %3904 = vmatprep.mubr.msk.f32.mxu1 %vm4230_vm0, %v4229_v0 }
 0x251   :  { %v4338_v58 = vpop.trf.xlu0 }
 0x30e   :  { %v301_v33 = vpop.f32.mrf.mxu1 }
 0x30f   :  { %3900 = vmatmul.mubr.msk.f32.vlgmr.msra.gmra.mxu0 %vm27_vm1, %v301_v33 }
 0x310   :  { %v3894_v34 = vpop.f32.mrf.mxu1  ;;  %3908 = vmatpush3.msra.mxu0 %v4265_v1  ;;  %3911 = vmatprep.mubr.msk.f32.mxu0 %vm4230_vm0, %v4229_v0 }
 0x311   :  { %3909 = vmatprep.subr.mxu0 %v4229_v0 }
 0x312   :  { %3910 = vmatpush3.msra.mxu0 %v4270_v2 }
 0x313   :  { %3912 = vmatmul.mubr.msk.f32.vlgmr.msra.gmra.mxu0 %vm27_vm1, %v3733_v35  ;;  %3919 = vmatprep.subr.mxu0 %v4229_v0 }
 0x314   :  { %3920 = vmatpush3.msk.msra.mxu0 %vm232_vm3, %v3733_v35  ;;  %3921 = vmatprep.mubr.msk.f32.mxu0 %vm4230_vm0, %v4229_v0 }
 0x315   :  { %3931 = vmatprep.subr.mxu0 %v4229_v0 }
 0x3cf   :  { %v374_v36 = vpop.f32.mrf.mxu0 }
 0x3d0   :  { %v379_v37 = vsel %vm378_vm6, %v374_v36, -inf }
 0x3d1   :  { %v380_v38 = vrot.slane %v379_v37, 4  ;;  %v3901_v39 = vpop.f32.mrf.mxu0 }
 0x3d3   :  { %v381_v40 = vmax.f32 %v379_v37, %v380_v38  ;;  %v594_v41 = vpop.f32.mrf.mxu0 }
 0x3d5   :  { %v382_v42 = vrot.slane %v381_v40, 2  ;;  %v3913_v43 = vpop.f32.mrf.mxu0 }
 0x3d7   :  { %v383_v44 = vmax.f32 %v381_v40, %v382_v42 }
 0x3d9   :  { %v384_v45 = vrot.slane %v383_v44, 1 }
 0x3db   :  { %v385_v46 = vmax.f32 %v383_v44, %v384_v45 }
 0x3dd   :  { %v386_v47 = vsub.f32 %v374_v36, %v385_v46 }
 0x3df   :  { %v387_v48 = vmul.f32 1.442695, %v386_v47 }
 0x3e1   :  { %4118 = vpow2.f32 %v387_v48  ;;  %v3740_v48 = vld [vmem:[%s4653_s0 + $0x4] sm:$0x3] }
 0x3ee   :  { %v4119_v49 = vpop.eup %4118 }
 0x3ef   :  { %v389_v50 = vsel %vm378_vm6, %v4119_v49, 0.0 }
 0x3f0   :  { %v390_v51 = vrot.slane %v389_v50, 4 }
 0x3f2   :  { %v391_v52 = vadd.f32 %v390_v51, %v389_v50 }
 0x3f4   :  { %v392_v53 = vrot.slane %v391_v52, 2 }
 0x3f6   :  { %v393_v54 = vadd.f32 %v392_v53, %v391_v52 }
 0x3f8   :  { %v394_v55 = vrot.slane %v393_v54, 1 }
 0x3fa   :  { %v395_v56 = vadd.f32 %v394_v55, %v393_v54 }
 0x3fc   :  { %4120 = vrcp.f32 %v395_v56 }
 0x3fd   :  { %4122 = vtanh.f32 %v594_v41 }
 0x409   :  { %v4121_v57 = vpop.eup %4120 }
 0x40a   :  { %v397_v59 = vmul.f32 %v4121_v57, %v4119_v49  ;;  %v4123_v60 = vpop.eup %4122 }
 0x40c   :  { %3903 = vmatpush3.msra.mxu1 %v397_v59 }
 0x40d   :  { %3905 = vmatmul.mubr.msk.f32.vlgmr.msra.gmra.mxu1 %vm102_vm2, %v4338_v58  ;;  %3914 = vmatprep.subr.mxu1 %v4229_v0 }
 0x40e   :  { %3915 = vmatpush3.msra.mxu1 %v4290_v4  ;;  %3916 = vmatprep.mubr.msk.f32.mxu1 %vm4230_vm0, %v4229_v0 }
 0x40f   :  { %3924 = vmatprep.subr.mxu1 %v4229_v0 }
 0x411   :  { %3917 = vmatmul.mubr.msk.f32.vlgmr.msra.gmra.mxu1 %vm102_vm2, %v4123_v60 }
 0x412   :  { %3925 = vmatpush3.msra.mxu1 %v4304_v29  ;;  %3928 = vmatprep.mubr.msk.f32.mxu1 %vm4230_vm0, %v4229_v0 }
 0x413   :  { %3926 = vmatprep.subr.mxu1 %v4229_v0 }
 0x414   :  { %3927 = vmatpush3.msra.mxu1 %v4314_v31 }
 0x415   :  { %3936 = vmatprep.subr.mxu1 %v4229_v0 }
 0x4cd   :  { %v499_v61 = vpop.f32.mrf.mxu1 }
 0x4ce   :  { %v504_v62 = vsel %vm503_vm7, %v499_v61, -inf }
 0x4cf   :  { %v505_v63 = vrot.slane %v504_v62, 4  ;;  %v3906_v3 = vpop.f32.mrf.mxu1 }
 0x4d1   :  { %v506_v5 = vmax.f32 %v504_v62, %v505_v63  ;;  %v668_v6 = vpop.f32.mrf.mxu1 }
 0x4d2   :  { %v672_v7 = vsel %vm176_vm4, %v668_v6, -inf }
 0x4d3   :  { %v507_v8 = vrot.slane %v506_v5, 2  ;;  %v673_v9 = vrot.slane %v672_v7, 4  ;;  %v3918_v10 = vpop.f32.mrf.mxu1 }
 0x4d5   :  { %v508_v11 = vmax.f32 %v506_v5, %v507_v8  ;;  %v674_v12 = vmax.f32 %v672_v7, %v673_v9 }
 0x4d7   :  { %v509_v13 = vrot.slane %v508_v11, 1  ;;  %v675_v14 = vrot.slane %v674_v12, 2 }
 0x4d9   :  { %v510_v15 = vmax.f32 %v508_v11, %v509_v13  ;;  %v676_v16 = vmax.f32 %v674_v12, %v675_v14 }
 0x4db   :  { %v511_v17 = vsub.f32 %v499_v61, %v510_v15  ;;  %v677_v18 = vrot.slane %v676_v16, 1 }
 0x4dd   :  { %v512_v19 = vmul.f32 1.442695, %v511_v17  ;;  %v678_v20 = vmax.f32 %v676_v16, %v677_v18 }
 0x4df   :  { %4124 = vpow2.f32 %v512_v19  ;;  %v679_v21 = vsub.f32 %v668_v6, %v678_v20 }
 0x4e1   :  { %v680_v22 = vmul.f32 1.442695, %v679_v21 }
 0x4e3   :  { %4126 = vpow2.f32 %v680_v22 }
 0x4ec   :  { %v4125_v23 = vpop.eup %4124 }
 0x4ed   :  { %v514_v24 = vsel %vm503_vm7, %v4125_v23, 0.0 }
 0x4ee   :  { %v515_v25 = vrot.slane %v514_v24, 4 }
 0x4f0   :  { %v4127_v26 = vpop.eup %4126  ;;  %v516_v27 = vadd.f32 %v515_v25, %v514_v24 }
 0x4f1   :  { %v682_v28 = vsel %vm176_vm4, %v4127_v26, 0.0 }
 0x4f2   :  { %v517_v30 = vrot.slane %v516_v27, 2  ;;  %v683_v32 = vrot.slane %v682_v28, 4 }
 0x4f4   :  { %v518_v33 = vadd.f32 %v517_v30, %v516_v27  ;;  %v684_v34 = vadd.f32 %v683_v32, %v682_v28 }
 0x4f6   :  { %v519_v35 = vrot.slane %v518_v33, 1  ;;  %v685_v36 = vrot.slane %v684_v34, 2 }
 0x4f8   :  { %v520_v37 = vadd.f32 %v519_v35, %v518_v33  ;;  %v686_v38 = vadd.f32 %v685_v36, %v684_v34 }
 0x4fa   :  { %4128 = vrcp.f32 %v520_v37  ;;  %v687_v39 = vrot.slane %v686_v38, 1 }
 0x4fc   :  { %v688_v40 = vadd.f32 %v687_v39, %v686_v38 }
 0x4fe   :  { %4130 = vrcp.f32 %v688_v40 }
 0x507   :  { %v4129_v41 = vpop.eup %4128 }
 0x508   :  { %v522_v42 = vmul.f32 %v4129_v41, %v4125_v23 }
 0x50a   :  { %3715 = vst.msk [vmem:[%s4657_s5] sm:$0x1f] %vm503_vm7, %v522_v42 }
 0x50b   :  { %v4131_v43 = vpop.eup %4130 }
 0x50c   :  { %v690_v44 = vmul.f32 %v4131_v43, %v4127_v26 }
 0x50e   :  { %691 = vxpose.xlu1.b32.start.end [1/1] (short) (narrow) %v690_v44, 8 }
 0x58a   :  { %v707_v45 = vpop.trf.xlu1 }
 0x58b   :  { %3922 = vmatmul.mubr.msk.f32.vlgmr.msra.gmra.mxu0 %vm228_vm5, %v707_v45 }
 0x58c   :  { %3933 = vmatprep.mubr.msk.f32.mxu0 %vm4230_vm0, %v4229_v0 }
 0x64b   :  { %v794_v46 = vpop.f32.mrf.mxu0 }
 0x64c   :  { %3929 = vmatmul.mubr.msk.f32.vlgmr.msra.gmra.mxu1 %vm27_vm1, %v794_v46 }
 0x64d   :  { %v3923_v47 = vpop.f32.mrf.mxu0  ;;  %3937 = vmatpush3.msra.mxu1 %v4265_v1  ;;  %3940 = vmatprep.mubr.msk.f32.mxu1 %vm4230_vm0, %v4229_v0 }
 0x64e   :  { %3938 = vmatprep.subr.mxu1 %v4229_v0 }
 0x64f   :  { %3939 = vmatpush3.msra.mxu1 %v4270_v2 }
 0x650   :  { %3941 = vmatmul.mubr.msk.f32.vlgmr.msra.gmra.mxu1 %vm27_vm1, %v3740_v48  ;;  %3948 = vmatprep.subr.mxu1 %v4229_v0 }
 0x651   :  { %3949 = vmatpush3.msk.msra.mxu1 %vm232_vm3, %v3740_v48  ;;  %3950 = vmatprep.mubr.msk.f32.mxu1 %vm4230_vm0, %v4229_v0 }
 0x652   :  { %3960 = vmatprep.subr.mxu1 %v4229_v0 }
 0x70c   :  { %v867_v49 = vpop.f32.mrf.mxu1 }
 0x70d   :  { %v871_v50 = vsel %vm378_vm6, %v867_v49, -inf }
 0x70e   :  { %v872_v51 = vrot.slane %v871_v50, 4  ;;  %v3930_v52 = vpop.f32.mrf.mxu1 }
 0x710   :  { %v873_v53 = vmax.f32 %v871_v50, %v872_v51  ;;  %v1050_v54 = vpop.f32.mrf.mxu1 }
 0x712   :  { %v874_v55 = vrot.slane %v873_v53, 2  ;;  %v3942_v56 = vpop.f32.mrf.mxu1 }
 0x714   :  { %v875_v57 = vmax.f32 %v873_v53, %v874_v55 }
 0x716   :  { %v876_v59 = vrot.slane %v875_v57, 1 }
 0x718   :  { %v877_v60 = vmax.f32 %v875_v57, %v876_v59 }
 0x71a   :  { %v878_v61 = vsub.f32 %v867_v49, %v877_v60 }
 0x71c   :  { %v879_v62 = vmul.f32 1.442695, %v878_v61 }
 0x71e   :  { %4132 = vpow2.f32 %v879_v62  ;;  %v3747_v62 = vld [vmem:[%s4653_s0 + $0x6] sm:$0x3] }
 0x72b   :  { %v4133_v63 = vpop.eup %4132 }
 0x72c   :  { %v881_v3 = vsel %vm378_vm6, %v4133_v63, 0.0 }
 0x72d   :  { %v882_v5 = vrot.slane %v881_v3, 4 }
 0x72f   :  { %v883_v6 = vadd.f32 %v882_v5, %v881_v3 }
 0x731   :  { %v884_v7 = vrot.slane %v883_v6, 2 }
 0x733   :  { %v885_v8 = vadd.f32 %v884_v7, %v883_v6 }
 0x735   :  { %v886_v9 = vrot.slane %v885_v8, 1 }
 0x737   :  { %v887_v10 = vadd.f32 %v886_v9, %v885_v8 }
 0x739   :  { %4134 = vrcp.f32 %v887_v10 }
 0x73a   :  { %4136 = vtanh.f32 %v1050_v54 }
 0x746   :  { %v4135_v11 = vpop.eup %4134 }
 0x747   :  { %v889_v12 = vmul.f32 %v4135_v11, %v4133_v63  ;;  %v4137_v13 = vpop.eup %4136 }
 0x749   :  { %3932 = vmatpush3.msra.mxu0 %v889_v12 }
 0x74a   :  { %3934 = vmatmul.mubr.msk.f32.vlgmr.msra.gmra.mxu0 %vm102_vm2, %v4338_v58  ;;  %3943 = vmatprep.subr.mxu0 %v4229_v0 }
 0x74b   :  { %3944 = vmatpush3.msra.mxu0 %v4290_v4  ;;  %3945 = vmatprep.mubr.msk.f32.mxu0 %vm4230_vm0, %v4229_v0 }
 0x74c   :  { %3953 = vmatprep.subr.mxu0 %v4229_v0 }
 0x74e   :  { %3946 = vmatmul.mubr.msk.f32.vlgmr.msra.gmra.mxu0 %vm102_vm2, %v4137_v13 }
 0x74f   :  { %3954 = vmatpush3.msra.mxu0 %v4304_v29  ;;  %3957 = vmatprep.mubr.msk.f32.mxu0 %vm4230_vm0, %v4229_v0 }
 0x750   :  { %3955 = vmatprep.subr.mxu0 %v4229_v0 }
 0x751   :  { %3956 = vmatpush3.msra.mxu0 %v4314_v31 }
 0x752   :  { %3965 = vmatprep.subr.mxu0 %v4229_v0 }
 0x80a   :  { %v956_v14 = vpop.f32.mrf.mxu0 }
 0x80b   :  { %v960_v15 = vsel %vm503_vm7, %v956_v14, -inf }
 0x80c   :  { %v961_v16 = vrot.slane %v960_v15, 4  ;;  %v3935_v17 = vpop.f32.mrf.mxu0 }
 0x80e   :  { %v962_v18 = vmax.f32 %v960_v15, %v961_v16  ;;  %v1124_v19 = vpop.f32.mrf.mxu0 }
 0x80f   :  { %v1128_v20 = vsel %vm176_vm4, %v1124_v19, -inf }
 0x810   :  { %v963_v21 = vrot.slane %v962_v18, 2  ;;  %v1129_v22 = vrot.slane %v1128_v20, 4  ;;  %v3947_v23 = vpop.f32.mrf.mxu0 }
 0x812   :  { %v964_v24 = vmax.f32 %v962_v18, %v963_v21  ;;  %v1130_v25 = vmax.f32 %v1128_v20, %v1129_v22 }
 0x814   :  { %v965_v26 = vrot.slane %v964_v24, 1  ;;  %v1131_v27 = vrot.slane %v1130_v25, 2 }
 0x816   :  { %v966_v28 = vmax.f32 %v964_v24, %v965_v26  ;;  %v1132_v30 = vmax.f32 %v1130_v25, %v1131_v27 }
 0x818   :  { %v967_v32 = vsub.f32 %v956_v14, %v966_v28  ;;  %v1133_v33 = vrot.slane %v1132_v30, 1 }
 0x81a   :  { %v968_v34 = vmul.f32 1.442695, %v967_v32  ;;  %v1134_v35 = vmax.f32 %v1132_v30, %v1133_v33 }
 0x81c   :  { %4138 = vpow2.f32 %v968_v34  ;;  %v1135_v36 = vsub.f32 %v1124_v19, %v1134_v35 }
 0x81e   :  { %v1136_v37 = vmul.f32 1.442695, %v1135_v36 }
 0x820   :  { %4140 = vpow2.f32 %v1136_v37 }
 0x829   :  { %v4139_v38 = vpop.eup %4138 }
 0x82a   :  { %v970_v39 = vsel %vm503_vm7, %v4139_v38, 0.0 }
 0x82b   :  { %v971_v40 = vrot.slane %v970_v39, 4 }
 0x82d   :  { %v4141_v41 = vpop.eup %4140  ;;  %v972_v42 = vadd.f32 %v971_v40, %v970_v39 }
 0x82e   :  { %v1138_v43 = vsel %vm176_vm4, %v4141_v41, 0.0 }
 0x82f   :  { %v973_v44 = vrot.slane %v972_v42, 2  ;;  %v1139_v45 = vrot.slane %v1138_v43, 4 }
 0x831   :  { %v974_v46 = vadd.f32 %v973_v44, %v972_v42  ;;  %v1140_v47 = vadd.f32 %v1139_v45, %v1138_v43 }
 0x833   :  { %v975_v48 = vrot.slane %v974_v46, 1  ;;  %v1141_v49 = vrot.slane %v1140_v47, 2 }
 0x835   :  { %v976_v50 = vadd.f32 %v975_v48, %v974_v46  ;;  %v1142_v51 = vadd.f32 %v1141_v49, %v1140_v47 }
 0x837   :  { %4142 = vrcp.f32 %v976_v50  ;;  %v1143_v52 = vrot.slane %v1142_v51, 1 }
 0x839   :  { %v1144_v53 = vadd.f32 %v1143_v52, %v1142_v51 }
 0x83b   :  { %4144 = vrcp.f32 %v1144_v53 }
 0x844   :  { %v4143_v54 = vpop.eup %4142 }
 0x845   :  { %v978_v55 = vmul.f32 %v4143_v54, %v4139_v38 }
 0x847   :  { %3716 = vst.msk [vmem:[%s4657_s5 + $0x8] sm:$0x1f] %vm503_vm7, %v978_v55 }
 0x848   :  { %v4145_v56 = vpop.eup %4144 }
 0x849   :  { %v1146_v57 = vmul.f32 %v4145_v56, %v4141_v41 }
 0x84b   :  { %1147 = vxpose.xlu1.b32.start.end [1/1] (short) (narrow) %v1146_v57, 8 }
 0x8c7   :  { %v1163_v59 = vpop.trf.xlu1 }
 0x8c8   :  { %3951 = vmatmul.mubr.msk.f32.vlgmr.msra.gmra.mxu1 %vm228_vm5, %v1163_v59 }
 0x8c9   :  { %3962 = vmatprep.mubr.msk.f32.mxu1 %vm4230_vm0, %v4229_v0 }
 0x988   :  { %v1250_v60 = vpop.f32.mrf.mxu1 }
 0x989   :  { %3958 = vmatmul.mubr.msk.f32.vlgmr.msra.gmra.mxu0 %vm27_vm1, %v1250_v60 }
 0x98a   :  { %v3952_v61 = vpop.f32.mrf.mxu1  ;;  %3966 = vmatpush3.msra.mxu0 %v4265_v1  ;;  %3969 = vmatprep.mubr.msk.f32.mxu0 %vm4230_vm0, %v4229_v0 }
 0x98b   :  { %3967 = vmatprep.subr.mxu0 %v4229_v0 }
 0x98c   :  { %3968 = vmatpush3.msra.mxu0 %v4270_v2 }
 0x98d   :  { %3970 = vmatmul.mubr.msk.f32.vlgmr.msra.gmra.mxu0 %vm27_vm1, %v3747_v62  ;;  %3977 = vmatprep.subr.mxu0 %v4229_v0 }
 0x98e   :  { %3978 = vmatpush3.msk.msra.mxu0 %vm232_vm3, %v3747_v62  ;;  %3979 = vmatprep.mubr.msk.f32.mxu0 %vm4230_vm0, %v4229_v0 }
 0x98f   :  { %3989 = vmatprep.subr.mxu0 %v4229_v0 }
 0xa49   :  { %v1323_v63 = vpop.f32.mrf.mxu0 }
 0xa4a   :  { %v1327_v3 = vsel %vm378_vm6, %v1323_v63, -inf }
 0xa4b   :  { %v1328_v5 = vrot.slane %v1327_v3, 4  ;;  %v3959_v6 = vpop.f32.mrf.mxu0 }
 0xa4d   :  { %v1329_v7 = vmax.f32 %v1327_v3, %v1328_v5  ;;  %v1506_v8 = vpop.f32.mrf.mxu0 }
 0xa4f   :  { %v1330_v9 = vrot.slane %v1329_v7, 2  ;;  %v3971_v10 = vpop.f32.mrf.mxu0 }
 0xa51   :  { %v1331_v11 = vmax.f32 %v1329_v7, %v1330_v9 }
 0xa53   :  { %v1332_v12 = vrot.slane %v1331_v11, 1 }
 0xa55   :  { %v1333_v13 = vmax.f32 %v1331_v11, %v1332_v12 }
 0xa57   :  { %v1334_v14 = vsub.f32 %v1323_v63, %v1333_v13 }
 0xa59   :  { %v1335_v15 = vmul.f32 1.442695, %v1334_v14 }
 0xa5b   :  { %4146 = vpow2.f32 %v1335_v15  ;;  %v3754_v15 = vld [vmem:[%s4653_s0 + $0x8] sm:$0x3] }
 0xa68   :  { %v4147_v16 = vpop.eup %4146 }
 0xa69   :  { %v1337_v17 = vsel %vm378_vm6, %v4147_v16, 0.0 }
 0xa6a   :  { %v1338_v18 = vrot.slane %v1337_v17, 4 }
 0xa6c   :  { %v1339_v19 = vadd.f32 %v1338_v18, %v1337_v17 }
 0xa6e   :  { %v1340_v20 = vrot.slane %v1339_v19, 2 }
 0xa70   :  { %v1341_v21 = vadd.f32 %v1340_v20, %v1339_v19 }
 0xa72   :  { %v1342_v22 = vrot.slane %v1341_v21, 1 }
 0xa74   :  { %v1343_v23 = vadd.f32 %v1342_v22, %v1341_v21 }
 0xa76   :  { %4148 = vrcp.f32 %v1343_v23 }
 0xa77   :  { %4150 = vtanh.f32 %v1506_v8 }
 0xa83   :  { %v4149_v24 = vpop.eup %4148 }
 0xa84   :  { %v1345_v25 = vmul.f32 %v4149_v24, %v4147_v16  ;;  %v4151_v26 = vpop.eup %4150 }
 0xa86   :  { %3961 = vmatpush3.msra.mxu1 %v1345_v25 }
 0xa87   :  { %3963 = vmatmul.mubr.msk.f32.vlgmr.msra.gmra.mxu1 %vm102_vm2, %v4338_v58  ;;  %3972 = vmatprep.subr.mxu1 %v4229_v0 }
 0xa88   :  { %3973 = vmatpush3.msra.mxu1 %v4290_v4  ;;  %3974 = vmatprep.mubr.msk.f32.mxu1 %vm4230_vm0, %v4229_v0 }
 0xa89   :  { %3982 = vmatprep.subr.mxu1 %v4229_v0 }
 0xa8b   :  { %3975 = vmatmul.mubr.msk.f32.vlgmr.msra.gmra.mxu1 %vm102_vm2, %v4151_v26 }
 0xa8c   :  { %3983 = vmatpush3.msra.mxu1 %v4304_v29  ;;  %3986 = vmatprep.mubr.msk.f32.mxu1 %vm4230_vm0, %v4229_v0 }
 0xa8d   :  { %3984 = vmatprep.subr.mxu1 %v4229_v0 }
 0xa8e   :  { %3985 = vmatpush3.msra.mxu1 %v4314_v31 }
 0xa8f   :  { %3994 = vmatprep.subr.mxu1 %v4229_v0 }
 0xb47   :  { %v1412_v27 = vpop.f32.mrf.mxu1 }
 0xb48   :  { %v1416_v28 = vsel %vm503_vm7, %v1412_v27, -inf }
 0xb49   :  { %v1417_v30 = vrot.slane %v1416_v28, 4  ;;  %v3964_v32 = vpop.f32.mrf.mxu1 }
 0xb4b   :  { %v1418_v33 = vmax.f32 %v1416_v28, %v1417_v30  ;;  %v1580_v34 = vpop.f32.mrf.mxu1 }
 0xb4c   :  { %v1584_v35 = vsel %vm176_vm4, %v1580_v34, -inf }
 0xb4d   :  { %v1419_v36 = vrot.slane %v1418_v33, 2  ;;  %v1585_v37 = vrot.slane %v1584_v35, 4  ;;  %v3976_v38 = vpop.f32.mrf.mxu1 }
 0xb4f   :  { %v1420_v39 = vmax.f32 %v1418_v33, %v1419_v36  ;;  %v1586_v40 = vmax.f32 %v1584_v35, %v1585_v37 }
 0xb51   :  { %v1421_v41 = vrot.slane %v1420_v39, 1  ;;  %v1587_v42 = vrot.slane %v1586_v40, 2 }
 0xb53   :  { %v1422_v43 = vmax.f32 %v1420_v39, %v1421_v41  ;;  %v1588_v44 = vmax.f32 %v1586_v40, %v1587_v42 }
 0xb55   :  { %v1423_v45 = vsub.f32 %v1412_v27, %v1422_v43  ;;  %v1589_v46 = vrot.slane %v1588_v44, 1 }
 0xb57   :  { %v1424_v47 = vmul.f32 1.442695, %v1423_v45  ;;  %v1590_v48 = vmax.f32 %v1588_v44, %v1589_v46 }
 0xb59   :  { %4152 = vpow2.f32 %v1424_v47  ;;  %v1591_v49 = vsub.f32 %v1580_v34, %v1590_v48 }
 0xb5b   :  { %v1592_v50 = vmul.f32 1.442695, %v1591_v49 }
 0xb5d   :  { %4154 = vpow2.f32 %v1592_v50 }
 0xb66   :  { %v4153_v51 = vpop.eup %4152 }
 0xb67   :  { %v1426_v52 = vsel %vm503_vm7, %v4153_v51, 0.0 }
 0xb68   :  { %v1427_v53 = vrot.slane %v1426_v52, 4 }
 0xb6a   :  { %v4155_v54 = vpop.eup %4154  ;;  %v1428_v55 = vadd.f32 %v1427_v53, %v1426_v52 }
 0xb6b   :  { %v1594_v56 = vsel %vm176_vm4, %v4155_v54, 0.0 }
 0xb6c   :  { %v1429_v57 = vrot.slane %v1428_v55, 2  ;;  %v1595_v59 = vrot.slane %v1594_v56, 4 }
 0xb6e   :  { %v1430_v60 = vadd.f32 %v1429_v57, %v1428_v55  ;;  %v1596_v61 = vadd.f32 %v1595_v59, %v1594_v56 }
 0xb70   :  { %v1431_v62 = vrot.slane %v1430_v60, 1  ;;  %v1597_v63 = vrot.slane %v1596_v61, 2 }
 0xb72   :  { %v1432_v3 = vadd.f32 %v1431_v62, %v1430_v60  ;;  %v1598_v5 = vadd.f32 %v1597_v63, %v1596_v61 }
 0xb74   :  { %4156 = vrcp.f32 %v1432_v3  ;;  %v1599_v6 = vrot.slane %v1598_v5, 1 }
 0xb76   :  { %v1600_v7 = vadd.f32 %v1599_v6, %v1598_v5 }
 0xb78   :  { %4158 = vrcp.f32 %v1600_v7 }
 0xb81   :  { %v4157_v8 = vpop.eup %4156 }
 0xb82   :  { %v1434_v9 = vmul.f32 %v4157_v8, %v4153_v51 }
 0xb84   :  { %3717 = vst.msk [vmem:[%s4657_s5 + $0x10] sm:$0x1f] %vm503_vm7, %v1434_v9 }
 0xb85   :  { %v4159_v10 = vpop.eup %4158 }
 0xb86   :  { %v1602_v11 = vmul.f32 %v4159_v10, %v4155_v54 }
 0xb88   :  { %1603 = vxpose.xlu0.b32.start.end [1/1] (short) (narrow) %v1602_v11, 8 }
 0xc04   :  { %v1619_v12 = vpop.trf.xlu0 }
 0xc05   :  { %3980 = vmatmul.mubr.msk.f32.vlgmr.msra.gmra.mxu0 %vm228_vm5, %v1619_v12 }
 0xc06   :  { %3991 = vmatprep.mubr.msk.f32.mxu0 %vm4230_vm0, %v4229_v0 }
 0xcc5   :  { %v1706_v13 = vpop.f32.mrf.mxu0 }
 0xcc6   :  { %3987 = vmatmul.mubr.msk.f32.vlgmr.msra.gmra.mxu1 %vm27_vm1, %v1706_v13 }
 0xcc7   :  { %v3981_v14 = vpop.f32.mrf.mxu0  ;;  %3995 = vmatpush3.msra.mxu1 %v4265_v1  ;;  %3998 = vmatprep.mubr.msk.f32.mxu1 %vm4230_vm0, %v4229_v0 }
 0xcc8   :  { %3996 = vmatprep.subr.mxu1 %v4229_v0 }
 0xcc9   :  { %3997 = vmatpush3.msra.mxu1 %v4270_v2 }
 0xcca   :  { %3999 = vmatmul.mubr.msk.f32.vlgmr.msra.gmra.mxu1 %vm27_vm1, %v3754_v15  ;;  %4006 = vmatprep.subr.mxu1 %v4229_v0 }
 0xccb   :  { %4007 = vmatpush3.msk.msra.mxu1 %vm232_vm3, %v3754_v15  ;;  %4008 = vmatprep.mubr.msk.f32.mxu1 %vm4230_vm0, %v4229_v0 }
 0xccc   :  { %4018 = vmatprep.subr.mxu1 %v4229_v0 }
 0xd86   :  { %v1779_v16 = vpop.f32.mrf.mxu1 }
 0xd87   :  { %v1783_v17 = vsel %vm378_vm6, %v1779_v16, -inf }
 0xd88   :  { %v1784_v18 = vrot.slane %v1783_v17, 4  ;;  %v3988_v19 = vpop.f32.mrf.mxu1 }
 0xd8a   :  { %v1785_v20 = vmax.f32 %v1783_v17, %v1784_v18  ;;  %v1962_v21 = vpop.f32.mrf.mxu1 }
 0xd8c   :  { %v1786_v22 = vrot.slane %v1785_v20, 2  ;;  %v4000_v23 = vpop.f32.mrf.mxu1 }
 0xd8e   :  { %v1787_v24 = vmax.f32 %v1785_v20, %v1786_v22 }
 0xd90   :  { %v1788_v25 = vrot.slane %v1787_v24, 1 }
 0xd92   :  { %v1789_v26 = vmax.f32 %v1787_v24, %v1788_v25 }
 0xd94   :  { %v1790_v27 = vsub.f32 %v1779_v16, %v1789_v26 }
 0xd96   :  { %v1791_v28 = vmul.f32 1.442695, %v1790_v27 }
 0xd98   :  { %4160 = vpow2.f32 %v1791_v28  ;;  %v3761_v28 = vld [vmem:[%s4653_s0 + $0xa] sm:$0x3] }
 0xda5   :  { %v4161_v30 = vpop.eup %4160 }
 0xda6   :  { %v1793_v32 = vsel %vm378_vm6, %v4161_v30, 0.0 }
 0xda7   :  { %v1794_v33 = vrot.slane %v1793_v32, 4 }
 0xda9   :  { %v1795_v34 = vadd.f32 %v1794_v33, %v1793_v32 }
 0xdab   :  { %v1796_v35 = vrot.slane %v1795_v34, 2 }
 0xdad   :  { %v1797_v36 = vadd.f32 %v1796_v35, %v1795_v34 }
 0xdaf   :  { %v1798_v37 = vrot.slane %v1797_v36, 1 }
 0xdb1   :  { %v1799_v38 = vadd.f32 %v1798_v37, %v1797_v36 }
 0xdb3   :  { %4162 = vrcp.f32 %v1799_v38 }
 0xdb4   :  { %4164 = vtanh.f32 %v1962_v21 }
 0xdc0   :  { %v4163_v39 = vpop.eup %4162 }
 0xdc1   :  { %v1801_v40 = vmul.f32 %v4163_v39, %v4161_v30  ;;  %v4165_v41 = vpop.eup %4164 }
 0xdc3   :  { %3990 = vmatpush3.msra.mxu0 %v1801_v40 }
 0xdc4   :  { %3992 = vmatmul.mubr.msk.f32.vlgmr.msra.gmra.mxu0 %vm102_vm2, %v4338_v58  ;;  %4001 = vmatprep.subr.mxu0 %v4229_v0 }
 0xdc5   :  { %4002 = vmatpush3.msra.mxu0 %v4290_v4  ;;  %4003 = vmatprep.mubr.msk.f32.mxu0 %vm4230_vm0, %v4229_v0 }
 0xdc6   :  { %4011 = vmatprep.subr.mxu0 %v4229_v0 }
 0xdc8   :  { %4004 = vmatmul.mubr.msk.f32.vlgmr.msra.gmra.mxu0 %vm102_vm2, %v4165_v41 }
 0xdc9   :  { %4012 = vmatpush3.msra.mxu0 %v4304_v29  ;;  %4015 = vmatprep.mubr.msk.f32.mxu0 %vm4230_vm0, %v4229_v0 }
 0xdca   :  { %4013 = vmatprep.subr.mxu0 %v4229_v0 }
 0xdcb   :  { %4014 = vmatpush3.msra.mxu0 %v4314_v31 }
 0xdcc   :  { %4023 = vmatprep.subr.mxu0 %v4229_v0 }
 0xe84   :  { %v1868_v42 = vpop.f32.mrf.mxu0 }
 0xe85   :  { %v1872_v43 = vsel %vm503_vm7, %v1868_v42, -inf }
 0xe86   :  { %v1873_v44 = vrot.slane %v1872_v43, 4  ;;  %v3993_v45 = vpop.f32.mrf.mxu0 }
 0xe88   :  { %v1874_v46 = vmax.f32 %v1872_v43, %v1873_v44  ;;  %v2036_v47 = vpop.f32.mrf.mxu0 }
 0xe89   :  { %v2040_v48 = vsel %vm176_vm4, %v2036_v47, -inf }
 0xe8a   :  { %v1875_v49 = vrot.slane %v1874_v46, 2  ;;  %v2041_v50 = vrot.slane %v2040_v48, 4  ;;  %v4005_v51 = vpop.f32.mrf.mxu0 }
 0xe8c   :  { %v1876_v52 = vmax.f32 %v1874_v46, %v1875_v49  ;;  %v2042_v53 = vmax.f32 %v2040_v48, %v2041_v50 }
 0xe8e   :  { %v1877_v54 = vrot.slane %v1876_v52, 1  ;;  %v2043_v55 = vrot.slane %v2042_v53, 2 }
 0xe90   :  { %v1878_v56 = vmax.f32 %v1876_v52, %v1877_v54  ;;  %v2044_v57 = vmax.f32 %v2042_v53, %v2043_v55 }
 0xe92   :  { %v1879_v59 = vsub.f32 %v1868_v42, %v1878_v56  ;;  %v2045_v60 = vrot.slane %v2044_v57, 1 }
 0xe94   :  { %v1880_v61 = vmul.f32 1.442695, %v1879_v59  ;;  %v2046_v62 = vmax.f32 %v2044_v57, %v2045_v60 }
 0xe96   :  { %4166 = vpow2.f32 %v1880_v61  ;;  %v2047_v63 = vsub.f32 %v2036_v47, %v2046_v62 }
 0xe98   :  { %v2048_v3 = vmul.f32 1.442695, %v2047_v63 }
 0xe9a   :  { %4168 = vpow2.f32 %v2048_v3 }
 0xea3   :  { %v4167_v5 = vpop.eup %4166 }
 0xea4   :  { %v1882_v6 = vsel %vm503_vm7, %v4167_v5, 0.0 }
 0xea5   :  { %v1883_v7 = vrot.slane %v1882_v6, 4 }
 0xea7   :  { %v4169_v8 = vpop.eup %4168  ;;  %v1884_v9 = vadd.f32 %v1883_v7, %v1882_v6 }
 0xea8   :  { %v2050_v10 = vsel %vm176_vm4, %v4169_v8, 0.0 }
 0xea9   :  { %v1885_v11 = vrot.slane %v1884_v9, 2  ;;  %v2051_v12 = vrot.slane %v2050_v10, 4 }
 0xeab   :  { %v1886_v13 = vadd.f32 %v1885_v11, %v1884_v9  ;;  %v2052_v14 = vadd.f32 %v2051_v12, %v2050_v10 }
 0xead   :  { %v1887_v15 = vrot.slane %v1886_v13, 1  ;;  %v2053_v16 = vrot.slane %v2052_v14, 2 }
 0xeaf   :  { %v1888_v17 = vadd.f32 %v1887_v15, %v1886_v13  ;;  %v2054_v18 = vadd.f32 %v2053_v16, %v2052_v14 }
 0xeb1   :  { %4170 = vrcp.f32 %v1888_v17  ;;  %v2055_v19 = vrot.slane %v2054_v18, 1 }
 0xeb3   :  { %v2056_v20 = vadd.f32 %v2055_v19, %v2054_v18 }
 0xeb5   :  { %4172 = vrcp.f32 %v2056_v20 }
 0xebe   :  { %v4171_v21 = vpop.eup %4170 }
 0xebf   :  { %v1890_v22 = vmul.f32 %v4171_v21, %v4167_v5 }
 0xec1   :  { %3718 = vst.msk [vmem:[%s4657_s5 + $0x18] sm:$0x1f] %vm503_vm7, %v1890_v22 }
 0xec2   :  { %v4173_v23 = vpop.eup %4172 }
 0xec3   :  { %v2058_v24 = vmul.f32 %v4173_v23, %v4169_v8 }
 0xec5   :  { %2059 = vxpose.xlu1.b32.start.end [1/1] (short) (narrow) %v2058_v24, 8 }
 0xf41   :  { %v2075_v25 = vpop.trf.xlu1 }
 0xf42   :  { %4009 = vmatmul.mubr.msk.f32.vlgmr.msra.gmra.mxu1 %vm228_vm5, %v2075_v25 }
 0xf43   :  { %4020 = vmatprep.mubr.msk.f32.mxu1 %vm4230_vm0, %v4229_v0 }
0x1002   :  { %v2162_v26 = vpop.f32.mrf.mxu1 }
0x1003   :  { %4016 = vmatmul.mubr.msk.f32.vlgmr.msra.gmra.mxu0 %vm27_vm1, %v2162_v26 }
0x1004   :  { %v4010_v27 = vpop.f32.mrf.mxu1  ;;  %4024 = vmatpush3.msra.mxu0 %v4265_v1  ;;  %4027 = vmatprep.mubr.msk.f32.mxu0 %vm4230_vm0, %v4229_v0 }
0x1005   :  { %4025 = vmatprep.subr.mxu0 %v4229_v0 }
0x1006   :  { %4026 = vmatpush3.msra.mxu0 %v4270_v2 }
0x1007   :  { %4028 = vmatmul.mubr.msk.f32.vlgmr.msra.gmra.mxu0 %vm27_vm1, %v3761_v28  ;;  %4035 = vmatprep.subr.mxu0 %v4229_v0 }
0x1008   :  { %4036 = vmatpush3.msk.msra.mxu0 %vm232_vm3, %v3761_v28  ;;  %4037 = vmatprep.mubr.msk.f32.mxu0 %vm4230_vm0, %v4229_v0 }
0x1009   :  { %4047 = vmatprep.subr.mxu0 %v4229_v0 }
0x10c3   :  { %v2235_v1 = vpop.f32.mrf.mxu0 }
0x10c4   :  { %v2239_v30 = vsel %vm378_vm6, %v2235_v1, -inf }
0x10c5   :  { %v2240_v32 = vrot.slane %v2239_v30, 4  ;;  %v4017_v33 = vpop.f32.mrf.mxu0 }
0x10c7   :  { %v2241_v34 = vmax.f32 %v2239_v30, %v2240_v32  ;;  %v2418_v35 = vpop.f32.mrf.mxu0 }
0x10c9   :  { %v2242_v36 = vrot.slane %v2241_v34, 2  ;;  %v4029_v2 = vpop.f32.mrf.mxu0 }
0x10ca   :  { %v4537_v2 = vld [vmem:[%s4652_s1 + $0x8] sm:$0xff] }
0x10cb   :  { %v2243_v37 = vmax.f32 %v2241_v34, %v2242_v36 }
0x10cd   :  { %v2244_v38 = vrot.slane %v2243_v37, 1 }
0x10cf   :  { %v2245_v39 = vmax.f32 %v2243_v37, %v2244_v38  ;;  %v3768_v37 = vld [vmem:[%s4653_s0 + $0xc] sm:$0x3]  ;;  %v4549_v38 = vld [vmem:[%s4652_s1] sm:$0xff] }
0x10d1   :  { %v2246_v40 = vsub.f32 %v2235_v1, %v2245_v39 }
0x10d3   :  { %v2247_v41 = vmul.f32 1.442695, %v2246_v40 }
0x10d5   :  { %4174 = vpow2.f32 %v2247_v41 }
0x10e2   :  { %v4175_v42 = vpop.eup %4174 }
0x10e3   :  { %v2249_v43 = vsel %vm378_vm6, %v4175_v42, 0.0 }
0x10e4   :  { %v2250_v44 = vrot.slane %v2249_v43, 4 }
0x10e6   :  { %v2251_v45 = vadd.f32 %v2250_v44, %v2249_v43 }
0x10e8   :  { %v2252_v46 = vrot.slane %v2251_v45, 2 }
0x10ea   :  { %v2253_v47 = vadd.f32 %v2252_v46, %v2251_v45 }
0x10ec   :  { %v2254_v48 = vrot.slane %v2253_v47, 1 }
0x10ee   :  { %v2255_v49 = vadd.f32 %v2254_v48, %v2253_v47 }
0x10f0   :  { %4176 = vrcp.f32 %v2255_v49 }
0x10f1   :  { %4178 = vtanh.f32 %v2418_v35 }
0x10fd   :  { %v4177_v50 = vpop.eup %4176 }
0x10fe   :  { %v2257_v51 = vmul.f32 %v4177_v50, %v4175_v42  ;;  %v4179_v52 = vpop.eup %4178 }
0x1100   :  { %4019 = vmatpush3.msra.mxu1 %v2257_v51 }
0x1101   :  { %4021 = vmatmul.mubr.msk.f32.vlgmr.msra.gmra.mxu1 %vm102_vm2, %v4338_v58  ;;  %4030 = vmatprep.subr.mxu1 %v4229_v0 }
0x1102   :  { %4031 = vmatpush3.msra.mxu1 %v4290_v4  ;;  %4032 = vmatprep.mubr.msk.f32.mxu1 %vm4230_vm0, %v4229_v0 }
0x1103   :  { %4040 = vmatprep.subr.mxu1 %v4229_v0 }
0x1105   :  { %4033 = vmatmul.mubr.msk.f32.vlgmr.msra.gmra.mxu1 %vm102_vm2, %v4179_v52 }
0x1106   :  { %4041 = vmatpush3.msra.mxu1 %v4304_v29  ;;  %4044 = vmatprep.mubr.msk.f32.mxu1 %vm4230_vm0, %v4229_v0 }
0x1107   :  { %4042 = vmatprep.subr.mxu1 %v4229_v0 }
0x1108   :  { %4043 = vmatpush3.msra.mxu1 %v4314_v31 }
0x1109   :  { %4052 = vmatprep.subr.mxu1 %v4229_v0 }
0x11c1   :  { %v2324_v53 = vpop.f32.mrf.mxu1 }
0x11c2   :  { %v2328_v4 = vsel %vm503_vm7, %v2324_v53, -inf }
0x11c3   :  { %v2329_v54 = vrot.slane %v2328_v4, 4  ;;  %v4022_v55 = vpop.f32.mrf.mxu1 }
0x11c5   :  { %v2330_v56 = vmax.f32 %v2328_v4, %v2329_v54  ;;  %v2492_v57 = vpop.f32.mrf.mxu1 }
0x11c6   :  { %v2496_v59 = vsel %vm176_vm4, %v2492_v57, -inf }
0x11c7   :  { %v2331_v60 = vrot.slane %v2330_v56, 2  ;;  %v2497_v29 = vrot.slane %v2496_v59, 4  ;;  %v4034_v61 = vpop.f32.mrf.mxu1 }
0x11c9   :  { %v2332_v62 = vmax.f32 %v2330_v56, %v2331_v60  ;;  %v2498_v63 = vmax.f32 %v2496_v59, %v2497_v29 }
0x11cb   :  { %v2333_v3 = vrot.slane %v2332_v62, 1  ;;  %v2499_v5 = vrot.slane %v2498_v63, 2 }
0x11cd   :  { %v2334_v6 = vmax.f32 %v2332_v62, %v2333_v3  ;;  %v2500_v31 = vmax.f32 %v2498_v63, %v2499_v5  ;;  %v4566_v62 = vld [vmem:[%s4654_s2] sm:$0xff]  ;;  %v4576_v63 = vld [vmem:[%s4655_s3 + $0x8] sm:$0xff] }
0x11ce   :  { %v4585_v3 = vld [vmem:[%s4655_s3] sm:$0xff] }
0x11cf   :  { %v2335_v7 = vsub.f32 %v2324_v53, %v2334_v6  ;;  %v2501_v8 = vrot.slane %v2500_v31, 1 }
0x11d1   :  { %v2336_v9 = vmul.f32 1.442695, %v2335_v7  ;;  %v2502_v10 = vmax.f32 %v2500_v31, %v2501_v8 }
0x11d3   :  { %4180 = vpow2.f32 %v2336_v9  ;;  %v2503_v11 = vsub.f32 %v2492_v57, %v2502_v10 }
0x11d5   :  { %v2504_v12 = vmul.f32 1.442695, %v2503_v11 }
0x11d7   :  { %4182 = vpow2.f32 %v2504_v12 }
0x11e0   :  { %v4181_v13 = vpop.eup %4180 }
0x11e1   :  { %v2338_v14 = vsel %vm503_vm7, %v4181_v13, 0.0 }
0x11e2   :  { %v2339_v15 = vrot.slane %v2338_v14, 4 }
0x11e4   :  { %v4183_v16 = vpop.eup %4182  ;;  %v2340_v17 = vadd.f32 %v2339_v15, %v2338_v14 }
0x11e5   :  { %v2506_v18 = vsel %vm176_vm4, %v4183_v16, 0.0 }
0x11e6   :  { %v2341_v19 = vrot.slane %v2340_v17, 2  ;;  %v2507_v20 = vrot.slane %v2506_v18, 4 }
0x11e8   :  { %v2342_v21 = vadd.f32 %v2341_v19, %v2340_v17  ;;  %v2508_v22 = vadd.f32 %v2507_v20, %v2506_v18 }
0x11ea   :  { %v2343_v23 = vrot.slane %v2342_v21, 1  ;;  %v2509_v24 = vrot.slane %v2508_v22, 2 }
0x11ec   :  { %v2344_v25 = vadd.f32 %v2343_v23, %v2342_v21  ;;  %v2510_v26 = vadd.f32 %v2509_v24, %v2508_v22 }
0x11ee   :  { %4184 = vrcp.f32 %v2344_v25  ;;  %v2511_v27 = vrot.slane %v2510_v26, 1 }
0x11f0   :  { %v2512_v28 = vadd.f32 %v2511_v27, %v2510_v26 }
0x11f2   :  { %4186 = vrcp.f32 %v2512_v28 }
0x11fb   :  { %v4185_v1 = vpop.eup %4184 }
0x11fc   :  { %v2346_v30 = vmul.f32 %v4185_v1, %v4181_v13 }
0x11fe   :  { %3719 = vst.msk [vmem:[%s4657_s5 + $0x20] sm:$0x1f] %vm503_vm7, %v2346_v30 }
0x11ff   :  { %v4187_v32 = vpop.eup %4186 }
0x1200   :  { %v2514_v33 = vmul.f32 %v4187_v32, %v4183_v16 }
0x1202   :  { %2515 = vxpose.xlu0.b32.start.end [1/1] (short) (narrow) %v2514_v33, 8 }
0x127e   :  { %v2531_v34 = vpop.trf.xlu0 }
0x127f   :  { %4038 = vmatmul.mubr.msk.f32.vlgmr.msra.gmra.mxu0 %vm228_vm5, %v2531_v34 }
0x1280   :  { %4049 = vmatprep.mubr.msk.f32.mxu0 %vm4230_vm0, %v4229_v0 }
0x133f   :  { %v2618_v35 = vpop.f32.mrf.mxu0 }
0x1340   :  { %4045 = vmatmul.mubr.msk.f32.vlgmr.msra.gmra.mxu1 %vm27_vm1, %v2618_v35 }
0x1341   :  { %v4039_v36 = vpop.f32.mrf.mxu0  ;;  %4053 = vmatpush3.msra.mxu1 %v4537_v2  ;;  %4056 = vmatprep.mubr.msk.f32.mxu1 %vm4230_vm0, %v4229_v0 }
0x1342   :  { %4054 = vmatprep.subr.mxu1 %v4229_v0 }
0x1343   :  { %4055 = vmatpush3.msra.mxu1 %v4549_v38 }
0x1344   :  { %4057 = vmatmul.mubr.msk.f32.vlgmr.msra.gmra.mxu1 %vm27_vm1, %v3768_v37  ;;  %4064 = vmatprep.subr.mxu1 %v4229_v0 }
0x1345   :  { %4065 = vmatpush3.msk.msra.mxu1 %vm232_vm3, %v3768_v37  ;;  %4066 = vmatprep.mubr.msk.f32.mxu1 %vm4230_vm0, %v4229_v0 }
0x1346   :  { %4076 = vmatprep.subr.mxu1 %v4229_v0 }
0x1400   :  { %v2691_v39 = vpop.f32.mrf.mxu1 }
0x1401   :  { %v2695_v40 = vsel %vm378_vm6, %v2691_v39, -inf }
0x1402   :  { %v2696_v41 = vrot.slane %v2695_v40, 4  ;;  %v4046_v42 = vpop.f32.mrf.mxu1 }
0x1404   :  { %v2697_v43 = vmax.f32 %v2695_v40, %v2696_v41  ;;  %v2874_v44 = vpop.f32.mrf.mxu1 }
0x1406   :  { %v2698_v45 = vrot.slane %v2697_v43, 2  ;;  %v4058_v46 = vpop.f32.mrf.mxu1 }
0x1408   :  { %v2699_v47 = vmax.f32 %v2697_v43, %v2698_v45 }
0x140a   :  { %v2700_v48 = vrot.slane %v2699_v47, 1 }
0x140c   :  { %v2701_v49 = vmax.f32 %v2699_v47, %v2700_v48 }
0x140e   :  { %v2702_v50 = vsub.f32 %v2691_v39, %v2701_v49 }
0x1410   :  { %v2703_v51 = vmul.f32 1.442695, %v2702_v50 }
0x1412   :  { %4188 = vpow2.f32 %v2703_v51  ;;  %v3775_v51 = vld [vmem:[%s4653_s0 + $0xe] sm:$0x3] }
0x141f   :  { %v4189_v52 = vpop.eup %4188 }
0x1420   :  { %v2705_v53 = vsel %vm378_vm6, %v4189_v52, 0.0 }
0x1421   :  { %v2706_v4 = vrot.slane %v2705_v53, 4 }
0x1423   :  { %v2707_v54 = vadd.f32 %v2706_v4, %v2705_v53 }
0x1425   :  { %v2708_v55 = vrot.slane %v2707_v54, 2 }
0x1427   :  { %v2709_v56 = vadd.f32 %v2708_v55, %v2707_v54 }
0x1429   :  { %v2710_v57 = vrot.slane %v2709_v56, 1 }
0x142b   :  { %v2711_v59 = vadd.f32 %v2710_v57, %v2709_v56 }
0x142d   :  { %4190 = vrcp.f32 %v2711_v59 }
0x142e   :  { %4192 = vtanh.f32 %v2874_v44 }
0x143a   :  { %v4191_v60 = vpop.eup %4190 }
0x143b   :  { %v2713_v29 = vmul.f32 %v4191_v60, %v4189_v52  ;;  %v4193_v61 = vpop.eup %4192 }
0x143d   :  { %4048 = vmatpush3.msra.mxu0 %v2713_v29 }
0x143e   :  { %4050 = vmatmul.mubr.msk.f32.vlgmr.msra.gmra.mxu0 %vm102_vm2, %v4338_v58  ;;  %4059 = vmatprep.subr.mxu0 %v4229_v0 }
0x143f   :  { %4060 = vmatpush3.msra.mxu0 %v4566_v62  ;;  %4061 = vmatprep.mubr.msk.f32.mxu0 %vm4230_vm0, %v4229_v0 }
0x1440   :  { %4069 = vmatprep.subr.mxu0 %v4229_v0 }
0x1442   :  { %4062 = vmatmul.mubr.msk.f32.vlgmr.msra.gmra.mxu0 %vm102_vm2, %v4193_v61 }
0x1443   :  { %4070 = vmatpush3.msra.mxu0 %v4576_v63  ;;  %4073 = vmatprep.mubr.msk.f32.mxu0 %vm4230_vm0, %v4229_v0 }
0x1444   :  { %4071 = vmatprep.subr.mxu0 %v4229_v0 }
0x1445   :  { %4072 = vmatpush3.msra.mxu0 %v4585_v3 }
0x1446   :  { %4081 = vmatprep.subr.mxu0 %v4229_v0 }
0x14fe   :  { %v2780_v5 = vpop.f32.mrf.mxu0 }
0x14ff   :  { %v2784_v6 = vsel %vm503_vm7, %v2780_v5, -inf }
0x1500   :  { %v2785_v31 = vrot.slane %v2784_v6, 4  ;;  %v4051_v7 = vpop.f32.mrf.mxu0 }
0x1502   :  { %v2786_v8 = vmax.f32 %v2784_v6, %v2785_v31  ;;  %v2948_v9 = vpop.f32.mrf.mxu0 }
0x1503   :  { %v2952_v10 = vsel %vm176_vm4, %v2948_v9, -inf }
0x1504   :  { %v2787_v11 = vrot.slane %v2786_v8, 2  ;;  %v2953_v12 = vrot.slane %v2952_v10, 4  ;;  %v4063_v13 = vpop.f32.mrf.mxu0 }
0x1506   :  { %v2788_v14 = vmax.f32 %v2786_v8, %v2787_v11  ;;  %v2954_v15 = vmax.f32 %v2952_v10, %v2953_v12 }
0x1508   :  { %v2789_v16 = vrot.slane %v2788_v14, 1  ;;  %v2955_v17 = vrot.slane %v2954_v15, 2 }
0x150a   :  { %v2790_v18 = vmax.f32 %v2788_v14, %v2789_v16  ;;  %v2956_v19 = vmax.f32 %v2954_v15, %v2955_v17 }
0x150c   :  { %v2791_v20 = vsub.f32 %v2780_v5, %v2790_v18  ;;  %v2957_v21 = vrot.slane %v2956_v19, 1 }
0x150e   :  { %v2792_v22 = vmul.f32 1.442695, %v2791_v20  ;;  %v2958_v23 = vmax.f32 %v2956_v19, %v2957_v21 }
0x1510   :  { %4194 = vpow2.f32 %v2792_v22  ;;  %v2959_v24 = vsub.f32 %v2948_v9, %v2958_v23 }
0x1512   :  { %v2960_v25 = vmul.f32 1.442695, %v2959_v24 }
0x1514   :  { %4196 = vpow2.f32 %v2960_v25 }
0x151d   :  { %v4195_v26 = vpop.eup %4194 }
0x151e   :  { %v2794_v27 = vsel %vm503_vm7, %v4195_v26, 0.0 }
0x151f   :  { %v2795_v28 = vrot.slane %v2794_v27, 4 }
0x1521   :  { %v4197_v1 = vpop.eup %4196  ;;  %v2796_v30 = vadd.f32 %v2795_v28, %v2794_v27 }
0x1522   :  { %v2962_v32 = vsel %vm176_vm4, %v4197_v1, 0.0 }
0x1523   :  { %v2797_v33 = vrot.slane %v2796_v30, 2  ;;  %v2963_v34 = vrot.slane %v2962_v32, 4 }
0x1525   :  { %v2798_v35 = vadd.f32 %v2797_v33, %v2796_v30  ;;  %v2964_v36 = vadd.f32 %v2963_v34, %v2962_v32 }
0x1527   :  { %v2799_v37 = vrot.slane %v2798_v35, 1  ;;  %v2965_v39 = vrot.slane %v2964_v36, 2 }
0x1529   :  { %v2800_v40 = vadd.f32 %v2799_v37, %v2798_v35  ;;  %v2966_v41 = vadd.f32 %v2965_v39, %v2964_v36 }
0x152b   :  { %4198 = vrcp.f32 %v2800_v40  ;;  %v2967_v42 = vrot.slane %v2966_v41, 1 }
0x152d   :  { %v2968_v43 = vadd.f32 %v2967_v42, %v2966_v41 }
0x152f   :  { %4200 = vrcp.f32 %v2968_v43 }
0x1538   :  { %v4199_v44 = vpop.eup %4198 }
0x1539   :  { %v2802_v45 = vmul.f32 %v4199_v44, %v4195_v26 }
0x153b   :  { %3720 = vst.msk [vmem:[%s4657_s5 + $0x28] sm:$0x1f] %vm503_vm7, %v2802_v45 }
0x153c   :  { %v4201_v46 = vpop.eup %4200 }
0x153d   :  { %v2970_v47 = vmul.f32 %v4201_v46, %v4197_v1 }
0x153f   :  { %2971 = vxpose.xlu1.b32.start.end [1/1] (short) (narrow) %v2970_v47, 8 }
0x15bb   :  { %v2987_v48 = vpop.trf.xlu1 }
0x15bc   :  { %4067 = vmatmul.mubr.msk.f32.vlgmr.msra.gmra.mxu1 %vm228_vm5, %v2987_v48 }
0x15bd   :  { %4078 = vmatprep.mubr.msk.f32.mxu1 %vm4230_vm0, %v4229_v0 }
0x167c   :  { %v3074_v49 = vpop.f32.mrf.mxu1 }
0x167d   :  { %4074 = vmatmul.mubr.msk.f32.vlgmr.msra.gmra.mxu0 %vm27_vm1, %v3074_v49 }
0x167e   :  { %v4068_v50 = vpop.f32.mrf.mxu1  ;;  %4082 = vmatpush3.msra.mxu0 %v4537_v2  ;;  %4085 = vmatprep.mubr.msk.f32.mxu0 %vm4230_vm0, %v4229_v0 }
0x167f   :  { %4083 = vmatprep.subr.mxu0 %v4229_v0 }
0x1680   :  { %4084 = vmatpush3.msra.mxu0 %v4549_v38 }
0x1681   :  { %4086 = vmatmul.mubr.msk.f32.vlgmr.msra.gmra.mxu0 %vm27_vm1, %v3775_v51  ;;  %4093 = vmatprep.subr.mxu0 %v4229_v0 }
0x1682   :  { %4094 = vmatpush3.msk.msra.mxu0 %vm232_vm3, %v3775_v51  ;;  %4095 = vmatprep.mubr.msk.f32.mxu0 %vm4230_vm0, %v4229_v0 }
0x1683   :  { %4105 = vmatprep.subr.mxu0 %v4229_v0 }
0x173d   :  { %v3147_v2 = vpop.f32.mrf.mxu0 }
0x173e   :  { %v3151_v52 = vsel %vm378_vm6, %v3147_v2, -inf }
0x173f   :  { %v3152_v53 = vrot.slane %v3151_v52, 4  ;;  %v4075_v4 = vpop.f32.mrf.mxu0 }
0x1741   :  { %v3153_v54 = vmax.f32 %v3151_v52, %v3152_v53  ;;  %v3330_v55 = vpop.f32.mrf.mxu0 }
0x1743   :  { %v3154_v56 = vrot.slane %v3153_v54, 2  ;;  %v4087_v38 = vpop.f32.mrf.mxu0 }
0x1745   :  { %v3155_v57 = vmax.f32 %v3153_v54, %v3154_v56 }
0x1747   :  { %v3156_v59 = vrot.slane %v3155_v57, 1 }
0x1749   :  { %v3157_v60 = vmax.f32 %v3155_v57, %v3156_v59 }
0x174b   :  { %v3158_v29 = vsub.f32 %v3147_v2, %v3157_v60 }
0x174d   :  { %v3159_v61 = vmul.f32 1.442695, %v3158_v29 }
0x174f   :  { %4202 = vpow2.f32 %v3159_v61 }
0x175c   :  { %v4203_v5 = vpop.eup %4202 }
0x175d   :  { %v3161_v6 = vsel %vm378_vm6, %v4203_v5, 0.0 }
0x175e   :  { %v3162_v31 = vrot.slane %v3161_v6, 4 }
0x1760   :  { %v3163_v7 = vadd.f32 %v3162_v31, %v3161_v6 }
0x1762   :  { %v3164_v8 = vrot.slane %v3163_v7, 2 }
0x1764   :  { %v3165_v9 = vadd.f32 %v3164_v8, %v3163_v7 }
0x1766   :  { %v3166_v10 = vrot.slane %v3165_v9, 1 }
0x1768   :  { %v3167_v11 = vadd.f32 %v3166_v10, %v3165_v9 }
0x176a   :  { %4204 = vrcp.f32 %v3167_v11 }
0x176b   :  { %4206 = vtanh.f32 %v3330_v55 }
0x1777   :  { %v4205_v12 = vpop.eup %4204 }
0x1778   :  { %v3169_v13 = vmul.f32 %v4205_v12, %v4203_v5  ;;  %v4207_v14 = vpop.eup %4206 }
0x177a   :  { %4077 = vmatpush3.msra.mxu1 %v3169_v13 }
0x177b   :  { %4079 = vmatmul.mubr.msk.f32.vlgmr.msra.gmra.mxu1 %vm102_vm2, %v4338_v58  ;;  %4088 = vmatprep.subr.mxu1 %v4229_v0 }
0x177c   :  { %4089 = vmatpush3.msra.mxu1 %v4566_v62  ;;  %4090 = vmatprep.mubr.msk.f32.mxu1 %vm4230_vm0, %v4229_v0 }
0x177d   :  { %4098 = vmatprep.subr.mxu1 %v4229_v0 }
0x177f   :  { %4091 = vmatmul.mubr.msk.f32.vlgmr.msra.gmra.mxu1 %vm102_vm2, %v4207_v14 }
0x1780   :  { %4099 = vmatpush3.msra.mxu1 %v4576_v63  ;;  %4102 = vmatprep.mubr.msk.f32.mxu1 %vm4230_vm0, %v4229_v0 }
0x1781   :  { %4100 = vmatprep.subr.mxu1 %v4229_v0 }
0x1782   :  { %4101 = vmatpush3.msra.mxu1 %v4585_v3 }
0x183b   :  { %v3236_v15 = vpop.f32.mrf.mxu1 }
0x183c   :  { %v3240_v16 = vsel %vm503_vm7, %v3236_v15, -inf }
0x183d   :  { %v3241_v62 = vrot.slane %v3240_v16, 4  ;;  %v4080_v17 = vpop.f32.mrf.mxu1 }
0x183f   :  { %v3242_v18 = vmax.f32 %v3240_v16, %v3241_v62  ;;  %v3404_v19 = vpop.f32.mrf.mxu1 }
0x1840   :  { %v3408_v20 = vsel %vm176_vm4, %v3404_v19, -inf }
0x1841   :  { %v3243_v21 = vrot.slane %v3242_v18, 2  ;;  %v3409_v22 = vrot.slane %v3408_v20, 4  ;;  %v4092_v23 = vpop.f32.mrf.mxu1 }
0x1843   :  { %v3244_v63 = vmax.f32 %v3242_v18, %v3243_v21  ;;  %v3410_v24 = vmax.f32 %v3408_v20, %v3409_v22 }
0x1845   :  { %v3245_v25 = vrot.slane %v3244_v63, 1  ;;  %v3411_v26 = vrot.slane %v3410_v24, 2 }
0x1847   :  { %v3246_v27 = vmax.f32 %v3244_v63, %v3245_v25  ;;  %v3412_v28 = vmax.f32 %v3410_v24, %v3411_v26 }
0x1849   :  { %v3247_v1 = vsub.f32 %v3236_v15, %v3246_v27  ;;  %v3413_v3 = vrot.slane %v3412_v28, 1 }
0x184b   :  { %v3248_v30 = vmul.f32 1.442695, %v3247_v1  ;;  %v3414_v32 = vmax.f32 %v3412_v28, %v3413_v3 }
0x184d   :  { %4208 = vpow2.f32 %v3248_v30  ;;  %v3415_v33 = vsub.f32 %v3404_v19, %v3414_v32 }
0x184f   :  { %v3416_v34 = vmul.f32 1.442695, %v3415_v33 }
0x1851   :  { %4210 = vpow2.f32 %v3416_v34 }
0x185a   :  { %v4209_v35 = vpop.eup %4208 }
0x185b   :  { %v3250_v36 = vsel %vm503_vm7, %v4209_v35, 0.0 }
0x185c   :  { %v3251_v37 = vrot.slane %v3250_v36, 4 }
0x185e   :  { %v4211_v39 = vpop.eup %4210  ;;  %v3252_v40 = vadd.f32 %v3251_v37, %v3250_v36 }
0x185f   :  { %v3418_v41 = vsel %vm176_vm4, %v4211_v39, 0.0 }
0x1860   :  { %v3253_v42 = vrot.slane %v3252_v40, 2  ;;  %v3419_v43 = vrot.slane %v3418_v41, 4 }
0x1862   :  { %v3254_v44 = vadd.f32 %v3253_v42, %v3252_v40  ;;  %v3420_v45 = vadd.f32 %v3419_v43, %v3418_v41 }
0x1864   :  { %v3255_v46 = vrot.slane %v3254_v44, 1  ;;  %v3421_v47 = vrot.slane %v3420_v45, 2 }
0x1866   :  { %v3256_v48 = vadd.f32 %v3255_v46, %v3254_v44  ;;  %v3422_v49 = vadd.f32 %v3421_v47, %v3420_v45 }
0x1868   :  { %4212 = vrcp.f32 %v3256_v48  ;;  %v3423_v50 = vrot.slane %v3422_v49, 1 }
0x186a   :  { %v3424_v51 = vadd.f32 %v3423_v50, %v3422_v49 }
0x186c   :  { %4214 = vrcp.f32 %v3424_v51 }
0x1875   :  { %v4213_v2 = vpop.eup %4212 }
0x1876   :  { %v3258_v52 = vmul.f32 %v4213_v2, %v4209_v35 }
0x1878   :  { %3721 = vst.msk [vmem:[%s4657_s5 + $0x30] sm:$0x1f] %vm503_vm7, %v3258_v52 }
0x1879   :  { %v4215_v53 = vpop.eup %4214 }
0x187a   :  { %v3426_v4 = vmul.f32 %v4215_v53, %v4211_v39 }
0x187c   :  { %3427 = vxpose.xlu0.b32.start.end [1/1] (short) (narrow) %v3426_v4, 8 }
0x18f8   :  { %v3443_v54 = vpop.trf.xlu0 }
0x18f9   :  { %4096 = vmatmul.mubr.msk.f32.vlgmr.msra.gmra.mxu0 %vm228_vm5, %v3443_v54 }
0x18fa   :  { %4107 = vmatprep.mubr.msk.f32.mxu0 %vm4230_vm0, %v4229_v0 }
0x19b9   :  { %v3530_v55 = vpop.f32.mrf.mxu0 }
0x19ba   :  { %4103 = vmatmul.mubr.msk.f32.vlgmr.msra.gmra.mxu1 %vm27_vm1, %v3530_v55 }
0x19bb   :  { %v4097_v56 = vpop.f32.mrf.mxu0 }
0x1a7a   :  { %v3603_v38 = vpop.f32.mrf.mxu1 }
0x1a7b   :  { %v3607_v57 = vsel %vm378_vm6, %v3603_v38, -inf }
0x1a7c   :  { %v3608_v59 = vrot.slane %v3607_v57, 4  ;;  %v4104_v60 = vpop.f32.mrf.mxu1 }
0x1a7e   :  { %v3609_v29 = vmax.f32 %v3607_v57, %v3608_v59 }
0x1a80   :  { %v3610_v61 = vrot.slane %v3609_v29, 2 }
0x1a82   :  { %v3611_v5 = vmax.f32 %v3609_v29, %v3610_v61 }
0x1a84   :  { %v3612_v6 = vrot.slane %v3611_v5, 1 }
0x1a86   :  { %v3613_v31 = vmax.f32 %v3611_v5, %v3612_v6 }
0x1a88   :  { %v3614_v7 = vsub.f32 %v3603_v38, %v3613_v31 }
0x1a8a   :  { %v3615_v8 = vmul.f32 1.442695, %v3614_v7 }
0x1a8c   :  { %4216 = vpow2.f32 %v3615_v8 }
0x1a99   :  { %v4217_v9 = vpop.eup %4216 }
0x1a9a   :  { %v3617_v0 = vsel %vm378_vm6, %v4217_v9, 0.0 }
0x1a9b   :  { %v3618_v10 = vrot.slane %v3617_v0, 4 }
0x1a9d   :  { %v3619_v11 = vadd.f32 %v3618_v10, %v3617_v0 }
0x1a9f   :  { %v3620_v12 = vrot.slane %v3619_v11, 2 }
0x1aa1   :  { %v3621_v13 = vadd.f32 %v3620_v12, %v3619_v11 }
0x1aa3   :  { %v3622_v14 = vrot.slane %v3621_v13, 1 }
0x1aa5   :  { %v3623_v15 = vadd.f32 %v3622_v14, %v3621_v13 }
0x1aa7   :  { %4218 = vrcp.f32 %v3623_v15 }
0x1ab4   :  { %v4219_v16 = vpop.eup %4218 }
0x1ab5   :  { %v3625_v62 = vmul.f32 %v4219_v16, %v4217_v9 }
0x1ab7   :  { %4106 = vmatpush3.msra.mxu0 %v3625_v62 }
0x1ab8   :  { %4108 = vmatmul.mubr.msk.f32.vlgmr.msra.gmra.mxu0 %vm102_vm2, %v4338_v58 }
0x1b78   :  { %v3692_v17 = vpop.f32.mrf.mxu0 }
0x1b79   :  { %v3696_v18 = vsel %vm503_vm7, %v3692_v17, -inf }
0x1b7a   :  { %v3697_v19 = vrot.slane %v3696_v18, 4  ;;  %v4109_v20 = vpop.f32.mrf.mxu0 }
0x1b7c   :  { %v3698_v21 = vmax.f32 %v3696_v18, %v3697_v19 }
0x1b7e   :  { %v3699_v22 = vrot.slane %v3698_v21, 2 }
0x1b80   :  { %v3700_v23 = vmax.f32 %v3698_v21, %v3699_v22 }
0x1b82   :  { %v3701_v63 = vrot.slane %v3700_v23, 1 }
0x1b84   :  { %v3702_v24 = vmax.f32 %v3700_v23, %v3701_v63 }
0x1b86   :  { %v3703_v25 = vsub.f32 %v3692_v17, %v3702_v24 }
0x1b88   :  { %v3704_v26 = vmul.f32 1.442695, %v3703_v25 }
0x1b8a   :  { %4220 = vpow2.f32 %v3704_v26 }
0x1b97   :  { %v4221_v27 = vpop.eup %4220 }
0x1b98   :  { %v3706_v28 = vsel %vm503_vm7, %v4221_v27, 0.0 }
0x1b99   :  { %v3707_v1 = vrot.slane %v3706_v28, 4 }
0x1b9b   :  { %v3708_v3 = vadd.f32 %v3707_v1, %v3706_v28 }
0x1b9d   :  { %v3709_v30 = vrot.slane %v3708_v3, 2 }
0x1b9f   :  { %v3710_v58 = vadd.f32 %v3709_v30, %v3708_v3 }
0x1ba1   :  { %v3711_v32 = vrot.slane %v3710_v58, 1 }
0x1ba3   :  { %v3712_v33 = vadd.f32 %v3711_v32, %v3710_v58 }
0x1ba5   :  { %4222 = vrcp.f32 %v3712_v33 }
0x1bb2   :  { %v4223_v34 = vpop.eup %4222 }
0x1bb3   :  { %v3714_v35 = vmul.f32 %v4223_v34, %v4221_v27 }
0x1bb5   :  { %3722 = vst.msk [vmem:[%s4657_s5 + $0x38] sm:$0x1f] %vm503_vm7, %v3714_v35 }

</bundles_post_ra>
